<compile_context>
chip_gen: v6e
topology: v6e:2x2x1
jax: 0.10.0
libtpu: 0.0.40
codegen_flags: <defaults>
</compile_context>

<pallas_src>
import math
from functools import partial

import jax
import jax.numpy as jnp
from jax.experimental import pallas as pl
from jax.experimental.pallas import tpu as pltpu

# ----------------------------- config (small, synthetic) -----------------------------
CFG = dict(
    model_dim=64,
    time_embed_dim=64,
    num_heads=2,
    num_layers=2,
    in_channels=4,
    out_channels=4,
    patch_size=2,
    text_dim=32,
    layer_norm_eps=1e-5,
    mini_batch_size=16,
    gating_alpha_init=0.1,
    theta=10000.0,
)

MXU_DTYPE = jnp.bfloat16          # MXU operand dtype; f32 accumulation
RES_DTYPE = jnp.bfloat16          # residual-stream / Q / KV HBM dtype


def _tpu_budgets():
    """Generation-dependent tile + scoped-VMEM budgets (queried at trace/setup time)."""
    vmem = 64 * 1024 * 1024
    try:
        info = pltpu.get_tpu_info()
        vmem = int(getattr(info, "vmem_capacity_bytes", vmem))
    except Exception:
        pass
    if vmem >= 96 * 1024 * 1024:
        # v5e / v6e: 128 MiB physical VMEM -> big row tiles, generous scoped budget
        return 512, 256, 100 * 1024 * 1024
    # v7x: 64 MiB physical VMEM -> smaller tiles, leave double-buffer + scratch headroom
    return 256, 128, 44 * 1024 * 1024


TOKEN_BLOCK_TARGET, KV_BLOCK_TARGET, VMEM_LIMIT = _tpu_budgets()


def _cparams(*sems):
    return pltpu.CompilerParams(dimension_semantics=sems, vmem_limit_bytes=VMEM_LIMIT)


def _round8(n):
    return ((n + 7) // 8) * 8


def _pick_block(n, target):
    """Row-tile size (multiple of 8) and number of tiles covering n with minimal padding."""
    nt = max(1, -(-n // target))
    bm = _round8(-(-n // nt))
    return bm, nt


def _choose_seq_tiles(S):
    """Token row tile (bm), number of tiles, and flash kv tile (bkv divides bm)."""
    bm, nt = _pick_block(S, TOKEN_BLOCK_TARGET)
    if bm >= 128:
        bm = -(-bm // 128) * 128                      # lane-friendly row tiles
        bkv = KV_BLOCK_TARGET if bm % KV_BLOCK_TARGET == 0 else 128
    else:
        bkv = bm
    return bm, nt, bkv


def _ln(x, g, b, eps):
    mu = jnp.mean(x, axis=-1, keepdims=True)
    var = jnp.mean(jnp.square(x - mu), axis=-1, keepdims=True)
    return (x - mu) * jax.lax.rsqrt(var + eps) * g + b


# ----------------------------- generic tiled linear (patch / text embedding) -----------------------------

def _linear_kernel(x_ref, w_ref, b_ref, o_ref):
    y = jnp.dot(x_ref[...].astype(w_ref.dtype), w_ref[...],
                preferred_element_type=jnp.float32) + b_ref[...]
    o_ref[...] = y.astype(o_ref.dtype)


def pallas_linear(x, w_kn, b_row, out_dtype=RES_DTYPE):
    """x: (..., K); w_kn: (K, N) pre-transposed (bf16); b_row: (1, N) f32."""
    lead = x.shape[:-1]
    K = x.shape[-1]
    N = w_kn.shape[1]
    x2 = x.reshape(-1, K)
    M = x2.shape[0]
    bm, nt = _pick_block(M, max(512, TOKEN_BLOCK_TARGET))
    Mp = bm * nt
    if Mp > M:
        x2 = jnp.pad(x2, ((0, Mp - M), (0, 0)))
    out = pl.pallas_call(
        _linear_kernel,
        out_shape=jax.ShapeDtypeStruct((Mp, N), out_dtype),
        grid=(nt,),
        in_specs=[pl.BlockSpec((bm, K), lambda i: (i, 0)),
                  pl.BlockSpec((K, N), lambda i: (0, 0)),    # weights resident across tiles
                  pl.BlockSpec((1, N), lambda i: (0, 0))],
        out_specs=pl.BlockSpec((bm, N), lambda i: (i, 0)),
        compiler_params=_cparams("parallel"),
    )(x2, w_kn, b_row)
    if Mp > M:
        out = out[:M]
    return out.reshape(*lead, N)


# ----------------------------- fused pre-attention kernel -----------------------------
# LayerNorm -> adaLN modulate (text/video per row) -> fused QKV matmul -> per-head q/k
# LayerNorm -> rotate-half RoPE (identity rows for text / padding) -> q pre-scaled by
# 1/sqrt(hd); outputs Q (md lanes) and fused KV (2*md lanes, dense store).

def _pre_attn_kernel(emb_ref, g_ref, b_ref, sht_ref, sct_ref, shv_ref, scv_ref,
                     w_ref, bias_ref, cos_ref, sin_ref,
                     qg_ref, qb_ref, kg_ref, kb_ref,
                     q_out, kv_out,
                     *, nh, hd, eps, text_len, bm, sm_scale):
    i = pl.program_id(1)
    md = nh * hd
    x = emb_ref[0].astype(jnp.float32)                                  # (bm, md)
    xn = _ln(x, g_ref[...], b_ref[...], eps)
    row = i * bm + jax.lax.broadcasted_iota(jnp.int32, (bm, 1), 0)
    is_text = row < text_len
    scale = jnp.where(is_text, sct_ref[0], scv_ref[0])
    shift = jnp.where(is_text, sht_ref[0], shv_ref[0])
    xm = xn * (1.0 + scale) + shift

    y = jnp.dot(xm.astype(w_ref.dtype), w_ref[...],
                preferred_element_type=jnp.float32) + bias_ref[...]     # (bm, 3*md)

    cos = cos_ref[...]
    sin = sin_ref[...]                                                  # sign-folded sin table
    half = hd // 2

    def rope(t):
        rot = jnp.concatenate([t[:, half:], t[:, :half]], axis=-1)      # sign lives in sin table
        return t * cos + rot * sin

    qs, ks = [], []
    for h in range(nh):                                                 # static head loop (lane slices)
        qh = _ln(y[:, h * hd:(h + 1) * hd], qg_ref[...], qb_ref[...], eps)
        kh = _ln(y[:, md + h * hd: md + (h + 1) * hd], kg_ref[...], kb_ref[...], eps)
        qs.append(rope(qh) * sm_scale)                                  # fold softmax scale into q
        ks.append(rope(kh))

    q_out[0] = jnp.concatenate(qs, axis=-1).astype(q_out.dtype)
    kv_out[0] = jnp.concatenate(ks + [y[:, 2 * md:]], axis=-1).astype(kv_out.dtype)


def pallas_pre_attention(emb, lp, sh_t, sc_t, sh_v, sc_v, cos, sin, text_len, bm, eps, nh, hd):
    B, S_pad, md = emb.shape
    nt = S_pad // bm
    seq = lambda: pl.BlockSpec((1, bm, md), lambda b, i: (b, i, 0))
    shared = lambda n: pl.BlockSpec((1, n), lambda b, i: (0, 0))
    perb = lambda: pl.BlockSpec((1, 1, md), lambda b, i: (b, 0, 0))
    q_sd = jax.ShapeDtypeStruct((B, S_pad, md), RES_DTYPE)
    kv_sd = jax.ShapeDtypeStruct((B, S_pad, 2 * md), RES_DTYPE)
    return pl.pallas_call(
        partial(_pre_attn_kernel, nh=nh, hd=hd, eps=eps, text_len=text_len, bm=bm,
                sm_scale=1.0 / math.sqrt(hd)),
        out_shape=(q_sd, kv_sd),
        grid=(B, nt),
        in_specs=[seq(),
                  shared(md), shared(md),                       # pre_seq_layernorm gamma/beta
                  perb(), perb(), perb(), perb(),               # shift_t, scale_t, shift_v, scale_v
                  pl.BlockSpec((md, 3 * md), lambda b, i: (0, 0)),
                  pl.BlockSpec((1, 3 * md), lambda b, i: (0, 0)),
                  pl.BlockSpec((bm, hd), lambda b, i: (i, 0)),  # rope cos
                  pl.BlockSpec((bm, hd), lambda b, i: (i, 0)),  # rope sin (sign-folded)
                  pl.BlockSpec((1, hd), lambda b, i: (0, 0)),
                  pl.BlockSpec((1, hd), lambda b, i: (0, 0)),
                  pl.BlockSpec((1, hd), lambda b, i: (0, 0)),
                  pl.BlockSpec((1, hd), lambda b, i: (0, 0))],
        out_specs=(pl.BlockSpec((1, bm, md), lambda b, i: (b, i, 0)),
                   pl.BlockSpec((1, bm, 2 * md), lambda b, i: (b, i, 0))),
        compiler_params=_cparams("parallel", "parallel"),
    )(emb, lp["ln1_g"], lp["ln1_b"], sh_t, sc_t, sh_v, sc_v,
      lp["qkv_w"], lp["qkv_b"], cos, sin,
      lp["qn_g"], lp["qn_b"], lp["kn_g"], lp["kn_b"])


# ----------------------------- flash attention (online softmax, decoupled q/kv tiles) -----------------------------

def _flash_attn_kernel(q_ref, kv_ref, bias_ref, o_ref, m_ref, l_ref, acc_ref,
                       *, nh, hd, bq, bkv, seq_len):
    kvi = pl.program_id(2)
    md = nh * hd

    @pl.when(kvi == 0)
    def _():
        m_ref[...] = jnp.full((nh, bq, 1), -1e30, jnp.float32)
        l_ref[...] = jnp.zeros((nh, bq, 1), jnp.float32)
        acc_ref[...] = jnp.zeros((nh, bq, hd), jnp.float32)

    @pl.when(kvi * bkv < seq_len)                               # skip fully-padded kv tiles
    def _():
        q = q_ref[0]                                            # (bq, md) bf16, pre-scaled by 1/sqrt(hd)
        kv = kv_ref[0]                                          # (bkv, 2*md) bf16
        bias = bias_ref[...]                                    # (1, bkv): 0 valid / -1e30 pad
        for h in range(nh):                                     # static head loop (lane slices)
            qh = q[:, h * hd:(h + 1) * hd]
            kh = kv[:, h * hd:(h + 1) * hd]
            vh = kv[:, md + h * hd: md + (h + 1) * hd]
            s = jax.lax.dot_general(qh, kh, (((1,), (1,)), ((), ())),
                                    preferred_element_type=jnp.float32) + bias
            m_prev = m_ref[h]
            m_new = jnp.maximum(m_prev, jnp.max(s, axis=-1, keepdims=True))
            alpha = jnp.exp(m_prev - m_new)
            p = jnp.exp(s - m_new)
            l_ref[h] = alpha * l_ref[h] + jnp.sum(p, axis=-1, keepdims=True)
            m_ref[h] = m_new
            pv = jnp.dot(p.astype(kv.dtype), vh, preferred_element_type=jnp.float32)
            acc_ref[h] = alpha * acc_ref[h] + pv

    @pl.when(kvi == pl.num_programs(2) - 1)
    def _():
        parts = [acc_ref[h] * pl.reciprocal(l_ref[h], approx=True) for h in range(nh)]
        o_ref[0] = jnp.concatenate(parts, axis=-1).astype(o_ref.dtype)


def pallas_flash_attention(q, kv, kv_bias, seq_len, nh, hd, bq, bkv):
    B, S_pad, md = q.shape
    ntq = S_pad // bq
    ntk = S_pad // bkv
    return pl.pallas_call(
        partial(_flash_attn_kernel, nh=nh, hd=hd, bq=bq, bkv=bkv, seq_len=seq_len),
        out_shape=jax.ShapeDtypeStruct((B, S_pad, md), q.dtype),
        grid=(B, ntq, ntk),
        in_specs=[pl.BlockSpec((1, bq, md), lambda b, qi, ki: (b, qi, 0)),
                  pl.BlockSpec((1, bkv, 2 * md), lambda b, qi, ki: (b, ki, 0)),
                  pl.BlockSpec((1, bkv), lambda b, qi, ki: (0, ki))],
        out_specs=pl.BlockSpec((1, bq, md), lambda b, qi, ki: (b, qi, 0)),
        scratch_shapes=[pltpu.VMEM((nh, bq, 1), jnp.float32),    # running max
                        pltpu.VMEM((nh, bq, 1), jnp.float32),    # running sum
                        pltpu.VMEM((nh, bq, hd), jnp.float32)],  # accumulator
        compiler_params=_cparams("parallel", "parallel", "arbitrary"),
    )(q, kv, kv_bias)


# ----------------------------- fused post-attention kernel -----------------------------
# o-proj + SSM gate + adaLN-gated residual, then LN2 + adaLN modulate + MLP + gated residual
# in the same row tile -> one fewer full residual-stream HBM round trip per layer.

def _post_attn_kernel(attn_ref, emb_ref,
                      ow_ref, ob_ref, ssmt_ref, ssmv_ref, gat_ref, gav_ref,
                      g2_ref, b2_ref, sht_ref, sct_ref, shv_ref, scv_ref, gmt_ref, gmv_ref,
                      w1_ref, b1_ref, w2_ref, b2m_ref,
                      o_ref, *, eps, text_len, bm):
    i = pl.program_id(1)
    row = i * bm + jax.lax.broadcasted_iota(jnp.int32, (bm, 1), 0)
    is_text = row < text_len

    # --- attention output projection + SSM gate + gated residual ---
    y = jnp.dot(attn_ref[0].astype(ow_ref.dtype), ow_ref[...],
                preferred_element_type=jnp.float32) + ob_ref[...]
    ssm = jnp.where(is_text, ssmt_ref[...], ssmv_ref[...])      # (1+tanh(fwd))*(1+tanh(bwd))
    gate_a = jnp.where(is_text, gat_ref[0], gav_ref[0])         # adaLN gate per segment / batch
    x = emb_ref[0].astype(jnp.float32) + gate_a * (ssm * y)

    # --- LN2 + modulate + MLP + gated residual ---
    xn = _ln(x, g2_ref[...], b2_ref[...], eps)
    scale = jnp.where(is_text, sct_ref[0], scv_ref[0])
    shift = jnp.where(is_text, sht_ref[0], shv_ref[0])
    xm = xn * (1.0 + scale) + shift
    h = jnp.dot(xm.astype(w1_ref.dtype), w1_ref[...],
                preferred_element_type=jnp.float32) + b1_ref[...]
    h = jax.nn.gelu(h, approximate=True)                        # == F.gelu(..., approximate='tanh')
    y2 = jnp.dot(h.astype(w2_ref.dtype), w2_ref[...],
                 preferred_element_type=jnp.float32) + b2m_ref[...]
    gate_m = jnp.where(is_text, gmt_ref[0], gmv_ref[0])
    o_ref[0] = (x + gate_m * y2).astype(o_ref.dtype)


def pallas_post_attn_mlp(attn, emb, lp, ssm_t, ssm_v, g_t, g_v,
                         msh_t, msc_t, msh_v, msc_v, mg_t, mg_v, text_len, bm, eps):
    B, S_pad, md = emb.shape
    hidden = lp["mlp_w1"].shape[1]
    nt = S_pad // bm
    seq = lambda: pl.BlockSpec((1, bm, md), lambda bb, i: (bb, i, 0))
    shared = lambda n: pl.BlockSpec((1, n), lambda bb, i: (0, 0))
    perb = lambda: pl.BlockSpec((1, 1, md), lambda bb, i: (bb, 0, 0))
    return pl.pallas_call(
        partial(_post_attn_kernel, eps=eps, text_len=text_len, bm=bm),
        out_shape=jax.ShapeDtypeStruct((B, S_pad, md), emb.dtype),
        grid=(B, nt),
        in_specs=[seq(), seq(),
                  pl.BlockSpec((md, md), lambda bb, i: (0, 0)), shared(md),   # o_w, o_b
                  shared(md), shared(md),                                     # ssm_t, ssm_v
                  perb(), perb(),                                             # attn gate text/vid
                  shared(md), shared(md),                                     # ln2 gamma/beta
                  perb(), perb(), perb(), perb(),                             # mlp shift/scale (t,v)
                  perb(), perb(),                                             # mlp gate text/vid
                  pl.BlockSpec((md, hidden), lambda bb, i: (0, 0)), shared(hidden),
                  pl.BlockSpec((hidden, md), lambda bb, i: (0, 0)), shared(md)],
        out_specs=seq(),
        compiler_params=_cparams("parallel", "parallel"),
    )(attn, emb, lp["o_w"], lp["o_b"], ssm_t, ssm_v, g_t, g_v,
      lp["ln2_g"], lp["ln2_b"], msh_t, msc_t, msh_v, msc_v, mg_t, mg_v,
      lp["mlp_w1"], lp["mlp_b1"], lp["mlp_w2"], lp["mlp_b2"])


# ----------------------------- fused final (transformer_norm + FinalLayer) -----------------------------

def _final_kernel(x_ref, tg_ref, tb_ref, fg_ref, fb_ref, sh_ref, sc_ref, w_ref, b_ref, o_ref, *, eps):
    x = x_ref[0].astype(jnp.float32)
    x = _ln(x, tg_ref[...], tb_ref[...], eps)                  # transformer_norm
    x = _ln(x, fg_ref[...], fb_ref[...], eps)                  # final_layer.norm
    x = x * (1.0 + sc_ref[0]) + sh_ref[0]                      # modulate
    y = jnp.dot(x.astype(w_ref.dtype), w_ref[...],
                preferred_element_type=jnp.float32) + b_ref[...]
    o_ref[0] = y.astype(o_ref.dtype)                           # lane-padded (>=128) dense store


def pallas_final(vid, tn_g, tn_b, fn_g, fn_b, shift, scale, w, b, eps):
    B, L, md = vid.shape
    npad = w.shape[1]
    bm, nt = _pick_block(L, TOKEN_BLOCK_TARGET)
    Lp = bm * nt
    if Lp > L:
        vid = jnp.pad(vid, ((0, 0), (0, Lp - L), (0, 0)))
    out = pl.pallas_call(
        partial(_final_kernel, eps=eps),
        out_shape=jax.ShapeDtypeStruct((B, Lp, npad), jnp.float32),
        grid=(B, nt),
        in_specs=[pl.BlockSpec((1, bm, md), lambda bb, i: (bb, i, 0)),
                  pl.BlockSpec((1, md), lambda bb, i: (0, 0)),
                  pl.BlockSpec((1, md), lambda bb, i: (0, 0)),
                  pl.BlockSpec((1, md), lambda bb, i: (0, 0)),
                  pl.BlockSpec((1, md), lambda bb, i: (0, 0)),
                  pl.BlockSpec((1, 1, md), lambda bb, i: (bb, 0, 0)),
                  pl.BlockSpec((1, 1, md), lambda bb, i: (bb, 0, 0)),
                  pl.BlockSpec((md, npad), lambda bb, i: (0, 0)),
                  pl.BlockSpec((1, npad), lambda bb, i: (0, 0))],
        out_specs=pl.BlockSpec((1, bm, npad), lambda bb, i: (bb, i, 0)),
        compiler_params=_cparams("parallel", "parallel"),
    )(vid, tn_g, tn_b, fn_g, fn_b, shift, scale, w, b)
    return out[:, :L]


# ----------------------------- plain-JAX glue -----------------------------

def timestep_embedding(t, dim, max_period=10000.0):
    half = dim // 2
    freqs = jnp.exp(-math.log(max_period) * jnp.arange(half, dtype=jnp.float32) / half)
    args = t.astype(jnp.float32)[:, None] * freqs[None, :]
    return jnp.concatenate([jnp.cos(args), jnp.sin(args)], axis=-1)


def make_rope_3d(num_frames, hp, wp, head_dim, theta):
    # TODO(synk): Rotary3DPositionEmbedding source not provided; CogVideoX-style 3D rotate-half RoPE.
    d_t = head_dim // 4
    d_h = (head_dim - d_t) // 2
    d_w = head_dim - d_t - d_h

    def axis_freqs(d):
        return 1.0 / (theta ** (jnp.arange(0, d, 2, dtype=jnp.float32) / d))

    ft, fh, fw = axis_freqs(d_t), axis_freqs(d_h), axis_freqs(d_w)
    t = jnp.arange(num_frames, dtype=jnp.float32)
    h = jnp.arange(hp, dtype=jnp.float32)
    w = jnp.arange(wp, dtype=jnp.float32)
    tg, hg, wg = jnp.meshgrid(t, h, w, indexing="ij")           # token order: (t, h, w)
    tg, hg, wg = tg.reshape(-1), hg.reshape(-1), wg.reshape(-1)
    ang = jnp.concatenate(
        [tg[:, None] * ft[None, :], hg[:, None] * fh[None, :], wg[:, None] * fw[None, :]],
        axis=-1)                                                # (N_vid, head_dim // 2)
    cos = jnp.concatenate([jnp.cos(ang), jnp.cos(ang)], axis=-1)
    # rotate-half sign folded into the sin table: out = t*cos + [t_hi|t_lo]*sin_signed
    sin = jnp.concatenate([-jnp.sin(ang), jnp.sin(ang)], axis=-1)
    return cos, sin


def build_rope_tables(T, hp, wp, hd, theta, text_len, s_pad):
    """Full (S_pad, hd) cos/sin tables; identity rotation (cos=1, sin=0) for text + pad rows."""
    cos_v, sin_v = make_rope_3d(T, hp, wp, hd, theta)
    n_vid = T * hp * wp
    n_tail = s_pad - text_len - n_vid
    cos = jnp.concatenate([jnp.ones((text_len, hd), jnp.float32), cos_v,
                           jnp.ones((n_tail, hd), jnp.float32)], axis=0)
    sin = jnp.concatenate([jnp.zeros((text_len, hd), jnp.float32), sin_v,
                           jnp.zeros((n_tail, hd), jnp.float32)], axis=0)
    return cos, sin


def transformer_layer(lp, emb, t_emb, text_len, seq_len, cos, sin, kv_bias, bm, bkv, cfg):
    md = cfg["model_dim"]
    nh = cfg["num_heads"]
    hd = md // nh
    eps = cfg["layer_norm_eps"]
    B = emb.shape[0]
    silu_t = jax.nn.silu(t_emb)

    def chunks6(w, b):
        # tiny (B, ted) x (ted, 6*md) matmul -> leave to XLA
        m = jnp.dot(silu_t, w) + b
        return [c.reshape(B, 1, md) for c in jnp.split(m, 6, axis=-1)]

    # adaLN order matches PyTorch chunk(6): vid shift/scale/gate, then text shift/scale/gate
    sh_v, sc_v, g_v, sh_t, sc_t, g_t = chunks6(lp["pre_seq_ada_w"], lp["pre_seq_ada_b"])

    q, kv = pallas_pre_attention(emb, lp, sh_t, sc_t, sh_v, sc_v, cos, sin,
                                 text_len, bm, eps, nh, hd)
    attn = pallas_flash_attention(q, kv, kv_bias, seq_len, nh, hd, bm, bkv)

    # TODO(synk): identity SSM -> the forward/backward gated residuals collapse to a per-segment scale.
    ssm_t = (1.0 + jnp.tanh(lp["fg_text"])) * (1.0 + jnp.tanh(lp["bg_text"]))
    ssm_v = (1.0 + jnp.tanh(lp["fg_vid"])) * (1.0 + jnp.tanh(lp["bg_vid"]))

    msh_v, msc_v, mg_v, msh_t, msc_t, mg_t = chunks6(lp["pre_mlp_ada_w"], lp["pre_mlp_ada_b"])
    emb = pallas_post_attn_mlp(attn, emb, lp, ssm_t, ssm_v, g_t, g_v,
                               msh_t, msc_t, msh_v, msc_v, mg_t, mg_v, text_len, bm, eps)
    return emb


def diffusion_transformer_forward(params, video, text, timesteps):
    cfg = CFG
    B, T, C, H, W = video.shape
    p = cfg["patch_size"]
    md = cfg["model_dim"]
    outc = cfg["out_channels"]
    eps = cfg["layer_norm_eps"]
    nh = cfg["num_heads"]
    hd = md // nh
    text_len = text.shape[-2]
    num_chunks = text.shape[1]
    seq_text_len = text_len * num_chunks
    hp, wp = H // p, W // p
    n_vid = T * hp * wp
    S = seq_text_len + n_vid

    # ---- timestep embedding + time MLP (tiny -> plain XLA, f32) ----
    t_emb = timestep_embedding(timesteps, md)
    t_emb = jnp.dot(t_emb, params["time_w1"]) + params["time_b1"]
    t_emb = jax.nn.silu(t_emb)
    t_emb = jnp.dot(t_emb, params["time_w2"]) + params["time_b2"]

    # ---- patch embedding (Conv2d with kernel=stride=p == patch-extract + matmul), bf16 out ----
    patches = video.reshape(B * T, C, hp, p, wp, p)
    patches = patches.transpose(0, 2, 4, 1, 3, 5).reshape(B * T * hp * wp, C * p * p)
    vid_emb = pallas_linear(patches, params["vid_proj_w"], params["vid_proj_b"]).reshape(B, n_vid, md)
    text_emb = pallas_linear(text.reshape(-1, text.shape[-1]),
                             params["text_proj_w"], params["text_proj_b"])
    text_emb = text_emb.reshape(B, seq_text_len, md)            # 'b (c s) e'

    # ---- assemble padded [text ; video] sequence once (bf16 residual stream) ----
    bm, nt, bkv = _choose_seq_tiles(S)
    s_pad = bm * nt
    emb = jnp.concatenate([text_emb, vid_emb], axis=1)
    if s_pad > S:
        emb = jnp.pad(emb, ((0, 0), (0, s_pad - S), (0, 0)))

    # ---- 3D rotary tables (identity rows for text + padding) + key-padding bias row ----
    cos, sin = build_rope_tables(T, hp, wp, hd, cfg["theta"], seq_text_len, s_pad)
    kv_bias = jnp.where(jnp.arange(s_pad) < S, 0.0, -1e30).astype(jnp.float32).reshape(1, s_pad)

    # ---- transformer layers ----
    for lp in params["layers"]:
        emb = transformer_layer(lp, emb, t_emb, seq_text_len, S, cos, sin, kv_bias, bm, bkv, cfg)

    # ---- final norm + FinalLayer (fused kernel, lane-padded output) ----
    vid = jax.lax.slice_in_dim(emb, seq_text_len, seq_text_len + n_vid, axis=1)
    fmod = jnp.dot(jax.nn.silu(t_emb), params["final_ada_w"]) + params["final_ada_b"]
    shift, scale = jnp.split(fmod, 2, axis=-1)
    x = pallas_final(vid, params["tn_g"], params["tn_b"],
                     params["final_norm_g"], params["final_norm_b"],
                     shift.reshape(B, 1, md), scale.reshape(B, 1, md),
                     params["final_lin_w"], params["final_lin_b"], eps)
    ppo = p * p * outc
    x = x[:, :, :ppo]                                           # drop lane padding

    # unpatchify: 'b (t h w) (c p q) -> b t c (h p) (w q)'
    x = x.reshape(B, T, hp, wp, outc, p, p)
    x = x.transpose(0, 1, 4, 2, 5, 3, 6).reshape(B, T, outc, hp * p, wp * p)
    return x


# ----------------------------- parameter init (pre-transposed (K,N), bf16 MXU weights) -----------------------------

def init_params(key, cfg):
    md, ted = cfg["model_dim"], cfg["time_embed_dim"]
    nh = cfg["num_heads"]
    hd = md // nh
    p, inc, outc, td = cfg["patch_size"], cfg["in_channels"], cfg["out_channels"], cfg["text_dim"]
    ppo = p * p * outc
    ppo_pad = max(128, _round8(ppo))
    keys = iter(jax.random.split(key, 256))

    def w(shape, dtype=MXU_DTYPE, scale=0.02):
        return (scale * jax.random.normal(next(keys), shape, jnp.float32)).astype(dtype)

    row = lambda n: jnp.zeros((1, n), jnp.float32)
    ones_row = lambda n: jnp.ones((1, n), jnp.float32)

    params = dict(
        # time MLP (plain XLA, f32)
        time_w1=w((md, ted), jnp.float32), time_b1=row(ted),
        time_w2=w((ted, ted), jnp.float32), time_b2=row(ted),
        # patch / text embedding (weights stored (K, N) = torch weight.T, bf16)
        vid_proj_w=w((inc * p * p, md)), vid_proj_b=row(md),
        text_proj_w=w((td, md)), text_proj_b=row(md),
        # final
        tn_g=ones_row(md), tn_b=row(md),
        final_ada_w=w((ted, 2 * md), jnp.float32), final_ada_b=row(2 * md),
        final_norm_g=ones_row(md), final_norm_b=row(md),
        final_lin_w=jnp.pad(w((md, ppo)), ((0, 0), (0, ppo_pad - ppo))),  # lane-padded to >=128
        final_lin_b=row(ppo_pad),
        layers=[],
    )
    ga = cfg["gating_alpha_init"]
    for _ in range(cfg["num_layers"]):
        lp = dict(
            ln1_g=ones_row(md), ln1_b=row(md),
            pre_seq_ada_w=w((ted, 6 * md), jnp.float32), pre_seq_ada_b=row(6 * md),
            qkv_w=w((md, 3 * md)), qkv_b=row(3 * md),            # fused q|k|v projection
            qn_g=ones_row(hd), qn_b=row(hd), kn_g=ones_row(hd), kn_b=row(hd),
            o_w=w((md, md)), o_b=row(md),
            fg_text=ga * jnp.ones((1, md), jnp.float32),
            fg_vid=ga * jnp.ones((1, md), jnp.float32),
            bg_text=ga * jnp.ones((1, md), jnp.float32),
            bg_vid=ga * jnp.ones((1, md), jnp.float32),
            ln2_g=ones_row(md), ln2_b=row(md),
            pre_mlp_ada_w=w((ted, 6 * md), jnp.float32), pre_mlp_ada_b=row(6 * md),
            mlp_w1=w((md, 4 * md)), mlp_b1=row(4 * md),
            mlp_w2=w((4 * md, md)), mlp_b2=row(md),
        )
        params["layers"].append(lp)
    return params


# ----------------------------- main -----------------------------

if __name__ == "__main__":
    key = jax.random.PRNGKey(0)
    pkey, vkey, tkey = jax.random.split(key, 3)
    params = init_params(pkey, CFG)

    B, T, C, H, W = 1, 2, CFG["in_channels"], 8, 8
    num_chunks, text_len = 1, 8
    video = jax.random.normal(vkey, (B, T, C, H, W), dtype=jnp.float32)
    text = jax.random.normal(tkey, (B, num_chunks, text_len, CFG["text_dim"]), dtype=jnp.float32)
    timesteps = jnp.array([37.0], dtype=jnp.float32)

    fwd = jax.jit(diffusion_transformer_forward)
    out = jax.block_until_ready(fwd(params, video, text, timesteps))
    assert out.shape == (B, T, CFG["out_channels"], H, W), out.shape
    assert bool(jnp.all(jnp.isfinite(out)))
    print("KERNEL_OK")
</pallas_src>

<mosaic_0001>
module attributes {stable_mosaic.version = 11 : i64} {
  func.func @_linear_kernel(%arg0: i32, %arg1: memref<32x16xf32, #tpu.memory_space<vmem>>, %arg2: memref<16x64xbf16, #tpu.memory_space<vmem>>, %arg3: memref<1x64xf32, #tpu.memory_space<vmem>>, %arg4: memref<32x64xbf16, #tpu.memory_space<vmem>>) attributes {dimension_semantics = [#tpu.dimension_semantics<parallel>], iteration_bounds = array<i64: 1>, scalar_prefetch = 0 : i64, scratch_operands = 0 : i64, tpu.core_type = #tpu.core_type<tc>, window_params = [{transform_indices = @transform_0, window_bounds = array<i64: 32, 16>}, {pipeline_mode = #tpu.pipeline_mode<synchronous>, transform_indices = @transform_1, window_bounds = array<i64: 16, 64>}, {pipeline_mode = #tpu.pipeline_mode<synchronous>, transform_indices = @transform_2, window_bounds = array<i64: 1, 64>}, {transform_indices = @transform_3, window_bounds = array<i64: 32, 64>}]} {
    %c0 = arith.constant 0 : index
    %c0_0 = arith.constant 0 : index
    %0 = vector.load %arg1[%c0, %c0_0] : memref<32x16xf32, #tpu.memory_space<vmem>>, vector<32x16xf32>
    %1 = arith.truncf %0 : vector<32x16xf32> to vector<32x16xbf16>
    %c0_1 = arith.constant 0 : index
    %c0_2 = arith.constant 0 : index
    %2 = vector.load %arg2[%c0_1, %c0_2] : memref<16x64xbf16, #tpu.memory_space<vmem>>, vector<16x64xbf16>
    %cst = arith.constant dense<0.000000e+00> : vector<32x64xf32>
    %3 = tpu.matmul %1, %2, %cst {dimension_numbers = #tpu.dot_dimension_numbers<[1], [0], [0], [1], [0, 0, 1, 1], [], []>} : vector<32x16xbf16>, vector<16x64xbf16>, vector<32x64xf32> -> vector<32x64xf32>
    %c0_3 = arith.constant 0 : index
    %c0_4 = arith.constant 0 : index
    %4 = vector.load %arg3[%c0_3, %c0_4] : memref<1x64xf32, #tpu.memory_space<vmem>>, vector<1x64xf32>
    %5 = vector.broadcast %4 : vector<1x64xf32> to vector<32x64xf32>
    %6 = arith.addf %3, %5 : vector<32x64xf32>
    %7 = arith.truncf %6 : vector<32x64xf32> to vector<32x64xbf16>
    %c0_5 = arith.constant 0 : index
    %c0_6 = arith.constant 0 : index
    %8 = vector.load %arg4[%c0_5, %c0_6] : memref<32x64xbf16, #tpu.memory_space<vmem>>, vector<32x64xbf16>
    tpu.vector_store %arg4[%c0_5, %c0_6], %7 {strides = array<i32>} : memref<32x64xbf16, #tpu.memory_space<vmem>>, vector<32x64xbf16>,
    return
  }
  func.func @transform_0(%arg0: i32) -> (i32, i32) {
    %c0_i32 = arith.constant 0 : i32
    %c0_i32_0 = arith.constant 0 : i32
    return %arg0, %c0_i32 : i32, i32
  }
  func.func @transform_1(%arg0: i32) -> (i32, i32) {
    %c0_i32 = arith.constant 0 : i32
    %c0_i32_0 = arith.constant 0 : i32
    %c0_i32_1 = arith.constant 0 : i32
    return %c0_i32, %c0_i32_0 : i32, i32
  }
  func.func @transform_2(%arg0: i32) -> (i32, i32) {
    %c0_i32 = arith.constant 0 : i32
    %c0_i32_0 = arith.constant 0 : i32
    %c0_i32_1 = arith.constant 0 : i32
    return %c0_i32, %c0_i32_0 : i32, i32
  }
  func.func @transform_3(%arg0: i32) -> (i32, i32) {
    %c0_i32 = arith.constant 0 : i32
    %c0_i32_0 = arith.constant 0 : i32
    return %arg0, %c0_i32 : i32, i32
  }
}

module attributes {stable_mosaic.version = 11 : i64} {
  func.func @_linear_kernel(%arg0: i32, %arg1: memref<8x32xf32, #tpu.memory_space<vmem>>, %arg2: memref<32x64xbf16, #tpu.memory_space<vmem>>, %arg3: memref<1x64xf32, #tpu.memory_space<vmem>>, %arg4: memref<8x64xbf16, #tpu.memory_space<vmem>>) attributes {dimension_semantics = [#tpu.dimension_semantics<parallel>], iteration_bounds = array<i64: 1>, scalar_prefetch = 0 : i64, scratch_operands = 0 : i64, tpu.core_type = #tpu.core_type<tc>, window_params = [{transform_indices = @transform_0, window_bounds = array<i64: 8, 32>}, {pipeline_mode = #tpu.pipeline_mode<synchronous>, transform_indices = @transform_1, window_bounds = array<i64: 32, 64>}, {pipeline_mode = #tpu.pipeline_mode<synchronous>, transform_indices = @transform_2, window_bounds = array<i64: 1, 64>}, {transform_indices = @transform_3, window_bounds = array<i64: 8, 64>}]} {
    %c0 = arith.constant 0 : index
    %c0_0 = arith.constant 0 : index
    %0 = vector.load %arg1[%c0, %c0_0] : memref<8x32xf32, #tpu.memory_space<vmem>>, vector<8x32xf32>
    %1 = arith.truncf %0 : vector<8x32xf32> to vector<8x32xbf16>
    %c0_1 = arith.constant 0 : index
    %c0_2 = arith.constant 0 : index
    %2 = vector.load %arg2[%c0_1, %c0_2] : memref<32x64xbf16, #tpu.memory_space<vmem>>, vector<32x64xbf16>
    %cst = arith.constant dense<0.000000e+00> : vector<8x64xf32>
    %3 = tpu.matmul %1, %2, %cst {dimension_numbers = #tpu.dot_dimension_numbers<[1], [0], [0], [1], [0, 0, 1, 1], [], []>} : vector<8x32xbf16>, vector<32x64xbf16>, vector<8x64xf32> -> vector<8x64xf32>
    %c0_3 = arith.constant 0 : index
    %c0_4 = arith.constant 0 : index
    %4 = vector.load %arg3[%c0_3, %c0_4] : memref<1x64xf32, #tpu.memory_space<vmem>>, vector<1x64xf32>
    %5 = vector.broadcast %4 : vector<1x64xf32> to vector<8x64xf32>
    %6 = arith.addf %3, %5 : vector<8x64xf32>
    %7 = arith.truncf %6 : vector<8x64xf32> to vector<8x64xbf16>
    %c0_5 = arith.constant 0 : index
    %c0_6 = arith.constant 0 : index
    %8 = vector.load %arg4[%c0_5, %c0_6] : memref<8x64xbf16, #tpu.memory_space<vmem>>, vector<8x64xbf16>
    tpu.vector_store %arg4[%c0_5, %c0_6], %7 {strides = array<i32>} : memref<8x64xbf16, #tpu.memory_space<vmem>>, vector<8x64xbf16>,
    return
  }
  func.func @transform_0(%arg0: i32) -> (i32, i32) {
    %c0_i32 = arith.constant 0 : i32
    %c0_i32_0 = arith.constant 0 : i32
    return %arg0, %c0_i32 : i32, i32
  }
  func.func @transform_1(%arg0: i32) -> (i32, i32) {
    %c0_i32 = arith.constant 0 : i32
    %c0_i32_0 = arith.constant 0 : i32
    %c0_i32_1 = arith.constant 0 : i32
    return %c0_i32, %c0_i32_0 : i32, i32
  }
  func.func @transform_2(%arg0: i32) -> (i32, i32) {
    %c0_i32 = arith.constant 0 : i32
    %c0_i32_0 = arith.constant 0 : i32
    %c0_i32_1 = arith.constant 0 : i32
    return %c0_i32, %c0_i32_0 : i32, i32
  }
  func.func @transform_3(%arg0: i32) -> (i32, i32) {
    %c0_i32 = arith.constant 0 : i32
    %c0_i32_0 = arith.constant 0 : i32
    return %arg0, %c0_i32 : i32, i32
  }
}

module attributes {stable_mosaic.version = 11 : i64} {
  func.func @_flash_attn_kernel(%arg0: i32, %arg1: i32, %arg2: i32, %arg3: memref<1x40x64xbf16, #tpu.memory_space<vmem>>, %arg4: memref<1x40x128xbf16, #tpu.memory_space<vmem>>, %arg5: memref<1x40xf32, #tpu.memory_space<vmem>>, %arg6: memref<1x40x64xbf16, #tpu.memory_space<vmem>>, %arg7: memref<2x40x1xf32, #tpu.memory_space<vmem>>, %arg8: memref<2x40x1xf32, #tpu.memory_space<vmem>>, %arg9: memref<2x40x32xf32, #tpu.memory_space<vmem>>) attributes {dimension_semantics = [#tpu.dimension_semantics<parallel>, #tpu.dimension_semantics<parallel>, #tpu.dimension_semantics<arbitrary>], iteration_bounds = array<i64: 1, 1, 1>, scalar_prefetch = 0 : i64, scratch_operands = 3 : i64, tpu.core_type = #tpu.core_type<tc>, window_params = [{transform_indices = @transform_0, window_bounds = array<i64: 1, 40, 64>}, {transform_indices = @transform_1, window_bounds = array<i64: 1, 40, 128>}, {transform_indices = @transform_2, window_bounds = array<i64: 1, 40>}, {transform_indices = @transform_3, window_bounds = array<i64: 1, 40, 64>}]} {
    %c0_i32 = arith.constant 0 : i32
    %0 = arith.cmpi eq, %arg2, %c0_i32 : i32
    %1 = arith.extui %0 : i1 to i32
    %c0_i32_0 = arith.constant 0 : i32
    %2 = arith.cmpi ne, %1, %c0_i32_0 : i32
    scf.if %2 {
      %cst = arith.constant -1.000000e+30 : f32
      %10 = vector.broadcast %cst : f32 to vector<2x40x1xf32>
      %c0 = arith.constant 0 : index
      %c0_5 = arith.constant 0 : index
      %c0_6 = arith.constant 0 : index
      %11 = vector.load %arg7[%c0, %c0_5, %c0_6] : memref<2x40x1xf32, #tpu.memory_space<vmem>>, vector<2x40x1xf32>
      tpu.vector_store %arg7[%c0, %c0_5, %c0_6], %10 {strides = array<i32>} : memref<2x40x1xf32, #tpu.memory_space<vmem>>, vector<2x40x1xf32>,
      %cst_7 = arith.constant 0.000000e+00 : f32
      %12 = vector.broadcast %cst_7 : f32 to vector<2x40x1xf32>
      %c0_8 = arith.constant 0 : index
      %c0_9 = arith.constant 0 : index
      %c0_10 = arith.constant 0 : index
      %13 = vector.load %arg8[%c0_8, %c0_9, %c0_10] : memref<2x40x1xf32, #tpu.memory_space<vmem>>, vector<2x40x1xf32>
      tpu.vector_store %arg8[%c0_8, %c0_9, %c0_10], %12 {strides = array<i32>} : memref<2x40x1xf32, #tpu.memory_space<vmem>>, vector<2x40x1xf32>,
      %cst_11 = arith.constant 0.000000e+00 : f32
      %14 = vector.broadcast %cst_11 : f32 to vector<2x40x32xf32>
      %c0_12 = arith.constant 0 : index
      %c0_13 = arith.constant 0 : index
      %c0_14 = arith.constant 0 : index
      %15 = vector.load %arg9[%c0_12, %c0_13, %c0_14] : memref<2x40x32xf32, #tpu.memory_space<vmem>>, vector<2x40x32xf32>
      tpu.vector_store %arg9[%c0_12, %c0_13, %c0_14], %14 {strides = array<i32>} : memref<2x40x32xf32, #tpu.memory_space<vmem>>, vector<2x40x32xf32>,
    } else {
    }
    %c40_i32 = arith.constant 40 : i32
    %3 = arith.muli %arg2, %c40_i32 : i32
    %c40_i32_1 = arith.constant 40 : i32
    %4 = arith.cmpi slt, %3, %c40_i32_1 : i32
    %5 = arith.extui %4 : i1 to i32
    %c0_i32_2 = arith.constant 0 : i32
    %6 = arith.cmpi ne, %5, %c0_i32_2 : i32
    scf.if %6 {
      %c0 = arith.constant 0 : index
      %c0_5 = arith.constant 0 : index
      %c0_6 = arith.constant 0 : index
      %10 = vector.load %arg3[%c0, %c0_5, %c0_6] : memref<1x40x64xbf16, #tpu.memory_space<vmem>>, vector<1x40x64xbf16>
      %11 = vector.shape_cast %10 : vector<1x40x64xbf16> to vector<40x64xbf16>
      %c0_7 = arith.constant 0 : index
      %c0_8 = arith.constant 0 : index
      %c0_9 = arith.constant 0 : index
      %12 = vector.load %arg4[%c0_7, %c0_8, %c0_9] : memref<1x40x128xbf16, #tpu.memory_space<vmem>>, vector<1x40x128xbf16>
      %13 = vector.shape_cast %12 : vector<1x40x128xbf16> to vector<40x128xbf16>
      %c0_10 = arith.constant 0 : index
      %c0_11 = arith.constant 0 : index
      %14 = vector.load %arg5[%c0_10, %c0_11] : memref<1x40xf32, #tpu.memory_space<vmem>>, vector<1x40xf32>
      %15 = vector.extract_strided_slice %11 {offsets = [0, 0], sizes = [40, 32], strides = [1, 1]} : vector<40x64xbf16> to vector<40x32xbf16>
      %16 = vector.extract_strided_slice %13 {offsets = [0, 0], sizes = [40, 32], strides = [1, 1]} : vector<40x128xbf16> to vector<40x32xbf16>
      %17 = vector.extract_strided_slice %13 {offsets = [0, 64], sizes = [40, 32], strides = [1, 1]} : vector<40x128xbf16> to vector<40x32xbf16>
      %cst = arith.constant dense<0.000000e+00> : vector<40x40xf32>
      %18 = tpu.matmul %15, %16, %cst {dimension_numbers = #tpu.dot_dimension_numbers<[1], [1], [0], [0], [0, 0, 1, 0], [], []>} : vector<40x32xbf16>, vector<40x32xbf16>, vector<40x40xf32> -> vector<40x40xf32>
      %19 = vector.broadcast %14 : vector<1x40xf32> to vector<40x40xf32>
      %20 = arith.addf %18, %19 : vector<40x40xf32>
      %c0_12 = arith.constant 0 : index
      %c0_13 = arith.constant 0 : index
      %c0_14 = arith.constant 0 : index
      %21 = vector.load %arg7[%c0_12, %c0_13, %c0_14] : memref<2x40x1xf32, #tpu.memory_space<vmem>>, vector<1x40x1xf32>
      %22 = vector.shape_cast %21 : vector<1x40x1xf32> to vector<40x1xf32>
      %cst_15 = arith.constant dense<0xFF800000> : vector<40xf32>
      %23 = vector.multi_reduction <maximumf>, %20, %cst_15 [1] : vector<40x40xf32> to vector<40xf32>
      %24 = vector.shape_cast %23 : vector<40xf32> to vector<40x1xf32>
      %25 = arith.maximumf %22, %24 : vector<40x1xf32>
      %26 = arith.subf %22, %25 : vector<40x1xf32>
      %27 = math.exp %26 : vector<40x1xf32>
      %28 = vector.broadcast %25 : vector<40x1xf32> to vector<40x40xf32>
      %29 = arith.subf %20, %28 : vector<40x40xf32>
      %30 = math.exp %29 : vector<40x40xf32>
      %c0_16 = arith.constant 0 : index
      %c0_17 = arith.constant 0 : index
      %c0_18 = arith.constant 0 : index
      %31 = vector.load %arg8[%c0_16, %c0_17, %c0_18] : memref<2x40x1xf32, #tpu.memory_space<vmem>>, vector<1x40x1xf32>
      %32 = vector.shape_cast %31 : vector<1x40x1xf32> to vector<40x1xf32>
      %33 = arith.mulf %27, %32 : vector<40x1xf32>
      %cst_19 = arith.constant dense<0.000000e+00> : vector<40xf32>
      %34 = vector.multi_reduction <add>, %30, %cst_19 [1] : vector<40x40xf32> to vector<40xf32>
      %35 = vector.shape_cast %34 : vector<40xf32> to vector<40x1xf32>
      %36 = arith.addf %33, %35 : vector<40x1xf32>
      %c0_20 = arith.constant 0 : index
      %c0_21 = arith.constant 0 : index
      %c0_22 = arith.constant 0 : index
      %37 = vector.load %arg8[%c0_20, %c0_21, %c0_22] : memref<2x40x1xf32, #tpu.memory_space<vmem>>, vector<1x40x1xf32>
      %38 = vector.shape_cast %37 : vector<1x40x1xf32> to vector<40x1xf32>
      %39 = vector.shape_cast %36 : vector<40x1xf32> to vector<1x40x1xf32>
      tpu.vector_store %arg8[%c0_20, %c0_21, %c0_22], %39 {strides = array<i32>} : memref<2x40x1xf32, #tpu.memory_space<vmem>>, vector<1x40x1xf32>,
      %c0_23 = arith.constant 0 : index
      %c0_24 = arith.constant 0 : index
      %c0_25 = arith.constant 0 : index
      %40 = vector.load %arg7[%c0_23, %c0_24, %c0_25] : memref<2x40x1xf32, #tpu.memory_space<vmem>>, vector<1x40x1xf32>
      %41 = vector.shape_cast %40 : vector<1x40x1xf32> to vector<40x1xf32>
      %42 = vector.shape_cast %25 : vector<40x1xf32> to vector<1x40x1xf32>
      tpu.vector_store %arg7[%c0_23, %c0_24, %c0_25], %42 {strides = array<i32>} : memref<2x40x1xf32, #tpu.memory_space<vmem>>, vector<1x40x1xf32>,
      %43 = arith.truncf %30 : vector<40x40xf32> to vector<40x40xbf16>
      %cst_26 = arith.constant dense<0.000000e+00> : vector<40x32xf32>
      %44 = tpu.matmul %43, %17, %cst_26 {dimension_numbers = #tpu.dot_dimension_numbers<[1], [0], [0], [1], [0, 0, 1, 1], [], []>} : vector<40x40xbf16>, vector<40x32xbf16>, vector<40x32xf32> -> vector<40x32xf32>
      %c0_27 = arith.constant 0 : index
      %c0_28 = arith.constant 0 : index
      %c0_29 = arith.constant 0 : index
      %45 = vector.load %arg9[%c0_27, %c0_28, %c0_29] : memref<2x40x32xf32, #tpu.memory_space<vmem>>, vector<1x40x32xf32>
      %46 = vector.shape_cast %45 : vector<1x40x32xf32> to vector<40x32xf32>
      %47 = vector.broadcast %27 : vector<40x1xf32> to vector<40x32xf32>
      %48 = arith.mulf %47, %46 : vector<40x32xf32>
      %49 = arith.addf %48, %44 : vector<40x32xf32>
      %c0_30 = arith.constant 0 : index
      %c0_31 = arith.constant 0 : index
      %c0_32 = arith.constant 0 : index
      %50 = vector.load %arg9[%c0_30, %c0_31, %c0_32] : memref<2x40x32xf32, #tpu.memory_space<vmem>>, vector<1x40x32xf32>
      %51 = vector.shape_cast %50 : vector<1x40x32xf32> to vector<40x32xf32>
      %52 = vector.shape_cast %49 : vector<40x32xf32> to vector<1x40x32xf32>
      tpu.vector_store %arg9[%c0_30, %c0_31, %c0_32], %52 {strides = array<i32>} : memref<2x40x32xf32, #tpu.memory_space<vmem>>, vector<1x40x32xf32>,
      %53 = vector.extract_strided_slice %11 {offsets = [0, 32], sizes = [40, 32], strides = [1, 1]} : vector<40x64xbf16> to vector<40x32xbf16>
      %54 = vector.extract_strided_slice %13 {offsets = [0, 32], sizes = [40, 32], strides = [1, 1]} : vector<40x128xbf16> to vector<40x32xbf16>
      %55 = vector.extract_strided_slice %13 {offsets = [0, 96], sizes = [40, 32], strides = [1, 1]} : vector<40x128xbf16> to vector<40x32xbf16>
      %cst_33 = arith.constant dense<0.000000e+00> : vector<40x40xf32>
      %56 = tpu.matmul %53, %54, %cst_33 {dimension_numbers = #tpu.dot_dimension_numbers<[1], [1], [0], [0], [0, 0, 1, 0], [], []>} : vector<40x32xbf16>, vector<40x32xbf16>, vector<40x40xf32> -> vector<40x40xf32>
      %57 = vector.broadcast %14 : vector<1x40xf32> to vector<40x40xf32>
      %58 = arith.addf %56, %57 : vector<40x40xf32>
      %c1 = arith.constant 1 : index
      %c0_34 = arith.constant 0 : index
      %c0_35 = arith.constant 0 : index
      %59 = vector.load %arg7[%c1, %c0_34, %c0_35] : memref<2x40x1xf32, #tpu.memory_space<vmem>>, vector<1x40x1xf32>
      %60 = vector.shape_cast %59 : vector<1x40x1xf32> to vector<40x1xf32>
      %cst_36 = arith.constant dense<0xFF800000> : vector<40xf32>
      %61 = vector.multi_reduction <maximumf>, %58, %cst_36 [1] : vector<40x40xf32> to vector<40xf32>
      %62 = vector.shape_cast %61 : vector<40xf32> to vector<40x1xf32>
      %63 = arith.maximumf %60, %62 : vector<40x1xf32>
      %64 = arith.subf %60, %63 : vector<40x1xf32>
      %65 = math.exp %64 : vector<40x1xf32>
      %66 = vector.broadcast %63 : vector<40x1xf32> to vector<40x40xf32>
      %67 = arith.subf %58, %66 : vector<40x40xf32>
      %68 = math.exp %67 : vector<40x40xf32>
      %c1_37 = arith.constant 1 : index
      %c0_38 = arith.constant 0 : index
      %c0_39 = arith.constant 0 : index
      %69 = vector.load %arg8[%c1_37, %c0_38, %c0_39] : memref<2x40x1xf32, #tpu.memory_space<vmem>>, vector<1x40x1xf32>
      %70 = vector.shape_cast %69 : vector<1x40x1xf32> to vector<40x1xf32>
      %71 = arith.mulf %65, %70 : vector<40x1xf32>
      %cst_40 = arith.constant dense<0.000000e+00> : vector<40xf32>
      %72 = vector.multi_reduction <add>, %68, %cst_40 [1] : vector<40x40xf32> to vector<40xf32>
      %73 = vector.shape_cast %72 : vector<40xf32> to vector<40x1xf32>
      %74 = arith.addf %71, %73 : vector<40x1xf32>
      %c1_41 = arith.constant 1 : index
      %c0_42 = arith.constant 0 : index
      %c0_43 = arith.constant 0 : index
      %75 = vector.load %arg8[%c1_41, %c0_42, %c0_43] : memref<2x40x1xf32, #tpu.memory_space<vmem>>, vector<1x40x1xf32>
      %76 = vector.shape_cast %75 : vector<1x40x1xf32> to vector<40x1xf32>
      %77 = vector.shape_cast %74 : vector<40x1xf32> to vector<1x40x1xf32>
      tpu.vector_store %arg8[%c1_41, %c0_42, %c0_43], %77 {strides = array<i32>} : memref<2x40x1xf32, #tpu.memory_space<vmem>>, vector<1x40x1xf32>,
      %c1_44 = arith.constant 1 : index
      %c0_45 = arith.constant 0 : index
      %c0_46 = arith.constant 0 : index
      %78 = vector.load %arg7[%c1_44, %c0_45, %c0_46] : memref<2x40x1xf32, #tpu.memory_space<vmem>>, vector<1x40x1xf32>
      %79 = vector.shape_cast %78 : vector<1x40x1xf32> to vector<40x1xf32>
      %80 = vector.shape_cast %63 : vector<40x1xf32> to vector<1x40x1xf32>
      tpu.vector_store %arg7[%c1_44, %c0_45, %c0_46], %80 {strides = array<i32>} : memref<2x40x1xf32, #tpu.memory_space<vmem>>, vector<1x40x1xf32>,
      %81 = arith.truncf %68 : vector<40x40xf32> to vector<40x40xbf16>
      %cst_47 = arith.constant dense<0.000000e+00> : vector<40x32xf32>
      %82 = tpu.matmul %81, %55, %cst_47 {dimension_numbers = #tpu.dot_dimension_numbers<[1], [0], [0], [1], [0, 0, 1, 1], [], []>} : vector<40x40xbf16>, vector<40x32xbf16>, vector<40x32xf32> -> vector<40x32xf32>
      %c1_48 = arith.constant 1 : index
      %c0_49 = arith.constant 0 : index
      %c0_50 = arith.constant 0 : index
      %83 = vector.load %arg9[%c1_48, %c0_49, %c0_50] : memref<2x40x32xf32, #tpu.memory_space<vmem>>, vector<1x40x32xf32>
      %84 = vector.shape_cast %83 : vector<1x40x32xf32> to vector<40x32xf32>
      %85 = vector.broadcast %65 : vector<40x1xf32> to vector<40x32xf32>
      %86 = arith.mulf %85, %84 : vector<40x32xf32>
      %87 = arith.addf %86, %82 : vector<40x32xf32>
      %c1_51 = arith.constant 1 : index
      %c0_52 = arith.constant 0 : index
      %c0_53 = arith.constant 0 : index
      %88 = vector.load %arg9[%c1_51, %c0_52, %c0_53] : memref<2x40x32xf32, #tpu.memory_space<vmem>>, vector<1x40x32xf32>
      %89 = vector.shape_cast %88 : vector<1x40x32xf32> to vector<40x32xf32>
      %90 = vector.shape_cast %87 : vector<40x32xf32> to vector<1x40x32xf32>
      tpu.vector_store %arg9[%c1_51, %c0_52, %c0_53], %90 {strides = array<i32>} : memref<2x40x32xf32, #tpu.memory_space<vmem>>, vector<1x40x32xf32>,
    } else {
    }
    %c0_i32_3 = arith.constant 0 : i32
    %7 = arith.cmpi eq, %arg2, %c0_i32_3 : i32
    %8 = arith.extui %7 : i1 to i32
    %c0_i32_4 = arith.constant 0 : i32
    %9 = arith.cmpi ne, %8, %c0_i32_4 : i32
    scf.if %9 {
      %c0 = arith.constant 0 : index
      %c0_5 = arith.constant 0 : index
      %c0_6 = arith.constant 0 : index
      %10 = vector.load %arg9[%c0, %c0_5, %c0_6] : memref<2x40x32xf32, #tpu.memory_space<vmem>>, vector<1x40x32xf32>
      %11 = vector.shape_cast %10 : vector<1x40x32xf32> to vector<40x32xf32>
      %c0_7 = arith.constant 0 : index
      %c0_8 = arith.constant 0 : index
      %c0_9 = arith.constant 0 : index
      %12 = vector.load %arg8[%c0_7, %c0_8, %c0_9] : memref<2x40x1xf32, #tpu.memory_space<vmem>>, vector<1x40x1xf32>
      %13 = vector.shape_cast %12 : vector<1x40x1xf32> to vector<40x1xf32>
      %14 = tpu.reciprocal %13 {approx = true} : vector<40x1xf32> -> vector<40x1xf32>
      %15 = vector.broadcast %14 : vector<40x1xf32> to vector<40x32xf32>
      %16 = arith.mulf %11, %15 : vector<40x32xf32>
      %c1 = arith.constant 1 : index
      %c0_10 = arith.constant 0 : index
      %c0_11 = arith.constant 0 : index
      %17 = vector.load %arg9[%c1, %c0_10, %c0_11] : memref<2x40x32xf32, #tpu.memory_space<vmem>>, vector<1x40x32xf32>
      %18 = vector.shape_cast %17 : vector<1x40x32xf32> to vector<40x32xf32>
      %c1_12 = arith.constant 1 : index
      %c0_13 = arith.constant 0 : index
      %c0_14 = arith.constant 0 : index
      %19 = vector.load %arg8[%c1_12, %c0_13, %c0_14] : memref<2x40x1xf32, #tpu.memory_space<vmem>>, vector<1x40x1xf32>
      %20 = vector.shape_cast %19 : vector<1x40x1xf32> to vector<40x1xf32>
      %21 = tpu.reciprocal %20 {approx = true} : vector<40x1xf32> -> vector<40x1xf32>
      %22 = vector.broadcast %21 : vector<40x1xf32> to vector<40x32xf32>
      %23 = arith.mulf %18, %22 : vector<40x32xf32>
      %24 = tpu.concatenate %16, %23 in 1 : vector<40x32xf32>, vector<40x32xf32> -> vector<40x64xf32>
      %25 = arith.truncf %24 : vector<40x64xf32> to vector<40x64xbf16>
      %c0_15 = arith.constant 0 : index
      %c0_16 = arith.constant 0 : index
      %c0_17 = arith.constant 0 : index
      %26 = vector.load %arg6[%c0_15, %c0_16, %c0_17] : memref<1x40x64xbf16, #tpu.memory_space<vmem>>, vector<1x40x64xbf16>
      %27 = vector.shape_cast %26 : vector<1x40x64xbf16> to vector<40x64xbf16>
      %28 = vector.shape_cast %25 : vector<40x64xbf16> to vector<1x40x64xbf16>
      tpu.vector_store %arg6[%c0_15, %c0_16, %c0_17], %28 {strides = array<i32>} : memref<1x40x64xbf16, #tpu.memory_space<vmem>>, vector<1x40x64xbf16>,
    } else {
    }
    return
  }
  func.func @transform_0(%arg0: i32, %arg1: i32, %arg2: i32) -> (i32, i32, i32) {
    %c0_i32 = arith.constant 0 : i32
    %c0_i32_0 = arith.constant 0 : i32
    return %arg0, %arg1, %c0_i32 : i32, i32, i32
  }
  func.func @transform_1(%arg0: i32, %arg1: i32, %arg2: i32) -> (i32, i32, i32) {
    %c0_i32 = arith.constant 0 : i32
    %c0_i32_0 = arith.constant 0 : i32
    return %arg0, %arg2, %c0_i32 : i32, i32, i32
  }
  func.func @transform_2(%arg0: i32, %arg1: i32, %arg2: i32) -> (i32, i32) {
    %c0_i32 = arith.constant 0 : i32
    %c0_i32_0 = arith.constant 0 : i32
    return %c0_i32, %arg2 : i32, i32
  }
  func.func @transform_3(%arg0: i32, %arg1: i32, %arg2: i32) -> (i32, i32, i32) {
    %c0_i32 = arith.constant 0 : i32
    %c0_i32_0 = arith.constant 0 : i32
    return %arg0, %arg1, %c0_i32 : i32, i32, i32
  }
}

module attributes {stable_mosaic.version = 11 : i64} {
  func.func @_pre_attn_kernel(%arg0: i32, %arg1: i32, %arg2: memref<1x40x64xbf16, #tpu.memory_space<vmem>>, %arg3: memref<1x64xf32, #tpu.memory_space<vmem>>, %arg4: memref<1x64xf32, #tpu.memory_space<vmem>>, %arg5: memref<1x1x64xf32, #tpu.memory_space<vmem>>, %arg6: memref<1x1x64xf32, #tpu.memory_space<vmem>>, %arg7: memref<1x1x64xf32, #tpu.memory_space<vmem>>, %arg8: memref<1x1x64xf32, #tpu.memory_space<vmem>>, %arg9: memref<64x192xbf16, #tpu.memory_space<vmem>>, %arg10: memref<1x192xf32, #tpu.memory_space<vmem>>, %arg11: memref<40x32xf32, #tpu.memory_space<vmem>>, %arg12: memref<40x32xf32, #tpu.memory_space<vmem>>, %arg13: memref<1x32xf32, #tpu.memory_space<vmem>>, %arg14: memref<1x32xf32, #tpu.memory_space<vmem>>, %arg15: memref<1x32xf32, #tpu.memory_space<vmem>>, %arg16: memref<1x32xf32, #tpu.memory_space<vmem>>, %arg17: memref<1x40x64xbf16, #tpu.memory_space<vmem>>, %arg18: memref<1x40x128xbf16, #tpu.memory_space<vmem>>) attributes {dimension_semantics = [#tpu.dimension_semantics<parallel>, #tpu.dimension_semantics<parallel>], iteration_bounds = array<i64: 1, 1>, scalar_prefetch = 0 : i64, scratch_operands = 0 : i64, tpu.core_type = #tpu.core_type<tc>, window_params = [{transform_indices = @transform_0, window_bounds = array<i64: 1, 40, 64>}, {pipeline_mode = #tpu.pipeline_mode<synchronous>, transform_indices = @transform_1, window_bounds = array<i64: 1, 64>}, {pipeline_mode = #tpu.pipeline_mode<synchronous>, transform_indices = @transform_2, window_bounds = array<i64: 1, 64>}, {transform_indices = @transform_3, window_bounds = array<i64: 1, 1, 64>}, {transform_indices = @transform_4, window_bounds = array<i64: 1, 1, 64>}, {transform_indices = @transform_5, window_bounds = array<i64: 1, 1, 64>}, {transform_indices = @transform_6, window_bounds = array<i64: 1, 1, 64>}, {pipeline_mode = #tpu.pipeline_mode<synchronous>, transform_indices = @transform_7, window_bounds = array<i64: 64, 192>}, {pipeline_mode = #tpu.pipeline_mode<synchronous>, transform_indices = @transform_8, window_bounds = array<i64: 1, 192>}, {transform_indices = @transform_9, window_bounds = array<i64: 40, 32>}, {transform_indices = @transform_10, window_bounds = array<i64: 40, 32>}, {pipeline_mode = #tpu.pipeline_mode<synchronous>, transform_indices = @transform_11, window_bounds = array<i64: 1, 32>}, {pipeline_mode = #tpu.pipeline_mode<synchronous>, transform_indices = @transform_12, window_bounds = array<i64: 1, 32>}, {pipeline_mode = #tpu.pipeline_mode<synchronous>, transform_indices = @transform_13, window_bounds = array<i64: 1, 32>}, {pipeline_mode = #tpu.pipeline_mode<synchronous>, transform_indices = @transform_14, window_bounds = array<i64: 1, 32>}, {transform_indices = @transform_15, window_bounds = array<i64: 1, 40, 64>}, {transform_indices = @transform_16, window_bounds = array<i64: 1, 40, 128>}]} {
    %c0 = arith.constant 0 : index
    %c0_0 = arith.constant 0 : index
    %c0_1 = arith.constant 0 : index
    %0 = vector.load %arg2[%c0, %c0_0, %c0_1] : memref<1x40x64xbf16, #tpu.memory_space<vmem>>, vector<1x40x64xbf16>
    %1 = vector.shape_cast %0 : vector<1x40x64xbf16> to vector<40x64xbf16>
    %2 = arith.extf %1 : vector<40x64xbf16> to vector<40x64xf32>
    %c0_2 = arith.constant 0 : index
    %c0_3 = arith.constant 0 : index
    %3 = vector.load %arg3[%c0_2, %c0_3] : memref<1x64xf32, #tpu.memory_space<vmem>>, vector<1x64xf32>
    %c0_4 = arith.constant 0 : index
    %c0_5 = arith.constant 0 : index
    %4 = vector.load %arg4[%c0_4, %c0_5] : memref<1x64xf32, #tpu.memory_space<vmem>>, vector<1x64xf32>
    %cst = arith.constant dense<0.000000e+00> : vector<40xf32>
    %5 = vector.multi_reduction <add>, %2, %cst [1] : vector<40x64xf32> to vector<40xf32>
    %6 = vector.shape_cast %5 : vector<40xf32> to vector<40x1xf32>
    %cst_6 = arith.constant 6.400000e+01 : f32
    %7 = vector.broadcast %cst_6 : f32 to vector<40x1xf32>
    %8 = arith.divf %6, %7 : vector<40x1xf32>
    %9 = vector.broadcast %8 : vector<40x1xf32> to vector<40x64xf32>
    %10 = arith.subf %2, %9 : vector<40x64xf32>
    %11 = arith.mulf %10, %10 : vector<40x64xf32>
    %cst_7 = arith.constant dense<0.000000e+00> : vector<40xf32>
    %12 = vector.multi_reduction <add>, %11, %cst_7 [1] : vector<40x64xf32> to vector<40xf32>
    %13 = vector.shape_cast %12 : vector<40xf32> to vector<40x1xf32>
    %cst_8 = arith.constant 6.400000e+01 : f32
    %14 = vector.broadcast %cst_8 : f32 to vector<40x1xf32>
    %15 = arith.divf %13, %14 : vector<40x1xf32>
    %16 = vector.broadcast %8 : vector<40x1xf32> to vector<40x64xf32>
    %17 = arith.subf %2, %16 : vector<40x64xf32>
    %cst_9 = arith.constant 9.99999974E-6 : f32
    %18 = vector.broadcast %cst_9 : f32 to vector<40x1xf32>
    %19 = arith.addf %15, %18 : vector<40x1xf32>
    %20 = math.rsqrt %19 : vector<40x1xf32>
    %21 = vector.broadcast %20 : vector<40x1xf32> to vector<40x64xf32>
    %22 = arith.mulf %17, %21 : vector<40x64xf32>
    %23 = vector.broadcast %3 : vector<1x64xf32> to vector<40x64xf32>
    %24 = arith.mulf %22, %23 : vector<40x64xf32>
    %25 = vector.broadcast %4 : vector<1x64xf32> to vector<40x64xf32>
    %26 = arith.addf %24, %25 : vector<40x64xf32>
    %c40_i32 = arith.constant 40 : i32
    %27 = arith.muli %arg1, %c40_i32 : i32
    %28 = tpu.iota {dimensions = array<i32: 0>} : vector<40x1xi32>
    %29 = vector.broadcast %27 : i32 to vector<40x1xi32>
    %30 = arith.addi %29, %28 : vector<40x1xi32>
    %c8_i32 = arith.constant 8 : i32
    %31 = vector.broadcast %c8_i32 : i32 to vector<40x1xi32>
    %32 = arith.cmpi slt, %30, %31 : vector<40x1xi32>
    %c0_10 = arith.constant 0 : index
    %c0_11 = arith.constant 0 : index
    %c0_12 = arith.constant 0 : index
    %33 = vector.load %arg6[%c0_10, %c0_11, %c0_12] : memref<1x1x64xf32, #tpu.memory_space<vmem>>, vector<1x1x64xf32>
    %34 = vector.shape_cast %33 : vector<1x1x64xf32> to vector<1x64xf32>
    %c0_13 = arith.constant 0 : index
    %c0_14 = arith.constant 0 : index
    %c0_15 = arith.constant 0 : index
    %35 = vector.load %arg8[%c0_13, %c0_14, %c0_15] : memref<1x1x64xf32, #tpu.memory_space<vmem>>, vector<1x1x64xf32>
    %36 = vector.shape_cast %35 : vector<1x1x64xf32> to vector<1x64xf32>
    %37 = vector.shape_cast %32 : vector<40x1xi1> to vector<40x1xi1>
    %38 = vector.broadcast %37 : vector<40x1xi1> to vector<40x64xi1>
    %39 = vector.shape_cast %34 : vector<1x64xf32> to vector<1x64xf32>
    %40 = vector.broadcast %39 : vector<1x64xf32> to vector<40x64xf32>
    %41 = vector.shape_cast %36 : vector<1x64xf32> to vector<1x64xf32>
    %42 = vector.broadcast %41 : vector<1x64xf32> to vector<40x64xf32>
    %43 = arith.select %38, %40, %42 : vector<40x64xi1>, vector<40x64xf32>
    %c0_16 = arith.constant 0 : index
    %c0_17 = arith.constant 0 : index
    %c0_18 = arith.constant 0 : index
    %44 = vector.load %arg5[%c0_16, %c0_17, %c0_18] : memref<1x1x64xf32, #tpu.memory_space<vmem>>, vector<1x1x64xf32>
    %45 = vector.shape_cast %44 : vector<1x1x64xf32> to vector<1x64xf32>
    %c0_19 = arith.constant 0 : index
    %c0_20 = arith.constant 0 : index
    %c0_21 = arith.constant 0 : index
    %46 = vector.load %arg7[%c0_19, %c0_20, %c0_21] : memref<1x1x64xf32, #tpu.memory_space<vmem>>, vector<1x1x64xf32>
    %47 = vector.shape_cast %46 : vector<1x1x64xf32> to vector<1x64xf32>
    %48 = vector.shape_cast %32 : vector<40x1xi1> to vector<40x1xi1>
    %49 = vector.broadcast %48 : vector<40x1xi1> to vector<40x64xi1>
    %50 = vector.shape_cast %45 : vector<1x64xf32> to vector<1x64xf32>
    %51 = vector.broadcast %50 : vector<1x64xf32> to vector<40x64xf32>
    %52 = vector.shape_cast %47 : vector<1x64xf32> to vector<1x64xf32>
    %53 = vector.broadcast %52 : vector<1x64xf32> to vector<40x64xf32>
    %54 = arith.select %49, %51, %53 : vector<40x64xi1>, vector<40x64xf32>
    %cst_22 = arith.constant 1.000000e+00 : f32
    %55 = vector.broadcast %cst_22 : f32 to vector<40x64xf32>
    %56 = arith.addf %55, %43 : vector<40x64xf32>
    %57 = arith.mulf %26, %56 : vector<40x64xf32>
    %58 = arith.addf %57, %54 : vector<40x64xf32>
    %59 = arith.truncf %58 : vector<40x64xf32> to vector<40x64xbf16>
    %c0_23 = arith.constant 0 : index
    %c0_24 = arith.constant 0 : index
    %60 = vector.load %arg9[%c0_23, %c0_24] : memref<64x192xbf16, #tpu.memory_space<vmem>>, vector<64x192xbf16>
    %cst_25 = arith.constant dense<0.000000e+00> : vector<40x192xf32>
    %61 = tpu.matmul %59, %60, %cst_25 {dimension_numbers = #tpu.dot_dimension_numbers<[1], [0], [0], [1], [0, 0, 1, 1], [], []>} : vector<40x64xbf16>, vector<64x192xbf16>, vector<40x192xf32> -> vector<40x192xf32>
    %c0_26 = arith.constant 0 : index
    %c0_27 = arith.constant 0 : index
    %62 = vector.load %arg10[%c0_26, %c0_27] : memref<1x192xf32, #tpu.memory_space<vmem>>, vector<1x192xf32>
    %63 = vector.broadcast %62 : vector<1x192xf32> to vector<40x192xf32>
    %64 = arith.addf %61, %63 : vector<40x192xf32>
    %c0_28 = arith.constant 0 : index
    %c0_29 = arith.constant 0 : index
    %65 = vector.load %arg11[%c0_28, %c0_29] : memref<40x32xf32, #tpu.memory_space<vmem>>, vector<40x32xf32>
    %c0_30 = arith.constant 0 : index
    %c0_31 = arith.constant 0 : index
    %66 = vector.load %arg12[%c0_30, %c0_31] : memref<40x32xf32, #tpu.memory_space<vmem>>, vector<40x32xf32>
    %67 = vector.extract_strided_slice %64 {offsets = [0, 0], sizes = [40, 32], strides = [1, 1]} : vector<40x192xf32> to vector<40x32xf32>
    %c0_32 = arith.constant 0 : index
    %c0_33 = arith.constant 0 : index
    %68 = vector.load %arg13[%c0_32, %c0_33] : memref<1x32xf32, #tpu.memory_space<vmem>>, vector<1x32xf32>
    %c0_34 = arith.constant 0 : index
    %c0_35 = arith.constant 0 : index
    %69 = vector.load %arg14[%c0_34, %c0_35] : memref<1x32xf32, #tpu.memory_space<vmem>>, vector<1x32xf32>
    %cst_36 = arith.constant dense<0.000000e+00> : vector<40xf32>
    %70 = vector.multi_reduction <add>, %67, %cst_36 [1] : vector<40x32xf32> to vector<40xf32>
    %71 = vector.shape_cast %70 : vector<40xf32> to vector<40x1xf32>
    %cst_37 = arith.constant 3.200000e+01 : f32
    %72 = vector.broadcast %cst_37 : f32 to vector<40x1xf32>
    %73 = arith.divf %71, %72 : vector<40x1xf32>
    %74 = vector.broadcast %73 : vector<40x1xf32> to vector<40x32xf32>
    %75 = arith.subf %67, %74 : vector<40x32xf32>
    %76 = arith.mulf %75, %75 : vector<40x32xf32>
    %cst_38 = arith.constant dense<0.000000e+00> : vector<40xf32>
    %77 = vector.multi_reduction <add>, %76, %cst_38 [1] : vector<40x32xf32> to vector<40xf32>
    %78 = vector.shape_cast %77 : vector<40xf32> to vector<40x1xf32>
    %cst_39 = arith.constant 3.200000e+01 : f32
    %79 = vector.broadcast %cst_39 : f32 to vector<40x1xf32>
    %80 = arith.divf %78, %79 : vector<40x1xf32>
    %81 = vector.broadcast %73 : vector<40x1xf32> to vector<40x32xf32>
    %82 = arith.subf %67, %81 : vector<40x32xf32>
    %cst_40 = arith.constant 9.99999974E-6 : f32
    %83 = vector.broadcast %cst_40 : f32 to vector<40x1xf32>
    %84 = arith.addf %80, %83 : vector<40x1xf32>
    %85 = math.rsqrt %84 : vector<40x1xf32>
    %86 = vector.broadcast %85 : vector<40x1xf32> to vector<40x32xf32>
    %87 = arith.mulf %82, %86 : vector<40x32xf32>
    %88 = vector.broadcast %68 : vector<1x32xf32> to vector<40x32xf32>
    %89 = arith.mulf %87, %88 : vector<40x32xf32>
    %90 = vector.broadcast %69 : vector<1x32xf32> to vector<40x32xf32>
    %91 = arith.addf %89, %90 : vector<40x32xf32>
    %92 = vector.extract_strided_slice %64 {offsets = [0, 64], sizes = [40, 32], strides = [1, 1]} : vector<40x192xf32> to vector<40x32xf32>
    %c0_41 = arith.constant 0 : index
    %c0_42 = arith.constant 0 : index
    %93 = vector.load %arg15[%c0_41, %c0_42] : memref<1x32xf32, #tpu.memory_space<vmem>>, vector<1x32xf32>
    %c0_43 = arith.constant 0 : index
    %c0_44 = arith.constant 0 : index
    %94 = vector.load %arg16[%c0_43, %c0_44] : memref<1x32xf32, #tpu.memory_space<vmem>>, vector<1x32xf32>
    %cst_45 = arith.constant dense<0.000000e+00> : vector<40xf32>
    %95 = vector.multi_reduction <add>, %92, %cst_45 [1] : vector<40x32xf32> to vector<40xf32>
    %96 = vector.shape_cast %95 : vector<40xf32> to vector<40x1xf32>
    %cst_46 = arith.constant 3.200000e+01 : f32
    %97 = vector.broadcast %cst_46 : f32 to vector<40x1xf32>
    %98 = arith.divf %96, %97 : vector<40x1xf32>
    %99 = vector.broadcast %98 : vector<40x1xf32> to vector<40x32xf32>
    %100 = arith.subf %92, %99 : vector<40x32xf32>
    %101 = arith.mulf %100, %100 : vector<40x32xf32>
    %cst_47 = arith.constant dense<0.000000e+00> : vector<40xf32>
    %102 = vector.multi_reduction <add>, %101, %cst_47 [1] : vector<40x32xf32> to vector<40xf32>
    %103 = vector.shape_cast %102 : vector<40xf32> to vector<40x1xf32>
    %cst_48 = arith.constant 3.200000e+01 : f32
    %104 = vector.broadcast %cst_48 : f32 to vector<40x1xf32>
    %105 = arith.divf %103, %104 : vector<40x1xf32>
    %106 = vector.broadcast %98 : vector<40x1xf32> to vector<40x32xf32>
    %107 = arith.subf %92, %106 : vector<40x32xf32>
    %cst_49 = arith.constant 9.99999974E-6 : f32
    %108 = vector.broadcast %cst_49 : f32 to vector<40x1xf32>
    %109 = arith.addf %105, %108 : vector<40x1xf32>
    %110 = math.rsqrt %109 : vector<40x1xf32>
    %111 = vector.broadcast %110 : vector<40x1xf32> to vector<40x32xf32>
    %112 = arith.mulf %107, %111 : vector<40x32xf32>
    %113 = vector.broadcast %93 : vector<1x32xf32> to vector<40x32xf32>
    %114 = arith.mulf %112, %113 : vector<40x32xf32>
    %115 = vector.broadcast %94 : vector<1x32xf32> to vector<40x32xf32>
    %116 = arith.addf %114, %115 : vector<40x32xf32>
    %117 = vector.extract_strided_slice %91 {offsets = [0, 16], sizes = [40, 16], strides = [1, 1]} : vector<40x32xf32> to vector<40x16xf32>
    %118 = vector.extract_strided_slice %91 {offsets = [0, 0], sizes = [40, 16], strides = [1, 1]} : vector<40x32xf32> to vector<40x16xf32>
    %119 = tpu.concatenate %117, %118 in 1 : vector<40x16xf32>, vector<40x16xf32> -> vector<40x32xf32>
    %120 = arith.mulf %91, %65 : vector<40x32xf32>
    %121 = arith.mulf %119, %66 : vector<40x32xf32>
    %122 = arith.addf %120, %121 : vector<40x32xf32>
    %cst_50 = arith.constant 0.176776692 : f32
    %123 = vector.broadcast %cst_50 : f32 to vector<40x32xf32>
    %124 = arith.mulf %122, %123 : vector<40x32xf32>
    %125 = vector.extract_strided_slice %116 {offsets = [0, 16], sizes = [40, 16], strides = [1, 1]} : vector<40x32xf32> to vector<40x16xf32>
    %126 = vector.extract_strided_slice %116 {offsets = [0, 0], sizes = [40, 16], strides = [1, 1]} : vector<40x32xf32> to vector<40x16xf32>
    %127 = tpu.concatenate %125, %126 in 1 : vector<40x16xf32>, vector<40x16xf32> -> vector<40x32xf32>
    %128 = arith.mulf %116, %65 : vector<40x32xf32>
    %129 = arith.mulf %127, %66 : vector<40x32xf32>
    %130 = arith.addf %128, %129 : vector<40x32xf32>
    %131 = vector.extract_strided_slice %64 {offsets = [0, 32], sizes = [40, 32], strides = [1, 1]} : vector<40x192xf32> to vector<40x32xf32>
    %c0_51 = arith.constant 0 : index
    %c0_52 = arith.constant 0 : index
    %132 = vector.load %arg13[%c0_51, %c0_52] : memref<1x32xf32, #tpu.memory_space<vmem>>, vector<1x32xf32>
    %c0_53 = arith.constant 0 : index
    %c0_54 = arith.constant 0 : index
    %133 = vector.load %arg14[%c0_53, %c0_54] : memref<1x32xf32, #tpu.memory_space<vmem>>, vector<1x32xf32>
    %cst_55 = arith.constant dense<0.000000e+00> : vector<40xf32>
    %134 = vector.multi_reduction <add>, %131, %cst_55 [1] : vector<40x32xf32> to vector<40xf32>
    %135 = vector.shape_cast %134 : vector<40xf32> to vector<40x1xf32>
    %cst_56 = arith.constant 3.200000e+01 : f32
    %136 = vector.broadcast %cst_56 : f32 to vector<40x1xf32>
    %137 = arith.divf %135, %136 : vector<40x1xf32>
    %138 = vector.broadcast %137 : vector<40x1xf32> to vector<40x32xf32>
    %139 = arith.subf %131, %138 : vector<40x32xf32>
    %140 = arith.mulf %139, %139 : vector<40x32xf32>
    %cst_57 = arith.constant dense<0.000000e+00> : vector<40xf32>
    %141 = vector.multi_reduction <add>, %140, %cst_57 [1] : vector<40x32xf32> to vector<40xf32>
    %142 = vector.shape_cast %141 : vector<40xf32> to vector<40x1xf32>
    %cst_58 = arith.constant 3.200000e+01 : f32
    %143 = vector.broadcast %cst_58 : f32 to vector<40x1xf32>
    %144 = arith.divf %142, %143 : vector<40x1xf32>
    %145 = vector.broadcast %137 : vector<40x1xf32> to vector<40x32xf32>
    %146 = arith.subf %131, %145 : vector<40x32xf32>
    %cst_59 = arith.constant 9.99999974E-6 : f32
    %147 = vector.broadcast %cst_59 : f32 to vector<40x1xf32>
    %148 = arith.addf %144, %147 : vector<40x1xf32>
    %149 = math.rsqrt %148 : vector<40x1xf32>
    %150 = vector.broadcast %149 : vector<40x1xf32> to vector<40x32xf32>
    %151 = arith.mulf %146, %150 : vector<40x32xf32>
    %152 = vector.broadcast %132 : vector<1x32xf32> to vector<40x32xf32>
    %153 = arith.mulf %151, %152 : vector<40x32xf32>
    %154 = vector.broadcast %133 : vector<1x32xf32> to vector<40x32xf32>
    %155 = arith.addf %153, %154 : vector<40x32xf32>
    %156 = vector.extract_strided_slice %64 {offsets = [0, 96], sizes = [40, 32], strides = [1, 1]} : vector<40x192xf32> to vector<40x32xf32>
    %c0_60 = arith.constant 0 : index
    %c0_61 = arith.constant 0 : index
    %157 = vector.load %arg15[%c0_60, %c0_61] : memref<1x32xf32, #tpu.memory_space<vmem>>, vector<1x32xf32>
    %c0_62 = arith.constant 0 : index
    %c0_63 = arith.constant 0 : index
    %158 = vector.load %arg16[%c0_62, %c0_63] : memref<1x32xf32, #tpu.memory_space<vmem>>, vector<1x32xf32>
    %cst_64 = arith.constant dense<0.000000e+00> : vector<40xf32>
    %159 = vector.multi_reduction <add>, %156, %cst_64 [1] : vector<40x32xf32> to vector<40xf32>
    %160 = vector.shape_cast %159 : vector<40xf32> to vector<40x1xf32>
    %cst_65 = arith.constant 3.200000e+01 : f32
    %161 = vector.broadcast %cst_65 : f32 to vector<40x1xf32>
    %162 = arith.divf %160, %161 : vector<40x1xf32>
    %163 = vector.broadcast %162 : vector<40x1xf32> to vector<40x32xf32>
    %164 = arith.subf %156, %163 : vector<40x32xf32>
    %165 = arith.mulf %164, %164 : vector<40x32xf32>
    %cst_66 = arith.constant dense<0.000000e+00> : vector<40xf32>
    %166 = vector.multi_reduction <add>, %165, %cst_66 [1] : vector<40x32xf32> to vector<40xf32>
    %167 = vector.shape_cast %166 : vector<40xf32> to vector<40x1xf32>
    %cst_67 = arith.constant 3.200000e+01 : f32
    %168 = vector.broadcast %cst_67 : f32 to vector<40x1xf32>
    %169 = arith.divf %167, %168 : vector<40x1xf32>
    %170 = vector.broadcast %162 : vector<40x1xf32> to vector<40x32xf32>
    %171 = arith.subf %156, %170 : vector<40x32xf32>
    %cst_68 = arith.constant 9.99999974E-6 : f32
    %172 = vector.broadcast %cst_68 : f32 to vector<40x1xf32>
    %173 = arith.addf %169, %172 : vector<40x1xf32>
    %174 = math.rsqrt %173 : vector<40x1xf32>
    %175 = vector.broadcast %174 : vector<40x1xf32> to vector<40x32xf32>
    %176 = arith.mulf %171, %175 : vector<40x32xf32>
    %177 = vector.broadcast %157 : vector<1x32xf32> to vector<40x32xf32>
    %178 = arith.mulf %176, %177 : vector<40x32xf32>
    %179 = vector.broadcast %158 : vector<1x32xf32> to vector<40x32xf32>
    %180 = arith.addf %178, %179 : vector<40x32xf32>
    %181 = vector.extract_strided_slice %155 {offsets = [0, 16], sizes = [40, 16], strides = [1, 1]} : vector<40x32xf32> to vector<40x16xf32>
    %182 = vector.extract_strided_slice %155 {offsets = [0, 0], sizes = [40, 16], strides = [1, 1]} : vector<40x32xf32> to vector<40x16xf32>
    %183 = tpu.concatenate %181, %182 in 1 : vector<40x16xf32>, vector<40x16xf32> -> vector<40x32xf32>
    %184 = arith.mulf %155, %65 : vector<40x32xf32>
    %185 = arith.mulf %183, %66 : vector<40x32xf32>
    %186 = arith.addf %184, %185 : vector<40x32xf32>
    %cst_69 = arith.constant 0.176776692 : f32
    %187 = vector.broadcast %cst_69 : f32 to vector<40x32xf32>
    %188 = arith.mulf %186, %187 : vector<40x32xf32>
    %189 = vector.extract_strided_slice %180 {offsets = [0, 16], sizes = [40, 16], strides = [1, 1]} : vector<40x32xf32> to vector<40x16xf32>
    %190 = vector.extract_strided_slice %180 {offsets = [0, 0], sizes = [40, 16], strides = [1, 1]} : vector<40x32xf32> to vector<40x16xf32>
    %191 = tpu.concatenate %189, %190 in 1 : vector<40x16xf32>, vector<40x16xf32> -> vector<40x32xf32>
    %192 = arith.mulf %180, %65 : vector<40x32xf32>
    %193 = arith.mulf %191, %66 : vector<40x32xf32>
    %194 = arith.addf %192, %193 : vector<40x32xf32>
    %195 = tpu.concatenate %124, %188 in 1 : vector<40x32xf32>, vector<40x32xf32> -> vector<40x64xf32>
    %196 = arith.truncf %195 : vector<40x64xf32> to vector<40x64xbf16>
    %c0_70 = arith.constant 0 : index
    %c0_71 = arith.constant 0 : index
    %c0_72 = arith.constant 0 : index
    %197 = vector.load %arg17[%c0_70, %c0_71, %c0_72] : memref<1x40x64xbf16, #tpu.memory_space<vmem>>, vector<1x40x64xbf16>
    %198 = vector.shape_cast %197 : vector<1x40x64xbf16> to vector<40x64xbf16>
    %199 = vector.shape_cast %196 : vector<40x64xbf16> to vector<1x40x64xbf16>
    tpu.vector_store %arg17[%c0_70, %c0_71, %c0_72], %199 {strides = array<i32>} : memref<1x40x64xbf16, #tpu.memory_space<vmem>>, vector<1x40x64xbf16>,
    %200 = vector.extract_strided_slice %64 {offsets = [0, 128], sizes = [40, 64], strides = [1, 1]} : vector<40x192xf32> to vector<40x64xf32>
    %201 = tpu.concatenate %130, %194, %200 in 1 : vector<40x32xf32>, vector<40x32xf32>, vector<40x64xf32> -> vector<40x128xf32>
    %202 = arith.truncf %201 : vector<40x128xf32> to vector<40x128xbf16>
    %c0_73 = arith.constant 0 : index
    %c0_74 = arith.constant 0 : index
    %c0_75 = arith.constant 0 : index
    %203 = vector.load %arg18[%c0_73, %c0_74, %c0_75] : memref<1x40x128xbf16, #tpu.memory_space<vmem>>, vector<1x40x128xbf16>
    %204 = vector.shape_cast %203 : vector<1x40x128xbf16> to vector<40x128xbf16>
    %205 = vector.shape_cast %202 : vector<40x128xbf16> to vector<1x40x128xbf16>
    tpu.vector_store %arg18[%c0_73, %c0_74, %c0_75], %205 {strides = array<i32>} : memref<1x40x128xbf16, #tpu.memory_space<vmem>>, vector<1x40x128xbf16>,
    return
  }
  func.func @transform_0(%arg0: i32, %arg1: i32) -> (i32, i32, i32) {
    %c0_i32 = arith.constant 0 : i32
    %c0_i32_0 = arith.constant 0 : i32
    return %arg0, %arg1, %c0_i32 : i32, i32, i32
  }
  func.func @transform_1(%arg0: i32, %arg1: i32) -> (i32, i32) {
    %c0_i32 = arith.constant 0 : i32
    %c0_i32_0 = arith.constant 0 : i32
    %c0_i32_1 = arith.constant 0 : i32
    return %c0_i32, %c0_i32_0 : i32, i32
  }
  func.func @transform_2(%arg0: i32, %arg1: i32) -> (i32, i32) {
    %c0_i32 = arith.constant 0 : i32
    %c0_i32_0 = arith.constant 0 : i32
    %c0_i32_1 = arith.constant 0 : i32
    return %c0_i32, %c0_i32_0 : i32, i32
  }
  func.func @transform_3(%arg0: i32, %arg1: i32) -> (i32, i32, i32) {
    %c0_i32 = arith.constant 0 : i32
    %c0_i32_0 = arith.constant 0 : i32
    %c0_i32_1 = arith.constant 0 : i32
    return %arg0, %c0_i32, %c0_i32_0 : i32, i32, i32
  }
  func.func @transform_4(%arg0: i32, %arg1: i32) -> (i32, i32, i32) {
    %c0_i32 = arith.constant 0 : i32
    %c0_i32_0 = arith.constant 0 : i32
    %c0_i32_1 = arith.constant 0 : i32
    return %arg0, %c0_i32, %c0_i32_0 : i32, i32, i32
  }
  func.func @transform_5(%arg0: i32, %arg1: i32) -> (i32, i32, i32) {
    %c0_i32 = arith.constant 0 : i32
    %c0_i32_0 = arith.constant 0 : i32
    %c0_i32_1 = arith.constant 0 : i32
    return %arg0, %c0_i32, %c0_i32_0 : i32, i32, i32
  }
  func.func @transform_6(%arg0: i32, %arg1: i32) -> (i32, i32, i32) {
    %c0_i32 = arith.constant 0 : i32
    %c0_i32_0 = arith.constant 0 : i32
    %c0_i32_1 = arith.constant 0 : i32
    return %arg0, %c0_i32, %c0_i32_0 : i32, i32, i32
  }
  func.func @transform_7(%arg0: i32, %arg1: i32) -> (i32, i32) {
    %c0_i32 = arith.constant 0 : i32
    %c0_i32_0 = arith.constant 0 : i32
    %c0_i32_1 = arith.constant 0 : i32
    return %c0_i32, %c0_i32_0 : i32, i32
  }
  func.func @transform_8(%arg0: i32, %arg1: i32) -> (i32, i32) {
    %c0_i32 = arith.constant 0 : i32
    %c0_i32_0 = arith.constant 0 : i32
    %c0_i32_1 = arith.constant 0 : i32
    return %c0_i32, %c0_i32_0 : i32, i32
  }
  func.func @transform_9(%arg0: i32, %arg1: i32) -> (i32, i32) {
    %c0_i32 = arith.constant 0 : i32
    %c0_i32_0 = arith.constant 0 : i32
    return %arg1, %c0_i32 : i32, i32
  }
  func.func @transform_10(%arg0: i32, %arg1: i32) -> (i32, i32) {
    %c0_i32 = arith.constant 0 : i32
    %c0_i32_0 = arith.constant 0 : i32
    return %arg1, %c0_i32 : i32, i32
  }
  func.func @transform_11(%arg0: i32, %arg1: i32) -> (i32, i32) {
    %c0_i32 = arith.constant 0 : i32
    %c0_i32_0 = arith.constant 0 : i32
    %c0_i32_1 = arith.constant 0 : i32
    return %c0_i32, %c0_i32_0 : i32, i32
  }
  func.func @transform_12(%arg0: i32, %arg1: i32) -> (i32, i32) {
    %c0_i32 = arith.constant 0 : i32
    %c0_i32_0 = arith.constant 0 : i32
    %c0_i32_1 = arith.constant 0 : i32
    return %c0_i32, %c0_i32_0 : i32, i32
  }
  func.func @transform_13(%arg0: i32, %arg1: i32) -> (i32, i32) {
    %c0_i32 = arith.constant 0 : i32
    %c0_i32_0 = arith.constant 0 : i32
    %c0_i32_1 = arith.constant 0 : i32
    return %c0_i32, %c0_i32_0 : i32, i32
  }
  func.func @transform_14(%arg0: i32, %arg1: i32) -> (i32, i32) {
    %c0_i32 = arith.constant 0 : i32
    %c0_i32_0 = arith.constant 0 : i32
    %c0_i32_1 = arith.constant 0 : i32
    return %c0_i32, %c0_i32_0 : i32, i32
  }
  func.func @transform_15(%arg0: i32, %arg1: i32) -> (i32, i32, i32) {
    %c0_i32 = arith.constant 0 : i32
    %c0_i32_0 = arith.constant 0 : i32
    return %arg0, %arg1, %c0_i32 : i32, i32, i32
  }
  func.func @transform_16(%arg0: i32, %arg1: i32) -> (i32, i32, i32) {
    %c0_i32 = arith.constant 0 : i32
    %c0_i32_0 = arith.constant 0 : i32
    return %arg0, %arg1, %c0_i32 : i32, i32, i32
  }
}

module attributes {stable_mosaic.version = 11 : i64} {
  func.func @_post_attn_kernel(%arg0: i32, %arg1: i32, %arg2: memref<1x40x64xbf16, #tpu.memory_space<vmem>>, %arg3: memref<1x40x64xbf16, #tpu.memory_space<vmem>>, %arg4: memref<64x64xbf16, #tpu.memory_space<vmem>>, %arg5: memref<1x64xf32, #tpu.memory_space<vmem>>, %arg6: memref<1x64xf32, #tpu.memory_space<vmem>>, %arg7: memref<1x64xf32, #tpu.memory_space<vmem>>, %arg8: memref<1x1x64xf32, #tpu.memory_space<vmem>>, %arg9: memref<1x1x64xf32, #tpu.memory_space<vmem>>, %arg10: memref<1x64xf32, #tpu.memory_space<vmem>>, %arg11: memref<1x64xf32, #tpu.memory_space<vmem>>, %arg12: memref<1x1x64xf32, #tpu.memory_space<vmem>>, %arg13: memref<1x1x64xf32, #tpu.memory_space<vmem>>, %arg14: memref<1x1x64xf32, #tpu.memory_space<vmem>>, %arg15: memref<1x1x64xf32, #tpu.memory_space<vmem>>, %arg16: memref<1x1x64xf32, #tpu.memory_space<vmem>>, %arg17: memref<1x1x64xf32, #tpu.memory_space<vmem>>, %arg18: memref<64x256xbf16, #tpu.memory_space<vmem>>, %arg19: memref<1x256xf32, #tpu.memory_space<vmem>>, %arg20: memref<256x64xbf16, #tpu.memory_space<vmem>>, %arg21: memref<1x64xf32, #tpu.memory_space<vmem>>, %arg22: memref<1x40x64xbf16, #tpu.memory_space<vmem>>) attributes {dimension_semantics = [#tpu.dimension_semantics<parallel>, #tpu.dimension_semantics<parallel>], iteration_bounds = array<i64: 1, 1>, scalar_prefetch = 0 : i64, scratch_operands = 0 : i64, tpu.core_type = #tpu.core_type<tc>, window_params = [{transform_indices = @transform_0, window_bounds = array<i64: 1, 40, 64>}, {transform_indices = @transform_1, window_bounds = array<i64: 1, 40, 64>}, {pipeline_mode = #tpu.pipeline_mode<synchronous>, transform_indices = @transform_2, window_bounds = array<i64: 64, 64>}, {pipeline_mode = #tpu.pipeline_mode<synchronous>, transform_indices = @transform_3, window_bounds = array<i64: 1, 64>}, {pipeline_mode = #tpu.pipeline_mode<synchronous>, transform_indices = @transform_4, window_bounds = array<i64: 1, 64>}, {pipeline_mode = #tpu.pipeline_mode<synchronous>, transform_indices = @transform_5, window_bounds = array<i64: 1, 64>}, {transform_indices = @transform_6, window_bounds = array<i64: 1, 1, 64>}, {transform_indices = @transform_7, window_bounds = array<i64: 1, 1, 64>}, {pipeline_mode = #tpu.pipeline_mode<synchronous>, transform_indices = @transform_8, window_bounds = array<i64: 1, 64>}, {pipeline_mode = #tpu.pipeline_mode<synchronous>, transform_indices = @transform_9, window_bounds = array<i64: 1, 64>}, {transform_indices = @transform_10, window_bounds = array<i64: 1, 1, 64>}, {transform_indices = @transform_11, window_bounds = array<i64: 1, 1, 64>}, {transform_indices = @transform_12, window_bounds = array<i64: 1, 1, 64>}, {transform_indices = @transform_13, window_bounds = array<i64: 1, 1, 64>}, {transform_indices = @transform_14, window_bounds = array<i64: 1, 1, 64>}, {transform_indices = @transform_15, window_bounds = array<i64: 1, 1, 64>}, {pipeline_mode = #tpu.pipeline_mode<synchronous>, transform_indices = @transform_16, window_bounds = array<i64: 64, 256>}, {pipeline_mode = #tpu.pipeline_mode<synchronous>, transform_indices = @transform_17, window_bounds = array<i64: 1, 256>}, {pipeline_mode = #tpu.pipeline_mode<synchronous>, transform_indices = @transform_18, window_bounds = array<i64: 256, 64>}, {pipeline_mode = #tpu.pipeline_mode<synchronous>, transform_indices = @transform_19, window_bounds = array<i64: 1, 64>}, {transform_indices = @transform_20, window_bounds = array<i64: 1, 40, 64>}]} {
    %c40_i32 = arith.constant 40 : i32
    %0 = arith.muli %arg1, %c40_i32 : i32
    %1 = tpu.iota {dimensions = array<i32: 0>} : vector<40x1xi32>
    %2 = vector.broadcast %0 : i32 to vector<40x1xi32>
    %3 = arith.addi %2, %1 : vector<40x1xi32>
    %c8_i32 = arith.constant 8 : i32
    %4 = vector.broadcast %c8_i32 : i32 to vector<40x1xi32>
    %5 = arith.cmpi slt, %3, %4 : vector<40x1xi32>
    %c0 = arith.constant 0 : index
    %c0_0 = arith.constant 0 : index
    %c0_1 = arith.constant 0 : index
    %6 = vector.load %arg2[%c0, %c0_0, %c0_1] : memref<1x40x64xbf16, #tpu.memory_space<vmem>>, vector<1x40x64xbf16>
    %7 = vector.shape_cast %6 : vector<1x40x64xbf16> to vector<40x64xbf16>
    %c0_2 = arith.constant 0 : index
    %c0_3 = arith.constant 0 : index
    %8 = vector.load %arg4[%c0_2, %c0_3] : memref<64x64xbf16, #tpu.memory_space<vmem>>, vector<64x64xbf16>
    %cst = arith.constant dense<0.000000e+00> : vector<40x64xf32>
    %9 = tpu.matmul %7, %8, %cst {dimension_numbers = #tpu.dot_dimension_numbers<[1], [0], [0], [1], [0, 0, 1, 1], [], []>} : vector<40x64xbf16>, vector<64x64xbf16>, vector<40x64xf32> -> vector<40x64xf32>
    %c0_4 = arith.constant 0 : index
    %c0_5 = arith.constant 0 : index
    %10 = vector.load %arg5[%c0_4, %c0_5] : memref<1x64xf32, #tpu.memory_space<vmem>>, vector<1x64xf32>
    %11 = vector.broadcast %10 : vector<1x64xf32> to vector<40x64xf32>
    %12 = arith.addf %9, %11 : vector<40x64xf32>
    %c0_6 = arith.constant 0 : index
    %c0_7 = arith.constant 0 : index
    %13 = vector.load %arg6[%c0_6, %c0_7] : memref<1x64xf32, #tpu.memory_space<vmem>>, vector<1x64xf32>
    %c0_8 = arith.constant 0 : index
    %c0_9 = arith.constant 0 : index
    %14 = vector.load %arg7[%c0_8, %c0_9] : memref<1x64xf32, #tpu.memory_space<vmem>>, vector<1x64xf32>
    %15 = vector.shape_cast %5 : vector<40x1xi1> to vector<40x1xi1>
    %16 = vector.broadcast %15 : vector<40x1xi1> to vector<40x64xi1>
    %17 = vector.shape_cast %13 : vector<1x64xf32> to vector<1x64xf32>
    %18 = vector.broadcast %17 : vector<1x64xf32> to vector<40x64xf32>
    %19 = vector.shape_cast %14 : vector<1x64xf32> to vector<1x64xf32>
    %20 = vector.broadcast %19 : vector<1x64xf32> to vector<40x64xf32>
    %21 = arith.select %16, %18, %20 : vector<40x64xi1>, vector<40x64xf32>
    %c0_10 = arith.constant 0 : index
    %c0_11 = arith.constant 0 : index
    %c0_12 = arith.constant 0 : index
    %22 = vector.load %arg8[%c0_10, %c0_11, %c0_12] : memref<1x1x64xf32, #tpu.memory_space<vmem>>, vector<1x1x64xf32>
    %23 = vector.shape_cast %22 : vector<1x1x64xf32> to vector<1x64xf32>
    %c0_13 = arith.constant 0 : index
    %c0_14 = arith.constant 0 : index
    %c0_15 = arith.constant 0 : index
    %24 = vector.load %arg9[%c0_13, %c0_14, %c0_15] : memref<1x1x64xf32, #tpu.memory_space<vmem>>, vector<1x1x64xf32>
    %25 = vector.shape_cast %24 : vector<1x1x64xf32> to vector<1x64xf32>
    %26 = vector.shape_cast %5 : vector<40x1xi1> to vector<40x1xi1>
    %27 = vector.broadcast %26 : vector<40x1xi1> to vector<40x64xi1>
    %28 = vector.shape_cast %23 : vector<1x64xf32> to vector<1x64xf32>
    %29 = vector.broadcast %28 : vector<1x64xf32> to vector<40x64xf32>
    %30 = vector.shape_cast %25 : vector<1x64xf32> to vector<1x64xf32>
    %31 = vector.broadcast %30 : vector<1x64xf32> to vector<40x64xf32>
    %32 = arith.select %27, %29, %31 : vector<40x64xi1>, vector<40x64xf32>
    %c0_16 = arith.constant 0 : index
    %c0_17 = arith.constant 0 : index
    %c0_18 = arith.constant 0 : index
    %33 = vector.load %arg3[%c0_16, %c0_17, %c0_18] : memref<1x40x64xbf16, #tpu.memory_space<vmem>>, vector<1x40x64xbf16>
    %34 = vector.shape_cast %33 : vector<1x40x64xbf16> to vector<40x64xbf16>
    %35 = arith.extf %34 : vector<40x64xbf16> to vector<40x64xf32>
    %36 = arith.mulf %21, %12 : vector<40x64xf32>
    %37 = arith.mulf %32, %36 : vector<40x64xf32>
    %38 = arith.addf %35, %37 : vector<40x64xf32>
    %c0_19 = arith.constant 0 : index
    %c0_20 = arith.constant 0 : index
    %39 = vector.load %arg10[%c0_19, %c0_20] : memref<1x64xf32, #tpu.memory_space<vmem>>, vector<1x64xf32>
    %c0_21 = arith.constant 0 : index
    %c0_22 = arith.constant 0 : index
    %40 = vector.load %arg11[%c0_21, %c0_22] : memref<1x64xf32, #tpu.memory_space<vmem>>, vector<1x64xf32>
    %cst_23 = arith.constant dense<0.000000e+00> : vector<40xf32>
    %41 = vector.multi_reduction <add>, %38, %cst_23 [1] : vector<40x64xf32> to vector<40xf32>
    %42 = vector.shape_cast %41 : vector<40xf32> to vector<40x1xf32>
    %cst_24 = arith.constant 6.400000e+01 : f32
    %43 = vector.broadcast %cst_24 : f32 to vector<40x1xf32>
    %44 = arith.divf %42, %43 : vector<40x1xf32>
    %45 = vector.broadcast %44 : vector<40x1xf32> to vector<40x64xf32>
    %46 = arith.subf %38, %45 : vector<40x64xf32>
    %47 = arith.mulf %46, %46 : vector<40x64xf32>
    %cst_25 = arith.constant dense<0.000000e+00> : vector<40xf32>
    %48 = vector.multi_reduction <add>, %47, %cst_25 [1] : vector<40x64xf32> to vector<40xf32>
    %49 = vector.shape_cast %48 : vector<40xf32> to vector<40x1xf32>
    %cst_26 = arith.constant 6.400000e+01 : f32
    %50 = vector.broadcast %cst_26 : f32 to vector<40x1xf32>
    %51 = arith.divf %49, %50 : vector<40x1xf32>
    %52 = vector.broadcast %44 : vector<40x1xf32> to vector<40x64xf32>
    %53 = arith.subf %38, %52 : vector<40x64xf32>
    %cst_27 = arith.constant 9.99999974E-6 : f32
    %54 = vector.broadcast %cst_27 : f32 to vector<40x1xf32>
    %55 = arith.addf %51, %54 : vector<40x1xf32>
    %56 = math.rsqrt %55 : vector<40x1xf32>
    %57 = vector.broadcast %56 : vector<40x1xf32> to vector<40x64xf32>
    %58 = arith.mulf %53, %57 : vector<40x64xf32>
    %59 = vector.broadcast %39 : vector<1x64xf32> to vector<40x64xf32>
    %60 = arith.mulf %58, %59 : vector<40x64xf32>
    %61 = vector.broadcast %40 : vector<1x64xf32> to vector<40x64xf32>
    %62 = arith.addf %60, %61 : vector<40x64xf32>
    %c0_28 = arith.constant 0 : index
    %c0_29 = arith.constant 0 : index
    %c0_30 = arith.constant 0 : index
    %63 = vector.load %arg13[%c0_28, %c0_29, %c0_30] : memref<1x1x64xf32, #tpu.memory_space<vmem>>, vector<1x1x64xf32>
    %64 = vector.shape_cast %63 : vector<1x1x64xf32> to vector<1x64xf32>
    %c0_31 = arith.constant 0 : index
    %c0_32 = arith.constant 0 : index
    %c0_33 = arith.constant 0 : index
    %65 = vector.load %arg15[%c0_31, %c0_32, %c0_33] : memref<1x1x64xf32, #tpu.memory_space<vmem>>, vector<1x1x64xf32>
    %66 = vector.shape_cast %65 : vector<1x1x64xf32> to vector<1x64xf32>
    %67 = vector.shape_cast %5 : vector<40x1xi1> to vector<40x1xi1>
    %68 = vector.broadcast %67 : vector<40x1xi1> to vector<40x64xi1>
    %69 = vector.shape_cast %64 : vector<1x64xf32> to vector<1x64xf32>
    %70 = vector.broadcast %69 : vector<1x64xf32> to vector<40x64xf32>
    %71 = vector.shape_cast %66 : vector<1x64xf32> to vector<1x64xf32>
    %72 = vector.broadcast %71 : vector<1x64xf32> to vector<40x64xf32>
    %73 = arith.select %68, %70, %72 : vector<40x64xi1>, vector<40x64xf32>
    %c0_34 = arith.constant 0 : index
    %c0_35 = arith.constant 0 : index
    %c0_36 = arith.constant 0 : index
    %74 = vector.load %arg12[%c0_34, %c0_35, %c0_36] : memref<1x1x64xf32, #tpu.memory_space<vmem>>, vector<1x1x64xf32>
    %75 = vector.shape_cast %74 : vector<1x1x64xf32> to vector<1x64xf32>
    %c0_37 = arith.constant 0 : index
    %c0_38 = arith.constant 0 : index
    %c0_39 = arith.constant 0 : index
    %76 = vector.load %arg14[%c0_37, %c0_38, %c0_39] : memref<1x1x64xf32, #tpu.memory_space<vmem>>, vector<1x1x64xf32>
    %77 = vector.shape_cast %76 : vector<1x1x64xf32> to vector<1x64xf32>
    %78 = vector.shape_cast %5 : vector<40x1xi1> to vector<40x1xi1>
    %79 = vector.broadcast %78 : vector<40x1xi1> to vector<40x64xi1>
    %80 = vector.shape_cast %75 : vector<1x64xf32> to vector<1x64xf32>
    %81 = vector.broadcast %80 : vector<1x64xf32> to vector<40x64xf32>
    %82 = vector.shape_cast %77 : vector<1x64xf32> to vector<1x64xf32>
    %83 = vector.broadcast %82 : vector<1x64xf32> to vector<40x64xf32>
    %84 = arith.select %79, %81, %83 : vector<40x64xi1>, vector<40x64xf32>
    %cst_40 = arith.constant 1.000000e+00 : f32
    %85 = vector.broadcast %cst_40 : f32 to vector<40x64xf32>
    %86 = arith.addf %85, %73 : vector<40x64xf32>
    %87 = arith.mulf %62, %86 : vector<40x64xf32>
    %88 = arith.addf %87, %84 : vector<40x64xf32>
    %89 = arith.truncf %88 : vector<40x64xf32> to vector<40x64xbf16>
    %c0_41 = arith.constant 0 : index
    %c0_42 = arith.constant 0 : index
    %90 = vector.load %arg18[%c0_41, %c0_42] : memref<64x256xbf16, #tpu.memory_space<vmem>>, vector<64x256xbf16>
    %cst_43 = arith.constant dense<0.000000e+00> : vector<40x256xf32>
    %91 = tpu.matmul %89, %90, %cst_43 {dimension_numbers = #tpu.dot_dimension_numbers<[1], [0], [0], [1], [0, 0, 1, 1], [], []>} : vector<40x64xbf16>, vector<64x256xbf16>, vector<40x256xf32> -> vector<40x256xf32>
    %c0_44 = arith.constant 0 : index
    %c0_45 = arith.constant 0 : index
    %92 = vector.load %arg19[%c0_44, %c0_45] : memref<1x256xf32, #tpu.memory_space<vmem>>, vector<1x256xf32>
    %93 = vector.broadcast %92 : vector<1x256xf32> to vector<40x256xf32>
    %94 = arith.addf %91, %93 : vector<40x256xf32>
    %95 = arith.mulf %94, %94 : vector<40x256xf32>
    %96 = arith.mulf %94, %95 : vector<40x256xf32>
    %cst_46 = arith.constant 4.471500e-02 : f32
    %97 = vector.broadcast %cst_46 : f32 to vector<40x256xf32>
    %98 = arith.mulf %97, %96 : vector<40x256xf32>
    %99 = arith.addf %94, %98 : vector<40x256xf32>
    %cst_47 = arith.constant 0.797884583 : f32
    %100 = vector.broadcast %cst_47 : f32 to vector<40x256xf32>
    %101 = arith.mulf %100, %99 : vector<40x256xf32>
    %102 = math.tanh %101 : vector<40x256xf32>
    %cst_48 = arith.constant 1.000000e+00 : f32
    %103 = vector.broadcast %cst_48 : f32 to vector<40x256xf32>
    %104 = arith.addf %103, %102 : vector<40x256xf32>
    %cst_49 = arith.constant 5.000000e-01 : f32
    %105 = vector.broadcast %cst_49 : f32 to vector<40x256xf32>
    %106 = arith.mulf %105, %104 : vector<40x256xf32>
    %107 = arith.mulf %94, %106 : vector<40x256xf32>
    %108 = arith.truncf %107 : vector<40x256xf32> to vector<40x256xbf16>
    %c0_50 = arith.constant 0 : index
    %c0_51 = arith.constant 0 : index
    %109 = vector.load %arg20[%c0_50, %c0_51] : memref<256x64xbf16, #tpu.memory_space<vmem>>, vector<256x64xbf16>
    %cst_52 = arith.constant dense<0.000000e+00> : vector<40x64xf32>
    %110 = tpu.matmul %108, %109, %cst_52 {dimension_numbers = #tpu.dot_dimension_numbers<[1], [0], [0], [1], [0, 0, 1, 1], [], []>} : vector<40x256xbf16>, vector<256x64xbf16>, vector<40x64xf32> -> vector<40x64xf32>
    %c0_53 = arith.constant 0 : index
    %c0_54 = arith.constant 0 : index
    %111 = vector.load %arg21[%c0_53, %c0_54] : memref<1x64xf32, #tpu.memory_space<vmem>>, vector<1x64xf32>
    %112 = vector.broadcast %111 : vector<1x64xf32> to vector<40x64xf32>
    %113 = arith.addf %110, %112 : vector<40x64xf32>
    %c0_55 = arith.constant 0 : index
    %c0_56 = arith.constant 0 : index
    %c0_57 = arith.constant 0 : index
    %114 = vector.load %arg16[%c0_55, %c0_56, %c0_57] : memref<1x1x64xf32, #tpu.memory_space<vmem>>, vector<1x1x64xf32>
    %115 = vector.shape_cast %114 : vector<1x1x64xf32> to vector<1x64xf32>
    %c0_58 = arith.constant 0 : index
    %c0_59 = arith.constant 0 : index
    %c0_60 = arith.constant 0 : index
    %116 = vector.load %arg17[%c0_58, %c0_59, %c0_60] : memref<1x1x64xf32, #tpu.memory_space<vmem>>, vector<1x1x64xf32>
    %117 = vector.shape_cast %116 : vector<1x1x64xf32> to vector<1x64xf32>
    %118 = vector.shape_cast %5 : vector<40x1xi1> to vector<40x1xi1>
    %119 = vector.broadcast %118 : vector<40x1xi1> to vector<40x64xi1>
    %120 = vector.shape_cast %115 : vector<1x64xf32> to vector<1x64xf32>
    %121 = vector.broadcast %120 : vector<1x64xf32> to vector<40x64xf32>
    %122 = vector.shape_cast %117 : vector<1x64xf32> to vector<1x64xf32>
    %123 = vector.broadcast %122 : vector<1x64xf32> to vector<40x64xf32>
    %124 = arith.select %119, %121, %123 : vector<40x64xi1>, vector<40x64xf32>
    %125 = arith.mulf %124, %113 : vector<40x64xf32>
    %126 = arith.addf %38, %125 : vector<40x64xf32>
    %127 = arith.truncf %126 : vector<40x64xf32> to vector<40x64xbf16>
    %c0_61 = arith.constant 0 : index
    %c0_62 = arith.constant 0 : index
    %c0_63 = arith.constant 0 : index
    %128 = vector.load %arg22[%c0_61, %c0_62, %c0_63] : memref<1x40x64xbf16, #tpu.memory_space<vmem>>, vector<1x40x64xbf16>
    %129 = vector.shape_cast %128 : vector<1x40x64xbf16> to vector<40x64xbf16>
    %130 = vector.shape_cast %127 : vector<40x64xbf16> to vector<1x40x64xbf16>
    tpu.vector_store %arg22[%c0_61, %c0_62, %c0_63], %130 {strides = array<i32>} : memref<1x40x64xbf16, #tpu.memory_space<vmem>>, vector<1x40x64xbf16>,
    return
  }
  func.func @transform_0(%arg0: i32, %arg1: i32) -> (i32, i32, i32) {
    %c0_i32 = arith.constant 0 : i32
    %c0_i32_0 = arith.constant 0 : i32
    return %arg0, %arg1, %c0_i32 : i32, i32, i32
  }
  func.func @transform_1(%arg0: i32, %arg1: i32) -> (i32, i32, i32) {
    %c0_i32 = arith.constant 0 : i32
    %c0_i32_0 = arith.constant 0 : i32
    return %arg0, %arg1, %c0_i32 : i32, i32, i32
  }
  func.func @transform_2(%arg0: i32, %arg1: i32) -> (i32, i32) {
    %c0_i32 = arith.constant 0 : i32
    %c0_i32_0 = arith.constant 0 : i32
    %c0_i32_1 = arith.constant 0 : i32
    return %c0_i32, %c0_i32_0 : i32, i32
  }
  func.func @transform_3(%arg0: i32, %arg1: i32) -> (i32, i32) {
    %c0_i32 = arith.constant 0 : i32
    %c0_i32_0 = arith.constant 0 : i32
    %c0_i32_1 = arith.constant 0 : i32
    return %c0_i32, %c0_i32_0 : i32, i32
  }
  func.func @transform_4(%arg0: i32, %arg1: i32) -> (i32, i32) {
    %c0_i32 = arith.constant 0 : i32
    %c0_i32_0 = arith.constant 0 : i32
    %c0_i32_1 = arith.constant 0 : i32
    return %c0_i32, %c0_i32_0 : i32, i32
  }
  func.func @transform_5(%arg0: i32, %arg1: i32) -> (i32, i32) {
    %c0_i32 = arith.constant 0 : i32
    %c0_i32_0 = arith.constant 0 : i32
    %c0_i32_1 = arith.constant 0 : i32
    return %c0_i32, %c0_i32_0 : i32, i32
  }
  func.func @transform_6(%arg0: i32, %arg1: i32) -> (i32, i32, i32) {
    %c0_i32 = arith.constant 0 : i32
    %c0_i32_0 = arith.constant 0 : i32
    %c0_i32_1 = arith.constant 0 : i32
    return %arg0, %c0_i32, %c0_i32_0 : i32, i32, i32
  }
  func.func @transform_7(%arg0: i32, %arg1: i32) -> (i32, i32, i32) {
    %c0_i32 = arith.constant 0 : i32
    %c0_i32_0 = arith.constant 0 : i32
    %c0_i32_1 = arith.constant 0 : i32
    return %arg0, %c0_i32, %c0_i32_0 : i32, i32, i32
  }
  func.func @transform_8(%arg0: i32, %arg1: i32) -> (i32, i32) {
    %c0_i32 = arith.constant 0 : i32
    %c0_i32_0 = arith.constant 0 : i32
    %c0_i32_1 = arith.constant 0 : i32
    return %c0_i32, %c0_i32_0 : i32, i32
  }
  func.func @transform_9(%arg0: i32, %arg1: i32) -> (i32, i32) {
    %c0_i32 = arith.constant 0 : i32
    %c0_i32_0 = arith.constant 0 : i32
    %c0_i32_1 = arith.constant 0 : i32
    return %c0_i32, %c0_i32_0 : i32, i32
  }
  func.func @transform_10(%arg0: i32, %arg1: i32) -> (i32, i32, i32) {
    %c0_i32 = arith.constant 0 : i32
    %c0_i32_0 = arith.constant 0 : i32
    %c0_i32_1 = arith.constant 0 : i32
    return %arg0, %c0_i32, %c0_i32_0 : i32, i32, i32
  }
  func.func @transform_11(%arg0: i32, %arg1: i32) -> (i32, i32, i32) {
    %c0_i32 = arith.constant 0 : i32
    %c0_i32_0 = arith.constant 0 : i32
    %c0_i32_1 = arith.constant 0 : i32
    return %arg0, %c0_i32, %c0_i32_0 : i32, i32, i32
  }
  func.func @transform_12(%arg0: i32, %arg1: i32) -> (i32, i32, i32) {
    %c0_i32 = arith.constant 0 : i32
    %c0_i32_0 = arith.constant 0 : i32
    %c0_i32_1 = arith.constant 0 : i32
    return %arg0, %c0_i32, %c0_i32_0 : i32, i32, i32
  }
  func.func @transform_13(%arg0: i32, %arg1: i32) -> (i32, i32, i32) {
    %c0_i32 = arith.constant 0 : i32
    %c0_i32_0 = arith.constant 0 : i32
    %c0_i32_1 = arith.constant 0 : i32
    return %arg0, %c0_i32, %c0_i32_0 : i32, i32, i32
  }
  func.func @transform_14(%arg0: i32, %arg1: i32) -> (i32, i32, i32) {
    %c0_i32 = arith.constant 0 : i32
    %c0_i32_0 = arith.constant 0 : i32
    %c0_i32_1 = arith.constant 0 : i32
    return %arg0, %c0_i32, %c0_i32_0 : i32, i32, i32
  }
  func.func @transform_15(%arg0: i32, %arg1: i32) -> (i32, i32, i32) {
    %c0_i32 = arith.constant 0 : i32
    %c0_i32_0 = arith.constant 0 : i32
    %c0_i32_1 = arith.constant 0 : i32
    return %arg0, %c0_i32, %c0_i32_0 : i32, i32, i32
  }
  func.func @transform_16(%arg0: i32, %arg1: i32) -> (i32, i32) {
    %c0_i32 = arith.constant 0 : i32
    %c0_i32_0 = arith.constant 0 : i32
    %c0_i32_1 = arith.constant 0 : i32
    return %c0_i32, %c0_i32_0 : i32, i32
  }
  func.func @transform_17(%arg0: i32, %arg1: i32) -> (i32, i32) {
    %c0_i32 = arith.constant 0 : i32
    %c0_i32_0 = arith.constant 0 : i32
    %c0_i32_1 = arith.constant 0 : i32
    return %c0_i32, %c0_i32_0 : i32, i32
  }
  func.func @transform_18(%arg0: i32, %arg1: i32) -> (i32, i32) {
    %c0_i32 = arith.constant 0 : i32
    %c0_i32_0 = arith.constant 0 : i32
    %c0_i32_1 = arith.constant 0 : i32
    return %c0_i32, %c0_i32_0 : i32, i32
  }
  func.func @transform_19(%arg0: i32, %arg1: i32) -> (i32, i32) {
    %c0_i32 = arith.constant 0 : i32
    %c0_i32_0 = arith.constant 0 : i32
    %c0_i32_1 = arith.constant 0 : i32
    return %c0_i32, %c0_i32_0 : i32, i32
  }
  func.func @transform_20(%arg0: i32, %arg1: i32) -> (i32, i32, i32) {
    %c0_i32 = arith.constant 0 : i32
    %c0_i32_0 = arith.constant 0 : i32
    return %arg0, %arg1, %c0_i32 : i32, i32, i32
  }
}

module attributes {stable_mosaic.version = 11 : i64} {
  func.func @_final_kernel(%arg0: i32, %arg1: i32, %arg2: memref<1x32x64xbf16, #tpu.memory_space<vmem>>, %arg3: memref<1x64xf32, #tpu.memory_space<vmem>>, %arg4: memref<1x64xf32, #tpu.memory_space<vmem>>, %arg5: memref<1x64xf32, #tpu.memory_space<vmem>>, %arg6: memref<1x64xf32, #tpu.memory_space<vmem>>, %arg7: memref<1x1x64xf32, #tpu.memory_space<vmem>>, %arg8: memref<1x1x64xf32, #tpu.memory_space<vmem>>, %arg9: memref<64x128xbf16, #tpu.memory_space<vmem>>, %arg10: memref<1x128xf32, #tpu.memory_space<vmem>>, %arg11: memref<1x32x128xf32, #tpu.memory_space<vmem>>) attributes {dimension_semantics = [#tpu.dimension_semantics<parallel>, #tpu.dimension_semantics<parallel>], iteration_bounds = array<i64: 1, 1>, scalar_prefetch = 0 : i64, scratch_operands = 0 : i64, tpu.core_type = #tpu.core_type<tc>, window_params = [{transform_indices = @transform_0, window_bounds = array<i64: 1, 32, 64>}, {pipeline_mode = #tpu.pipeline_mode<synchronous>, transform_indices = @transform_1, window_bounds = array<i64: 1, 64>}, {pipeline_mode = #tpu.pipeline_mode<synchronous>, transform_indices = @transform_2, window_bounds = array<i64: 1, 64>}, {pipeline_mode = #tpu.pipeline_mode<synchronous>, transform_indices = @transform_3, window_bounds = array<i64: 1, 64>}, {pipeline_mode = #tpu.pipeline_mode<synchronous>, transform_indices = @transform_4, window_bounds = array<i64: 1, 64>}, {transform_indices = @transform_5, window_bounds = array<i64: 1, 1, 64>}, {transform_indices = @transform_6, window_bounds = array<i64: 1, 1, 64>}, {pipeline_mode = #tpu.pipeline_mode<synchronous>, transform_indices = @transform_7, window_bounds = array<i64: 64, 128>}, {pipeline_mode = #tpu.pipeline_mode<synchronous>, transform_indices = @transform_8, window_bounds = array<i64: 1, 128>}, {transform_indices = @transform_9, window_bounds = array<i64: 1, 32, 128>}]} {
    %c0 = arith.constant 0 : index
    %c0_0 = arith.constant 0 : index
    %c0_1 = arith.constant 0 : index
    %0 = vector.load %arg2[%c0, %c0_0, %c0_1] : memref<1x32x64xbf16, #tpu.memory_space<vmem>>, vector<1x32x64xbf16>
    %1 = vector.shape_cast %0 : vector<1x32x64xbf16> to vector<32x64xbf16>
    %2 = arith.extf %1 : vector<32x64xbf16> to vector<32x64xf32>
    %c0_2 = arith.constant 0 : index
    %c0_3 = arith.constant 0 : index
    %3 = vector.load %arg3[%c0_2, %c0_3] : memref<1x64xf32, #tpu.memory_space<vmem>>, vector<1x64xf32>
    %c0_4 = arith.constant 0 : index
    %c0_5 = arith.constant 0 : index
    %4 = vector.load %arg4[%c0_4, %c0_5] : memref<1x64xf32, #tpu.memory_space<vmem>>, vector<1x64xf32>
    %cst = arith.constant dense<0.000000e+00> : vector<32xf32>
    %5 = vector.multi_reduction <add>, %2, %cst [1] : vector<32x64xf32> to vector<32xf32>
    %6 = vector.shape_cast %5 : vector<32xf32> to vector<32x1xf32>
    %cst_6 = arith.constant 6.400000e+01 : f32
    %7 = vector.broadcast %cst_6 : f32 to vector<32x1xf32>
    %8 = arith.divf %6, %7 : vector<32x1xf32>
    %9 = vector.broadcast %8 : vector<32x1xf32> to vector<32x64xf32>
    %10 = arith.subf %2, %9 : vector<32x64xf32>
    %11 = arith.mulf %10, %10 : vector<32x64xf32>
    %cst_7 = arith.constant dense<0.000000e+00> : vector<32xf32>
    %12 = vector.multi_reduction <add>, %11, %cst_7 [1] : vector<32x64xf32> to vector<32xf32>
    %13 = vector.shape_cast %12 : vector<32xf32> to vector<32x1xf32>
    %cst_8 = arith.constant 6.400000e+01 : f32
    %14 = vector.broadcast %cst_8 : f32 to vector<32x1xf32>
    %15 = arith.divf %13, %14 : vector<32x1xf32>
    %16 = vector.broadcast %8 : vector<32x1xf32> to vector<32x64xf32>
    %17 = arith.subf %2, %16 : vector<32x64xf32>
    %cst_9 = arith.constant 9.99999974E-6 : f32
    %18 = vector.broadcast %cst_9 : f32 to vector<32x1xf32>
    %19 = arith.addf %15, %18 : vector<32x1xf32>
    %20 = math.rsqrt %19 : vector<32x1xf32>
    %21 = vector.broadcast %20 : vector<32x1xf32> to vector<32x64xf32>
    %22 = arith.mulf %17, %21 : vector<32x64xf32>
    %23 = vector.broadcast %3 : vector<1x64xf32> to vector<32x64xf32>
    %24 = arith.mulf %22, %23 : vector<32x64xf32>
    %25 = vector.broadcast %4 : vector<1x64xf32> to vector<32x64xf32>
    %26 = arith.addf %24, %25 : vector<32x64xf32>
    %c0_10 = arith.constant 0 : index
    %c0_11 = arith.constant 0 : index
    %27 = vector.load %arg5[%c0_10, %c0_11] : memref<1x64xf32, #tpu.memory_space<vmem>>, vector<1x64xf32>
    %c0_12 = arith.constant 0 : index
    %c0_13 = arith.constant 0 : index
    %28 = vector.load %arg6[%c0_12, %c0_13] : memref<1x64xf32, #tpu.memory_space<vmem>>, vector<1x64xf32>
    %cst_14 = arith.constant dense<0.000000e+00> : vector<32xf32>
    %29 = vector.multi_reduction <add>, %26, %cst_14 [1] : vector<32x64xf32> to vector<32xf32>
    %30 = vector.shape_cast %29 : vector<32xf32> to vector<32x1xf32>
    %cst_15 = arith.constant 6.400000e+01 : f32
    %31 = vector.broadcast %cst_15 : f32 to vector<32x1xf32>
    %32 = arith.divf %30, %31 : vector<32x1xf32>
    %33 = vector.broadcast %32 : vector<32x1xf32> to vector<32x64xf32>
    %34 = arith.subf %26, %33 : vector<32x64xf32>
    %35 = arith.mulf %34, %34 : vector<32x64xf32>
    %cst_16 = arith.constant dense<0.000000e+00> : vector<32xf32>
    %36 = vector.multi_reduction <add>, %35, %cst_16 [1] : vector<32x64xf32> to vector<32xf32>
    %37 = vector.shape_cast %36 : vector<32xf32> to vector<32x1xf32>
    %cst_17 = arith.constant 6.400000e+01 : f32
    %38 = vector.broadcast %cst_17 : f32 to vector<32x1xf32>
    %39 = arith.divf %37, %38 : vector<32x1xf32>
    %40 = vector.broadcast %32 : vector<32x1xf32> to vector<32x64xf32>
    %41 = arith.subf %26, %40 : vector<32x64xf32>
    %cst_18 = arith.constant 9.99999974E-6 : f32
    %42 = vector.broadcast %cst_18 : f32 to vector<32x1xf32>
    %43 = arith.addf %39, %42 : vector<32x1xf32>
    %44 = math.rsqrt %43 : vector<32x1xf32>
    %45 = vector.broadcast %44 : vector<32x1xf32> to vector<32x64xf32>
    %46 = arith.mulf %41, %45 : vector<32x64xf32>
    %47 = vector.broadcast %27 : vector<1x64xf32> to vector<32x64xf32>
    %48 = arith.mulf %46, %47 : vector<32x64xf32>
    %49 = vector.broadcast %28 : vector<1x64xf32> to vector<32x64xf32>
    %50 = arith.addf %48, %49 : vector<32x64xf32>
    %c0_19 = arith.constant 0 : index
    %c0_20 = arith.constant 0 : index
    %c0_21 = arith.constant 0 : index
    %51 = vector.load %arg8[%c0_19, %c0_20, %c0_21] : memref<1x1x64xf32, #tpu.memory_space<vmem>>, vector<1x1x64xf32>
    %52 = vector.shape_cast %51 : vector<1x1x64xf32> to vector<1x64xf32>
    %cst_22 = arith.constant 1.000000e+00 : f32
    %53 = vector.broadcast %cst_22 : f32 to vector<1x64xf32>
    %54 = arith.addf %53, %52 : vector<1x64xf32>
    %55 = vector.broadcast %54 : vector<1x64xf32> to vector<32x64xf32>
    %56 = arith.mulf %50, %55 : vector<32x64xf32>
    %c0_23 = arith.constant 0 : index
    %c0_24 = arith.constant 0 : index
    %c0_25 = arith.constant 0 : index
    %57 = vector.load %arg7[%c0_23, %c0_24, %c0_25] : memref<1x1x64xf32, #tpu.memory_space<vmem>>, vector<1x1x64xf32>
    %58 = vector.shape_cast %57 : vector<1x1x64xf32> to vector<1x64xf32>
    %59 = vector.broadcast %58 : vector<1x64xf32> to vector<32x64xf32>
    %60 = arith.addf %56, %59 : vector<32x64xf32>
    %61 = arith.truncf %60 : vector<32x64xf32> to vector<32x64xbf16>
    %c0_26 = arith.constant 0 : index
    %c0_27 = arith.constant 0 : index
    %62 = vector.load %arg9[%c0_26, %c0_27] : memref<64x128xbf16, #tpu.memory_space<vmem>>, vector<64x128xbf16>
    %cst_28 = arith.constant dense<0.000000e+00> : vector<32x128xf32>
    %63 = tpu.matmul %61, %62, %cst_28 {dimension_numbers = #tpu.dot_dimension_numbers<[1], [0], [0], [1], [0, 0, 1, 1], [], []>} : vector<32x64xbf16>, vector<64x128xbf16>, vector<32x128xf32> -> vector<32x128xf32>
    %c0_29 = arith.constant 0 : index
    %c0_30 = arith.constant 0 : index
    %64 = vector.load %arg10[%c0_29, %c0_30] : memref<1x128xf32, #tpu.memory_space<vmem>>, vector<1x128xf32>
    %65 = vector.broadcast %64 : vector<1x128xf32> to vector<32x128xf32>
    %66 = arith.addf %63, %65 : vector<32x128xf32>
    %c0_31 = arith.constant 0 : index
    %c0_32 = arith.constant 0 : index
    %c0_33 = arith.constant 0 : index
    %67 = vector.load %arg11[%c0_31, %c0_32, %c0_33] : memref<1x32x128xf32, #tpu.memory_space<vmem>>, vector<1x32x128xf32>
    %68 = vector.shape_cast %67 : vector<1x32x128xf32> to vector<32x128xf32>
    %69 = vector.shape_cast %66 : vector<32x128xf32> to vector<1x32x128xf32>
    tpu.vector_store %arg11[%c0_31, %c0_32, %c0_33], %69 {strides = array<i32>} : memref<1x32x128xf32, #tpu.memory_space<vmem>>, vector<1x32x128xf32>,
    return
  }
  func.func @transform_0(%arg0: i32, %arg1: i32) -> (i32, i32, i32) {
    %c0_i32 = arith.constant 0 : i32
    %c0_i32_0 = arith.constant 0 : i32
    return %arg0, %arg1, %c0_i32 : i32, i32, i32
  }
  func.func @transform_1(%arg0: i32, %arg1: i32) -> (i32, i32) {
    %c0_i32 = arith.constant 0 : i32
    %c0_i32_0 = arith.constant 0 : i32
    %c0_i32_1 = arith.constant 0 : i32
    return %c0_i32, %c0_i32_0 : i32, i32
  }
  func.func @transform_2(%arg0: i32, %arg1: i32) -> (i32, i32) {
    %c0_i32 = arith.constant 0 : i32
    %c0_i32_0 = arith.constant 0 : i32
    %c0_i32_1 = arith.constant 0 : i32
    return %c0_i32, %c0_i32_0 : i32, i32
  }
  func.func @transform_3(%arg0: i32, %arg1: i32) -> (i32, i32) {
    %c0_i32 = arith.constant 0 : i32
    %c0_i32_0 = arith.constant 0 : i32
    %c0_i32_1 = arith.constant 0 : i32
    return %c0_i32, %c0_i32_0 : i32, i32
  }
  func.func @transform_4(%arg0: i32, %arg1: i32) -> (i32, i32) {
    %c0_i32 = arith.constant 0 : i32
    %c0_i32_0 = arith.constant 0 : i32
    %c0_i32_1 = arith.constant 0 : i32
    return %c0_i32, %c0_i32_0 : i32, i32
  }
  func.func @transform_5(%arg0: i32, %arg1: i32) -> (i32, i32, i32) {
    %c0_i32 = arith.constant 0 : i32
    %c0_i32_0 = arith.constant 0 : i32
    %c0_i32_1 = arith.constant 0 : i32
    return %arg0, %c0_i32, %c0_i32_0 : i32, i32, i32
  }
  func.func @transform_6(%arg0: i32, %arg1: i32) -> (i32, i32, i32) {
    %c0_i32 = arith.constant 0 : i32
    %c0_i32_0 = arith.constant 0 : i32
    %c0_i32_1 = arith.constant 0 : i32
    return %arg0, %c0_i32, %c0_i32_0 : i32, i32, i32
  }
  func.func @transform_7(%arg0: i32, %arg1: i32) -> (i32, i32) {
    %c0_i32 = arith.constant 0 : i32
    %c0_i32_0 = arith.constant 0 : i32
    %c0_i32_1 = arith.constant 0 : i32
    return %c0_i32, %c0_i32_0 : i32, i32
  }
  func.func @transform_8(%arg0: i32, %arg1: i32) -> (i32, i32) {
    %c0_i32 = arith.constant 0 : i32
    %c0_i32_0 = arith.constant 0 : i32
    %c0_i32_1 = arith.constant 0 : i32
    return %c0_i32, %c0_i32_0 : i32, i32
  }
  func.func @transform_9(%arg0: i32, %arg1: i32) -> (i32, i32, i32) {
    %c0_i32 = arith.constant 0 : i32
    %c0_i32_0 = arith.constant 0 : i32
    return %arg0, %arg1, %c0_i32 : i32, i32, i32
  }
}

</mosaic_0001>

<bundles_post_ra>
// kernel: mul.53
= control target key start
LH: loop header
LB: loop body
LE: loop exit
PB: predicated region body
PF: predicated region fallthrough
CT: control target
= control target key end

     0   :  { %vm12_vm0 = vcmask 31744   ;;  %s73_s10 = smov 20   ;;  %s74_s11 = smov 24   ;;  %vm18_vm1 = vcmask 261344   ;;  %vm24_vm2 = vcmask 228544   ;;  %vm30_vm3 = vcmask 195744   ;;  %s98_s0 = inlined_call_operand.vmem [shape: f32[2,4,4], index: 0, kind: input, shape index: {}]   ;;  %s99_s1 = inlined_call_operand.vmem [shape: f32[32], index: 1, kind: output, shape index: {}]  }
   0x1   :  { %v64_v0 = vld [vmem:[%s98_s0 + $0x4] sm:$0xf]  ;;  %v9_v1 = vld [vmem:[%s98_s0] sm:$0xf]  ;;  %s72_s0 = smov 28   ;;  %s75_s12 = smov 16  }
   0x2   :  { %8 = vst [vmem:[#allocation1 + $0x8] sm:$0xf] %v64_v0  ;;  %10 = vst [vmem:[#allocation1] sm:$0xf] %v9_v1  ;;  %s76_s13 = smov 12   ;;  %s77_s14 = smov 8  }
   0x3   :  { %s78_s15 = smov 4   ;;  %vm36_vm4 = vcmask 162944   ;;  %vm42_vm5 = vcmask 130144   ;;  %vm48_vm6 = vcmask 97344   ;;  %vm54_vm7 = vcmask 64544  }
   0x9   :  { %v15_v2 = vld [vmem:[#allocation1 + $0xb] sm:$0x1]   ;;  %v27_v3 = vld [vmem:[#allocation1 + $0x9] sm:$0x1]   ;;  %v21_v4 = vld [vmem:[#allocation1 + $0xa] sm:$0x1]  }
   0xa   :  { %16 = vrot.lane.b32.xlu0 %v15_v2, %s72_s0  ;;  %28 = vrot.lane.b32.xlu1 %v27_v3, %s73_s10  ;;  %v33_v5 = vld [vmem:[#allocation1 + $0x8] sm:$0x1]   ;;  %v11_v6 = vld [vmem:[#allocation1] sm:$0x1]   ;;  %v39_v7 = vld [vmem:[#allocation1 + $0x3] sm:$0x1]  }
   0xb   :  { %13 = vst.msk [vmem:[#allocation0] sm:$0x1] %vm12_vm0, %v11_v6   ;;  %v45_v8 = vld [vmem:[#allocation1 + $0x2] sm:$0x1]   ;;  %v51_v9 = vld [vmem:[#allocation1 + $0x1] sm:$0x1]  }
   0xe   :  { %22 = vrot.lane.b32.xlu0 %v21_v4, %s74_s11  ;;  %34 = vrot.lane.b32.xlu1 %v33_v5, %s75_s12 }
  0x12   :  { %40 = vrot.lane.b32.xlu0 %v39_v7, %s76_s13  ;;  %46 = vrot.lane.b32.xlu1 %v45_v8, %s77_s14 }
  0x16   :  { %52 = vrot.lane.b32.xlu0 %v51_v9, %s78_s15 }
  0x7c   :  { %v17_v10 = vpop.permute.xlu0 %16   ;;  %v29_v11 = vpop.permute.xlu1 %28  }
  0x7d   :  { %19 = vst.msk [vmem:[#allocation0] sm:$0x1] %vm18_vm1, %v17_v10  }
  0x80   :  { %v23_v12 = vpop.permute.xlu0 %22   ;;  %v35_v13 = vpop.permute.xlu1 %34  }
  0x81   :  { %25 = vst.msk [vmem:[#allocation0] sm:$0x1] %vm24_vm2, %v23_v12  }
  0x82   :  { %31 = vst.msk [vmem:[#allocation0] sm:$0x1] %vm30_vm3, %v29_v11  }
  0x83   :  { %37 = vst.msk [vmem:[#allocation0] sm:$0x1] %vm36_vm4, %v35_v13  }
  0x84   :  { %v41_v14 = vpop.permute.xlu0 %40   ;;  %v47_v15 = vpop.permute.xlu1 %46  }
  0x85   :  { %43 = vst.msk [vmem:[#allocation0] sm:$0x1] %vm42_vm5, %v41_v14  }
  0x86   :  { %49 = vst.msk [vmem:[#allocation0] sm:$0x1] %vm48_vm6, %v47_v15  }
  0x88   :  { %v53_v16 = vpop.permute.xlu0 %52  }
  0x89   :  { %55 = vst.msk [vmem:[#allocation0] sm:$0x1] %vm54_vm7, %v53_v16  }
  0x90   :  { %v60_v17 = vld [vmem:[#allocation0] sm:$0x1] }
  0x91   :  { %63 = vst [vmem:[%s99_s1] sm:$0x1] %v60_v17 }

// kernel: diffusion_transformer_forward.9
= control target key start
LH: loop header
LB: loop body
LE: loop exit
PB: predicated region body
PF: predicated region fallthrough
CT: control target
= control target key end

     0   :  { %vm36_vm0 = vcmask 130048   ;;  %vm108_vm1 = vcmask 519168   ;;  %s189_s1 = inlined_call_operand.vmem [shape: bf16[16,64], index: 1, kind: input, shape index: {}]   ;;  %s190_s0 = inlined_call_operand.vmem [shape: f32[32,16], index: 0, kind: input, shape index: {}]   ;;  %s191_s2 = inlined_call_operand.vmem [shape: f32[1,64], index: 2, kind: input, shape index: {}]   ;;  %s192_s3 = inlined_call_operand.vmem [shape: bf16[32,64], index: 3, kind: output, shape index: {}]  }
   0x1   :  { %v138_v0 = vld [vmem:[%s189_s1] sm:$0xff]   ;;  %v16_v2 = vld [vmem:[%s190_s0 + $0x8] sm:$0xff]  ;;  %v17_v3 = vld [vmem:[%s190_s0 + $0x10] sm:$0xff] }
   0x2   :  { %v15_v1 = vld [vmem:[%s190_s0] sm:$0xff]  ;;  %132 = vmatprep.subr.bf16.mxu0 %v138_v0  ;;  %v18_v5 = vld [vmem:[%s190_s0 + $0x18] sm:$0xff] }
   0x3   :  { %v19_v4 = vpack.c.bf16 %v16_v2, %v15_v1  ;;  %133 = vmatpush3.bf16.msra.mxu0 %v138_v0  ;;  %v20_v6 = vpack.c.bf16 %v18_v5, %v17_v3  ;;  %v117_v7 = vld [vmem:[%s191_s2] ss:$0 sm:$0xff] }
   0x5   :  { %134 = vmatprep.mubr.msk.bf16.mxu0 %vm36_vm0, %v19_v4 }
   0x6   :  { %135 = vmatmul.mubr.msk.bf16.vlgmr.msra.gmra.mxu0 %vm36_vm0, %v20_v6 }
  0xc6   :  { %v136_v8 = vpop.f32.mrf.mxu0 }
  0xc7   :  { %v86_v9 = vadd.f32 %v136_v8, %v117_v7 }
  0xc8   :  { %v77_v10 = vpop.f32.mrf.mxu0 }
  0xc9   :  { %v127_v11 = vpack.c.bf16 %v86_v9, %v86_v9  ;;  %v78_v12 = vadd.f32 %v117_v7, %v77_v10 }
  0xca   :  { %v137_v13 = vpop.f32.mrf.mxu0 }
  0xcb   :  { %111 = vst.msk [vmem:[%s192_s3 + $0x8] sm:$0xf] %vm108_vm1, %v127_v11  ;;  %v125_v14 = vpack.c.bf16 %v78_v12, %v78_v12  ;;  %v89_v15 = vadd.f32 %v137_v13, %v117_v7 }
  0xcc   :  { %v80_v16 = vpop.f32.mrf.mxu0 }
  0xcd   :  { %109 = vst.msk [vmem:[%s192_s3] sm:$0xf] %vm108_vm1, %v125_v14  ;;  %v128_v17 = vpack.c.bf16 %v89_v15, %v89_v15  ;;  %v81_v18 = vadd.f32 %v117_v7, %v80_v16 }
  0xcf   :  { %112 = vst.msk [vmem:[%s192_s3 + $0xc] sm:$0xf] %vm108_vm1, %v128_v17  ;;  %v126_v19 = vpack.c.bf16 %v81_v18, %v81_v18 }
  0xd1   :  { %110 = vst.msk [vmem:[%s192_s3 + $0x4] sm:$0xf] %vm108_vm1, %v126_v19 }

// kernel: diffusion_transformer_forward.10
= control target key start
LH: loop header
LB: loop body
LE: loop exit
PB: predicated region body
PF: predicated region fallthrough
CT: control target
= control target key end

     0   :  { %v110_v0 = vmov 0.0   ;;  %vm111_vm0 = vmmov 0   ;;  %vm40_vm1 = vcmask 261120   ;;  %vm85_vm2 = vcmask 519168   ;;  %s147_s1 = inlined_call_operand.vmem [shape: bf16[32,64], index: 1, kind: input, shape index: {}]   ;;  %s148_s0 = inlined_call_operand.vmem [shape: f32[8,32], index: 0, kind: input, shape index: {}]   ;;  %s149_s2 = inlined_call_operand.vmem [shape: f32[1,64], index: 2, kind: input, shape index: {}]   ;;  %s150_s3 = inlined_call_operand.vmem [shape: bf16[8,64], index: 3, kind: output, shape index: {}]  }
   0x1   :  { %98 = vmatprep.subr.bf16.mxu0 %v110_v0  ;;  %v108_v1 = vld [vmem:[%s147_s1 + $0x8] sm:$0xff]   ;;  %102 = vmatprep.mubr.msk.bf16.mxu0 %vm111_vm0, %v110_v0  ;;  %v109_v2 = vld [vmem:[%s147_s1] sm:$0xff]  }
   0x2   :  { %99 = vmatpush3.bf16.msra.mxu0 %v108_v1  ;;  %v15_v3 = vld [vmem:[%s148_s0] sm:$0xff] }
   0x3   :  { %100 = vmatprep.subr.bf16.mxu0 %v110_v0  ;;  %v16_v4 = vpack.c.bf16 %v15_v3, %v15_v3  ;;  %v91_v5 = vld [vmem:[%s149_s2] ss:$0 sm:$0xff] }
   0x6   :  { %101 = vmatpush3.bf16.msra.mxu0 %v109_v2 }
   0x9   :  { %103 = vmatmul.mubr.msk.bf16.vlgmr.msra.gmra.mxu0 %vm40_vm1, %v16_v4 }
  0xc9   :  { %v78_v6 = vpop.f32.mrf.mxu0 }
  0xca   :  { %v79_v7 = vadd.f32 %v91_v5, %v78_v6 }
  0xcb   :  { %v104_v8 = vpop.f32.mrf.mxu0 }
  0xcc   :  { %v84_v9 = vpack.c.bf16 %v79_v7, %v79_v7 }
  0xcd   :  { %v81_v10 = vpop.f32.mrf.mxu0 }
  0xce   :  { %86 = vst.msk [vmem:[%s150_s3] sm:$0xf] %vm85_vm2, %v84_v9 }
  0xcf   :  { %v105_v11 = vpop.f32.mrf.mxu0 }

// kernel: diffusion_transformer_forward.12
= control target key start
LH: loop header
LB: loop body
LE: loop exit
PB: predicated region body
PF: predicated region fallthrough
CT: control target
= control target key end

     0   :  { %vm40_vm0 = vcmask 261120   ;;  %v1116_v0 = vmov 0.0   ;;  %vm1117_vm1 = vmmov 0   ;;  %vm19_vm2 = vcmask 7168   ;;  %s1121_s24 = smov 64   ;;  %s1122_s25 = smov 32   ;;  %s1573_s1 = inlined_call_operand.vmem [shape: bf16[1,40,128], index: 1, kind: input, shape index: {}]   ;;  %s1574_s0 = inlined_call_operand.vmem [shape: bf16[1,40,64], index: 0, kind: input, shape index: {}]   ;;  %s1575_s2 = inlined_call_operand.vmem [shape: f32[1,40], index: 2, kind: input, shape index: {}]   ;;  %s1576_s3 = inlined_call_operand.vmem [shape: bf16[1,40,64], index: 3, kind: output, shape index: {}]  }
   0x1   :  { %959 = vmatprep.subr.bf16.mxu0 %v1116_v0  ;;  %v1147_v1 = vld [vmem:[%s1573_s1 + $0x10] ss:$0 sps:$4 sm:$0xff]   ;;  %41 = vst.msk [vmem:[#allocation4] sm:$0xff] %vm40_vm0, %v1116_v0  ;;  %42 = vst.msk [vmem:[#allocation4 + $0x8] sm:$0xff] %vm40_vm0, %v1116_v0  ;;  %965 = vmatprep.mubr.msk.bf16.mxu0 %vm1117_vm1, %v1116_v0  ;;  %v1180_v3 = vld [vmem:[%s1573_s1 + $0x8] sm:$0xff]   ;;  %vm179_vm3 = vcmask 326656  }
   0x2   :  { %43 = vst.msk [vmem:[#allocation4 + $0x10] sm:$0xff] %vm40_vm0, %v1116_v0  ;;  %44 = vst.msk [vmem:[#allocation4 + $0x18] sm:$0xff] %vm40_vm0, %v1116_v0  ;;  %977 = vmatprep.subr.bf16.mxu1 %v1116_v0  ;;  %983 = vmatprep.mubr.msk.bf16.mxu1 %vm1117_vm1, %v1116_v0  ;;  %v116_v2 = vsel %vm40_vm0, %v1147_v1, 0  ;;  %v113_v4 = vsel %vm40_vm0, %v1180_v3, 0  ;;  %v1188_v5 = vld [vmem:[%s1573_s1] sm:$0xff]   ;;  %v1205_v8 = vld [vmem:[%s1574_s0 + $0x8] sm:$0xff]  }
   0x3   :  { %45 = vst.msk [vmem:[#allocation4 + $0x20] sm:$0xff] %vm40_vm0, %v1116_v0  ;;  %46 = vst.msk [vmem:[#allocation4 + $0x28] sm:$0xff] %vm40_vm0, %v1116_v0  ;;  %960 = vmatpush3.bf16.xpose.msra.mxu0 %v116_v2  ;;  %v110_v6 = vsel %vm40_vm0, %v1188_v5, 0  ;;  %v1196_v7 = vld [vmem:[%s1574_s0] sm:$0xff]   ;;  %v1214_v9 = vld [vmem:[%s1574_s0 + $0x10] ss:$0 sps:$4 sm:$0xff]  }
   0x4   :  { %47 = vst.msk [vmem:[#allocation4 + $0x30] sm:$0xff] %vm40_vm0, %v1116_v0  ;;  %48 = vst.msk [vmem:[#allocation4 + $0x38] sm:$0xff] %vm40_vm0, %v1116_v0  ;;  %961 = vmatprep.subr.bf16.mxu0 %v1116_v0  ;;  %v1118_v10 = vmov -1e+30   ;;  %v1253_v11 = vld [vmem:[%s1575_s2] ss:$0 sm:$0xff] }
   0x5   :  { %49 = vst.msk [vmem:[#allocation4 + $0x40] sm:$0xff] %vm40_vm0, %v1116_v0  ;;  %50 = vst.msk [vmem:[#allocation4 + $0x48] sm:$0xff] %vm40_vm0, %v1116_v0  ;;  %v1119_v28 = vmov 0   ;;  %s1120_s2 = smov 96   ;;  %vm316_vm4 = vcmask 1043456   ;;  %vm896_vm5 = vcmask 519168  }
   0x6   :  { %20 = vst.msk [vmem:[#allocation2] sm:$0xff] %vm19_vm2, %v1118_v10  ;;  %21 = vst.msk [vmem:[#allocation2 + $0x8] sm:$0xff] %vm19_vm2, %v1118_v10  ;;  %1038 = vset.pattern.permute.xlu1 %v1119_v28  ;;  %1039 = vset.pattern.permute.xlu0 %v1119_v28 }
   0x7   :  { %22 = vst.msk [vmem:[#allocation2 + $0x10] sm:$0xff] %vm19_vm2, %v1118_v10  ;;  %23 = vst.msk [vmem:[#allocation2 + $0x18] sm:$0xff] %vm19_vm2, %v1118_v10 }
   0x8   :  { %24 = vst.msk [vmem:[#allocation2 + $0x20] sm:$0xff] %vm19_vm2, %v1118_v10  ;;  %25 = vst.msk [vmem:[#allocation2 + $0x28] sm:$0xff] %vm19_vm2, %v1118_v10 }
   0x9   :  { %26 = vst.msk [vmem:[#allocation2 + $0x30] sm:$0xff] %vm19_vm2, %v1118_v10  ;;  %27 = vst.msk [vmem:[#allocation2 + $0x38] sm:$0xff] %vm19_vm2, %v1118_v10 }
   0xa   :  { %28 = vst.msk [vmem:[#allocation2 + $0x40] sm:$0xff] %vm19_vm2, %v1118_v10  ;;  %29 = vst.msk [vmem:[#allocation2 + $0x48] sm:$0xff] %vm19_vm2, %v1118_v10 }
   0xb   :  { %962 = vmatpush3.bf16.xpose.msra.mxu0 %v113_v4  ;;  %30 = vst.msk [vmem:[#allocation3] sm:$0xff] %vm19_vm2, %v1116_v0  ;;  %31 = vst.msk [vmem:[#allocation3 + $0x8] sm:$0xff] %vm19_vm2, %v1116_v0 }
   0xc   :  { %963 = vmatprep.subr.bf16.mxu0 %v1116_v0  ;;  %32 = vst.msk [vmem:[#allocation3 + $0x10] sm:$0xff] %vm19_vm2, %v1116_v0  ;;  %33 = vst.msk [vmem:[#allocation3 + $0x18] sm:$0xff] %vm19_vm2, %v1116_v0 }
   0xd   :  { %34 = vst.msk [vmem:[#allocation3 + $0x20] sm:$0xff] %vm19_vm2, %v1116_v0  ;;  %35 = vst.msk [vmem:[#allocation3 + $0x28] sm:$0xff] %vm19_vm2, %v1116_v0  ;;  %v1280_v35 = vld [vmem:[#allocation2] sm:$0xff]  ;;  %v1285_v38 = vld [vmem:[#allocation2 + $0x8] sm:$0xff] }
   0xe   :  { %36 = vst.msk [vmem:[#allocation3 + $0x30] sm:$0xff] %vm19_vm2, %v1116_v0  ;;  %37 = vst.msk [vmem:[#allocation3 + $0x38] sm:$0xff] %vm19_vm2, %v1116_v0  ;;  %v1295_v42 = vld [vmem:[#allocation2 + $0x10] sm:$0xff]  ;;  %v1305_v46 = vld [vmem:[#allocation2 + $0x18] sm:$0xff] }
   0xf   :  { %38 = vst.msk [vmem:[#allocation3 + $0x40] sm:$0xff] %vm19_vm2, %v1116_v0  ;;  %39 = vst.msk [vmem:[#allocation3 + $0x48] sm:$0xff] %vm19_vm2, %v1116_v0  ;;  %v1316_v50 = vld [vmem:[#allocation2 + $0x20] sm:$0xff] }
  0x13   :  { %964 = vmatpush3.bf16.xpose.msra.mxu0 %v110_v6 }
  0x14   :  { %1013 = vmatprep.subr.bf16.mxu0 %v1116_v0 }
  0x1a   :  { %966 = vmatmul.mubr.msk.bf16.vlgmr.msra.gmra.mxu0 %vm40_vm0, %v1196_v7 }
  0x1b   :  { %969 = vmatprep.mubr.msk.bf16.mxu0 %vm1117_vm1, %v1116_v0 }
  0x22   :  { %970 = vmatmul.mubr.msk.bf16.gmra.mxu0 %vm40_vm0, %v1205_v8 }
  0x23   :  { %973 = vmatprep.mubr.msk.bf16.mxu0 %vm1117_vm1, %v1116_v0 }
  0x2a   :  { %974 = vmatmul.mubr.msk.bf16.gmra.mxu0 %vm40_vm0, %v1214_v9 }
  0x2b   :  { %1019 = vmatprep.mubr.msk.bf16.mxu0 %vm1117_vm1, %v1116_v0 }
  0xda   :  { %v152_v12 = vpop.f32.mrf.mxu0 }
  0xdb   :  { %v1256_v13 = vadd.f32 %v1253_v11, %v152_v12 }
  0xdc   :  { %v967_v14 = vpop.f32.mrf.mxu0 }
  0xdd   :  { %v180_v15 = vsel %vm179_vm3, %v1256_v13, -inf }
  0xde   :  { %181 = vmax.xlane.f32.xlu0 %v180_v15  ;;  %v155_v16 = vpop.f32.mrf.mxu0 }
  0xdf   :  { %v1261_v17 = vadd.f32 %v1253_v11, %v155_v16 }
  0xe0   :  { %v968_v18 = vpop.f32.mrf.mxu0 }
  0xe1   :  { %v183_v19 = vsel %vm179_vm3, %v1261_v17, -inf }
  0xe2   :  { %184 = vmax.xlane.f32.xlu0 %v183_v19  ;;  %v160_v20 = vpop.f32.mrf.mxu0 }
  0xe3   :  { %v1266_v21 = vadd.f32 %v1253_v11, %v160_v20 }
  0xe4   :  { %v971_v22 = vpop.f32.mrf.mxu0 }
  0xe5   :  { %v186_v23 = vsel %vm179_vm3, %v1266_v21, -inf }
  0xe6   :  { %187 = vmax.xlane.f32.xlu1 %v186_v23  ;;  %v163_v24 = vpop.f32.mrf.mxu0 }
  0xe7   :  { %v1271_v25 = vadd.f32 %v1253_v11, %v163_v24 }
  0xe8   :  { %v972_v26 = vpop.f32.mrf.mxu0 }
  0xe9   :  { %v189_v27 = vsel %vm179_vm3, %v1271_v25, -inf }
  0xea   :  { %190 = vmax.xlane.f32.xlu1 %v189_v27  ;;  %v168_v29 = vpop.f32.mrf.mxu0 }
  0xeb   :  { %v1276_v30 = vadd.f32 %v1253_v11, %v168_v29 }
  0xec   :  { %v975_v31 = vpop.f32.mrf.mxu0 }
  0xed   :  { %v192_v32 = vsel %vm179_vm3, %v1276_v30, -inf }
  0xee   :  { %v171_v33 = vpop.f32.mrf.mxu0  ;;  %193 = vmax.xlane.f32.xlu0 %v192_v32 }
  0xf0   :  { %v976_v34 = vpop.f32.mrf.mxu0 }
 0x167   :  { %v182_v36 = vpop.xlane.xlu0 %181 }
 0x168   :  { %v1283_v37 = vmax.f32 %v1280_v35, %v182_v36 }
 0x16a   :  { %v200_v39 = vsub.f32 %v1280_v35, %v1283_v37  ;;  %291 = vst.msk [vmem:[#allocation2] sm:$0xff] %vm19_vm2, %v1283_v37  ;;  %217 = vperm.xlu1 %1038, %v1283_v37  }
 0x16b   :  { %v185_v40 = vpop.xlane.xlu0 %184 }
 0x16c   :  { %v1293_v41 = vmax.f32 %v1285_v38, %v185_v40 }
 0x16e   :  { %v201_v43 = vsub.f32 %v1285_v38, %v1293_v41  ;;  %292 = vst.msk [vmem:[#allocation2 + $0x8] sm:$0xff] %vm19_vm2, %v1293_v41  ;;  %222 = vperm.xlu0 %1039, %v1293_v41   ;;  %v591_v41 = vld [vmem:[#allocation3 + $0x38] sm:$0xff] }
 0x16f   :  { %v188_v44 = vpop.xlane.xlu1 %187 }
 0x170   :  { %v1303_v45 = vmax.f32 %v1295_v42, %v188_v44 }
 0x172   :  { %v202_v47 = vsub.f32 %v1295_v42, %v1303_v45  ;;  %293 = vst.msk [vmem:[#allocation2 + $0x10] sm:$0xff] %vm19_vm2, %v1303_v45  ;;  %227 = vperm.xlu1 %1038, %v1303_v45   ;;  %427 = vrot.lane.b32.xlu0 %v1188_v5, %s1120_s2 }
 0x173   :  { %v191_v48 = vpop.xlane.xlu1 %190 }
 0x174   :  { %v1314_v49 = vmax.f32 %v1305_v46, %v191_v48 }
 0x176   :  { %v203_v51 = vsub.f32 %v1305_v46, %v1314_v49  ;;  %294 = vst.msk [vmem:[#allocation2 + $0x18] sm:$0xff] %vm19_vm2, %v1314_v49  ;;  %232 = vperm.xlu1 %1038, %v1314_v49   ;;  %423 = vrot.lane.b32.xlu0 %v1205_v8, %s1120_s2 }
 0x177   :  { %v194_v52 = vpop.xlane.xlu0 %193 }
 0x178   :  { %v1325_v53 = vmax.f32 %v1316_v50, %v194_v52  ;;  %v211_v35 = vmul.f32 1.442695, %v203_v51 }
 0x17a   :  { %303 = vrot.lane.b32.xlu1 %v1147_v1, %s1121_s24  ;;  %v204_v54 = vsub.f32 %v1316_v50, %v1325_v53  ;;  %295 = vst.msk [vmem:[#allocation2 + $0x20] sm:$0xff] %vm19_vm2, %v1325_v53 }
 0x17c   :  { %v213_v37 = vmul.f32 1.442695, %v204_v54  ;;  %v255_v54 = vld [vmem:[#allocation3] sm:$0xff] }
 0x17e   :  { %237 = vperm.xlu1 %1038, %v1325_v53  }
 0x182   :  { %301 = vrot.lane.b32.xlu1 %v1180_v3, %s1121_s24 }
 0x186   :  { %299 = vrot.lane.b32.xlu1 %v1188_v5, %s1121_s24 }
 0x18a   :  { %431 = vrot.lane.b32.xlu1 %v1147_v1, %s1120_s2 }
 0x18e   :  { %429 = vrot.lane.b32.xlu1 %v1180_v3, %s1120_s2 }
 0x192   :  { %421 = vrot.lane.b32.xlu1 %v1196_v7, %s1120_s2 }
 0x196   :  { %425 = vrot.lane.b32.xlu1 %v1214_v9, %s1120_s2 }
 0x1e5   :  { %v218_v55 = vpop.permute.xlu1 %217 }
 0x1e6   :  { %v240_v58 = vsub.f32 %v1256_v13, %v218_v55 }
 0x1e8   :  { %v245_v61 = vmul.f32 1.442695, %v240_v58 }
 0x1e9   :  { %v223_v56 = vpop.permute.xlu0 %222 }
 0x1ea   :  { %v241_v57 = vsub.f32 %v1261_v17, %v223_v56 }
 0x1ec   :  { %v247_v60 = vmul.f32 1.442695, %v241_v57 }
 0x1ed   :  { %v228_v59 = vpop.permute.xlu1 %227  ;;  %v428_v26 = vpop.permute.xlu0 %427 }
 0x1ee   :  { %1056 = vpow2.f32 %v247_v60  ;;  %v242_v2 = vsub.f32 %v1266_v21, %v228_v59  ;;  %v443_v28 = vsel %vm40_vm0, %v428_v26, 0 }
 0x1ef   :  { %1058 = vpow2.f32 %v245_v61 }
 0x1f0   :  { %v249_v8 = vmul.f32 1.442695, %v242_v2 }
 0x1f1   :  { %v233_v62 = vpop.permute.xlu1 %232 }
 0x1f2   :  { %v243_v63 = vsub.f32 %v1271_v25, %v233_v62 }
 0x1f4   :  { %v251_v7 = vmul.f32 1.442695, %v243_v63 }
 0x1f5   :  { %v304_v4 = vpop.permute.xlu1 %303 }
 0x1f6   :  { %v318_v6 = vsel %vm316_vm4, %v304_v4, 0  ;;  %1060 = vpow2.f32 %v251_v7 }
 0x1f7   :  { %978 = vmatpush3.bf16.msra.mxu1 %v318_v6  ;;  %1062 = vpow2.f32 %v249_v8 }
 0x1f8   :  { %979 = vmatprep.subr.bf16.mxu1 %v1116_v0 }
 0x1f9   :  { %v238_v9 = vpop.permute.xlu1 %237 }
 0x1fa   :  { %v244_v10 = vsub.f32 %v1276_v30, %v238_v9  ;;  %v424_v30 = vpop.permute.xlu0 %423 }
 0x1fb   :  { %v1347_v14 = vpop.eup %1056 }
 0x1fc   :  { %v253_v13 = vmul.f32 1.442695, %v244_v10  ;;  %v1349_v16 = vpop.eup %1058 }
 0x1fd   :  { %v302_v12 = vpop.permute.xlu1 %301  ;;  %v296_v17 = vpack.c.bf16 %v1347_v14, %v1349_v16 }
 0x1fe   :  { %980 = vmatpush3.bf16.msra.mxu1 %v302_v12  ;;  %1064 = vpow2.f32 %v253_v13 }
 0x1ff   :  { %981 = vmatprep.subr.bf16.mxu1 %v1116_v0 }
 0x201   :  { %v300_v15 = vpop.permute.xlu1 %299 }
 0x202   :  { %982 = vmatpush3.bf16.msra.mxu1 %v300_v15 }
 0x203   :  { %995 = vmatprep.subr.bf16.mxu1 %v1116_v0  ;;  %v1358_v20 = vpop.eup %1060 }
 0x204   :  { %v1361_v22 = vpop.eup %1062 }
 0x205   :  { %v432_v18 = vpop.permute.xlu1 %431  ;;  %984 = vmatmul.mubr.msk.bf16.vlgmr.msra.gmra.mxu1 %vm179_vm3, %v296_v17  ;;  %v297_v23 = vpack.c.bf16 %v1358_v20, %v1361_v22 }
 0x206   :  { %v449_v19 = vsel %vm40_vm0, %v432_v18, 0  ;;  %987 = vmatprep.mubr.msk.bf16.mxu1 %vm1117_vm1, %v1116_v0 }
 0x207   :  { %996 = vmatpush3.bf16.xpose.msra.mxu1 %v449_v19 }
 0x208   :  { %997 = vmatprep.subr.bf16.mxu1 %v1116_v0 }
 0x209   :  { %v430_v21 = vpop.permute.xlu1 %429 }
 0x20a   :  { %v446_v24 = vsel %vm40_vm0, %v430_v21, 0 }
 0x20b   :  { %v1369_v25 = vpop.eup %1064 }
 0x20c   :  { %v298_v27 = vpack.c.bf16 %v1369_v25, %v1369_v25 }
 0x20d   :  { %988 = vmatmul.mubr.msk.bf16.gmra.mxu1 %vm179_vm3, %v297_v23  ;;  %v422_v29 = vpop.permute.xlu1 %421 }
 0x20e   :  { %991 = vmatprep.mubr.msk.bf16.mxu1 %vm1117_vm1, %v1116_v0 }
 0x20f   :  { %998 = vmatpush3.bf16.xpose.msra.mxu1 %v446_v24 }
 0x210   :  { %999 = vmatprep.subr.bf16.mxu1 %v1116_v0 }
 0x211   :  { %v426_v31 = vpop.permute.xlu1 %425 }
 0x215   :  { %992 = vmatmul.mubr.msk.bf16.gmra.mxu1 %vm179_vm3, %v298_v27  ;;  %v1408_v27 = vld [vmem:[#allocation2 + $0x28] sm:$0xff] }
 0x216   :  { %1001 = vmatprep.mubr.msk.bf16.mxu1 %vm1117_vm1, %v1116_v0 }
 0x217   :  { %1000 = vmatpush3.bf16.xpose.msra.mxu1 %v443_v28 }
 0x21e   :  { %1002 = vmatmul.mubr.msk.bf16.vlgmr.msra.gmra.mxu1 %vm40_vm0, %v422_v29 }
 0x21f   :  { %1005 = vmatprep.mubr.msk.bf16.mxu1 %vm1117_vm1, %v1116_v0 }
 0x226   :  { %1006 = vmatmul.mubr.msk.bf16.gmra.mxu1 %vm40_vm0, %v424_v30  ;;  %v1413_v30 = vld [vmem:[#allocation2 + $0x30] sm:$0xff] }
 0x227   :  { %1009 = vmatprep.mubr.msk.bf16.mxu1 %vm1117_vm1, %v1116_v0 }
 0x22e   :  { %1010 = vmatmul.mubr.msk.bf16.gmra.mxu1 %vm40_vm0, %v426_v31 }
 0x2c5   :  { %v1385_v32 = vpop.f32.mrf.mxu1 }
 0x2c7   :  { %v985_v33 = vpop.f32.mrf.mxu1 }
 0x2c9   :  { %v1387_v34 = vpop.f32.mrf.mxu1 }
 0x2cb   :  { %v986_v36 = vpop.f32.mrf.mxu1 }
 0x2cc   :  { %v1423_v36 = vld [vmem:[#allocation2 + $0x38] sm:$0xff] }
 0x2cd   :  { %v1389_v40 = vpop.f32.mrf.mxu1 }
 0x2cf   :  { %v989_v44 = vpop.f32.mrf.mxu1 }
 0x2d1   :  { %v1391_v48 = vpop.f32.mrf.mxu1 }
 0x2d3   :  { %v990_v52 = vpop.f32.mrf.mxu1 }
 0x2d5   :  { %v1393_v55 = vpop.f32.mrf.mxu1 }
 0x2d7   :  { %v993_v56 = vpop.f32.mrf.mxu1 }
 0x2d9   :  { %v373_v57 = vpop.f32.mrf.mxu1 }
 0x2da   :  { %v1433_v57 = vld [vmem:[#allocation2 + $0x40] sm:$0xff] }
 0x2db   :  { %v994_v58 = vpop.f32.mrf.mxu1 }
 0x2de   :  { %v485_v59 = vpop.f32.mrf.mxu1 }
 0x2df   :  { %v486_v60 = vadd.f32 %v1253_v11, %v485_v59 }
 0x2e0   :  { %v1003_v61 = vpop.f32.mrf.mxu1 }
 0x2e1   :  { %v513_v62 = vsel %vm179_vm3, %v486_v60, -inf }
 0x2e2   :  { %514 = vmax.xlane.f32.xlu0 %v513_v62  ;;  %v488_v63 = vpop.f32.mrf.mxu1  ;;  %v1443_v62 = vld [vmem:[#allocation2 + $0x48] sm:$0xff] }
 0x2e3   :  { %v489_v2 = vadd.f32 %v1253_v11, %v488_v63 }
 0x2e4   :  { %v1004_v4 = vpop.f32.mrf.mxu1 }
 0x2e5   :  { %v516_v6 = vsel %vm179_vm3, %v489_v2, -inf }
 0x2e6   :  { %517 = vmax.xlane.f32.xlu1 %v516_v6  ;;  %v493_v7 = vpop.f32.mrf.mxu1 }
 0x2e7   :  { %v494_v8 = vadd.f32 %v1253_v11, %v493_v7 }
 0x2e8   :  { %v1007_v9 = vpop.f32.mrf.mxu1 }
 0x2e9   :  { %v519_v10 = vsel %vm179_vm3, %v494_v8, -inf }
 0x2ea   :  { %520 = vmax.xlane.f32.xlu0 %v519_v10  ;;  %v496_v12 = vpop.f32.mrf.mxu1 }
 0x2eb   :  { %v497_v13 = vadd.f32 %v1253_v11, %v496_v12 }
 0x2ec   :  { %v1008_v15 = vpop.f32.mrf.mxu1 }
 0x2ed   :  { %v522_v17 = vsel %vm179_vm3, %v497_v13, -inf }
 0x2ee   :  { %523 = vmax.xlane.f32.xlu0 %v522_v17  ;;  %v501_v18 = vpop.f32.mrf.mxu1 }
 0x2ef   :  { %v1404_v19 = vadd.f32 %v1253_v11, %v501_v18 }
 0x2f0   :  { %v1011_v21 = vpop.f32.mrf.mxu1 }
 0x2f1   :  { %v525_v23 = vsel %vm179_vm3, %v1404_v19, -inf }
 0x2f2   :  { %526 = vmax.xlane.f32.xlu1 %v525_v23  ;;  %v504_v24 = vpop.f32.mrf.mxu1 }
 0x2f4   :  { %v1012_v26 = vpop.f32.mrf.mxu1 }
 0x36b   :  { %v515_v28 = vpop.xlane.xlu0 %514 }
 0x36c   :  { %v1411_v29 = vmax.f32 %v1408_v27, %v515_v28 }
 0x36e   :  { %v533_v31 = vsub.f32 %v1408_v27, %v1411_v29  ;;  %624 = vst.msk [vmem:[#allocation2 + $0x28] sm:$0xff] %vm19_vm2, %v1411_v29  ;;  %550 = vperm.xlu0 %1039, %v1411_v29  }
 0x36f   :  { %v518_v11 = vpop.xlane.xlu1 %517 }
 0x370   :  { %v1421_v33 = vmax.f32 %v1413_v30, %v518_v11 }
 0x372   :  { %v534_v44 = vsub.f32 %v1413_v30, %v1421_v33  ;;  %625 = vst.msk [vmem:[#allocation2 + $0x30] sm:$0xff] %vm19_vm2, %v1421_v33  ;;  %555 = vperm.xlu1 %1038, %v1421_v33  }
 0x373   :  { %v521_v52 = vpop.xlane.xlu0 %520 }
 0x374   :  { %v1431_v56 = vmax.f32 %v1423_v36, %v521_v52 }
 0x376   :  { %v535_v58 = vsub.f32 %v1423_v36, %v1431_v56  ;;  %626 = vst.msk [vmem:[#allocation2 + $0x38] sm:$0xff] %vm19_vm2, %v1431_v56  ;;  %560 = vperm.xlu1 %1038, %v1431_v56   ;;  %v207_v56 = vmul.f32 1.442695, %v201_v43 }
 0x377   :  { %v524_v59 = vpop.xlane.xlu0 %523 }
 0x378   :  { %v1441_v61 = vmax.f32 %v1433_v57, %v524_v59 }
 0x37a   :  { %v536_v63 = vsub.f32 %v1433_v57, %v1441_v61  ;;  %627 = vst.msk [vmem:[#allocation2 + $0x40] sm:$0xff] %vm19_vm2, %v1441_v61  ;;  %565 = vperm.xlu0 %1039, %v1441_v61   ;;  %636 = vrot.lane.b32.xlu1 %v1147_v1, %s1122_s25  ;;  %v209_v57 = vmul.f32 1.442695, %v202_v47  ;;  %v592_v47 = vld [vmem:[#allocation3 + $0x40] sm:$0xff] }
 0x37b   :  { %v527_v4 = vpop.xlane.xlu1 %526 }
 0x37c   :  { %v1453_v6 = vmax.f32 %v1443_v62, %v527_v4 }
 0x37e   :  { %v537_v7 = vsub.f32 %v1443_v62, %v1453_v6  ;;  %628 = vst.msk [vmem:[#allocation2 + $0x48] sm:$0xff] %vm19_vm2, %v1453_v6  ;;  %570 = vperm.xlu0 %1039, %v1453_v6   ;;  %634 = vrot.lane.b32.xlu1 %v1180_v3, %s1122_s25  ;;  %v590_v62 = vld [vmem:[#allocation3 + $0x30] sm:$0xff]  ;;  %v593_v6 = vld [vmem:[#allocation3 + $0x48] sm:$0xff] }
 0x380   :  { %v546_v30 = vmul.f32 1.442695, %v537_v7 }
 0x382   :  { %632 = vrot.lane.b32.xlu0 %v1188_v5, %s1122_s25 }
 0x3e9   :  { %v551_v9 = vpop.permute.xlu0 %550 }
 0x3ea   :  { %v573_v1 = vsub.f32 %v486_v60, %v551_v9 }
 0x3ec   :  { %v578_v10 = vmul.f32 1.442695, %v573_v1 }
 0x3ed   :  { %v556_v12 = vpop.permute.xlu1 %555 }
 0x3ee   :  { %1066 = vpow2.f32 %v578_v10  ;;  %v574_v15 = vsub.f32 %v489_v2, %v556_v12 }
 0x3f0   :  { %v580_v17 = vmul.f32 1.442695, %v574_v15 }
 0x3f1   :  { %v561_v18 = vpop.permute.xlu1 %560 }
 0x3f2   :  { %1068 = vpow2.f32 %v580_v17  ;;  %v575_v21 = vsub.f32 %v494_v8, %v561_v18 }
 0x3f4   :  { %v582_v23 = vmul.f32 1.442695, %v575_v21  ;;  %v265_v21 = vsel %vm179_vm3, %v1349_v16, 0.0  ;;  %v277_v16 = vsel %vm179_vm3, %v1369_v25, 0.0 }
 0x3f5   :  { %v637_v24 = vpop.permute.xlu1 %636  ;;  %v566_v26 = vpop.permute.xlu0 %565 }
 0x3f6   :  { %1070 = vpow2.f32 %v582_v23  ;;  %v650_v28 = vsel %vm316_vm4, %v637_v24, 0  ;;  %v576_v3 = vsub.f32 %v497_v13, %v566_v26  ;;  %v271_v24 = vsel %vm179_vm3, %v1361_v22, 0.0 }
 0x3f7   :  { %1014 = vmatpush3.bf16.msra.mxu0 %v650_v28  ;;  %v268_v26 = vsel %vm179_vm3, %v1347_v14, 0.0  ;;  %v542_v14 = vmul.f32 1.442695, %v535_v58  ;;  %v538_v22 = vmul.f32 1.442695, %v533_v31 }
 0x3f8   :  { %v584_v11 = vmul.f32 1.442695, %v576_v3  ;;  %1015 = vmatprep.subr.bf16.mxu0 %v1116_v0  ;;  %v274_v3 = vsel %vm179_vm3, %v1358_v20, 0.0  ;;  %v544_v20 = vmul.f32 1.442695, %v536_v63 }
 0x3f9   :  { %v571_v5 = vpop.permute.xlu0 %570  ;;  %v635_v60 = vpop.permute.xlu1 %634  ;;  %v205_v31 = vmul.f32 1.442695, %v200_v39 }
 0x3fa   :  { %1072 = vpow2.f32 %v584_v11  ;;  %v577_v2 = vsub.f32 %v1404_v19, %v571_v5 }
 0x3fb   :  { %v1067_v52 = vpop.eup %1066  ;;  %1016 = vmatpush3.bf16.msra.mxu0 %v635_v60 }
 0x3fc   :  { %v586_v59 = vmul.f32 1.442695, %v577_v2  ;;  %v599_v8 = vsel %vm179_vm3, %v1067_v52, 0.0  ;;  %1017 = vmatprep.subr.bf16.mxu0 %v1116_v0 }
 0x3fd   :  { %600 = vadd.xlane.f32.xlu1 %v599_v8  ;;  %v633_v4 = vpop.permute.xlu0 %632 }
 0x3fe   :  { %1074 = vpow2.f32 %v586_v59 }
 0x3ff   :  { %v1069_v13 = vpop.eup %1068  ;;  %1018 = vmatpush3.bf16.msra.mxu0 %v633_v4  ;;  %v257_v4 = vld [vmem:[#allocation3 + $0x10] sm:$0xff] }
 0x400   :  { %v629_v9 = vpack.c.bf16 %v1069_v13, %v1067_v52  ;;  %v602_v1 = vsel %vm179_vm3, %v1069_v13, 0.0  ;;  %v256_v13 = vld [vmem:[#allocation3 + $0x8] sm:$0xff] }
 0x401   :  { %603 = vadd.xlane.f32.xlu0 %v602_v1 }
 0x402   :  { %1020 = vmatmul.mubr.msk.bf16.vlgmr.msra.gmra.mxu0 %vm179_vm3, %v629_v9 }
 0x403   :  { %v1071_v10 = vpop.eup %1070  ;;  %1023 = vmatprep.mubr.msk.bf16.mxu0 %vm1117_vm1, %v1116_v0 }
 0x404   :  { %v605_v19 = vsel %vm179_vm3, %v1071_v10, 0.0 }
 0x405   :  { %606 = vadd.xlane.f32.xlu0 %v605_v19 }
 0x407   :  { %v1073_v12 = vpop.eup %1072 }
 0x408   :  { %v608_v15 = vsel %vm179_vm3, %v1073_v12, 0.0  ;;  %v630_v17 = vpack.c.bf16 %v1073_v12, %v1071_v10 }
 0x409   :  { %609 = vadd.xlane.f32.xlu1 %v608_v15 }
 0x40a   :  { %1024 = vmatmul.mubr.msk.bf16.gmra.mxu0 %vm179_vm3, %v630_v17 }
 0x40b   :  { %v1075_v18 = vpop.eup %1074  ;;  %1027 = vmatprep.mubr.msk.bf16.mxu0 %vm1117_vm1, %v1116_v0  ;;  %v540_v0 = vmul.f32 1.442695, %v534_v44  ;;  %v589_v44 = vld [vmem:[#allocation3 + $0x28] sm:$0xff] }
 0x40c   :  { %v611_v23 = vsel %vm179_vm3, %v1075_v18, 0.0  ;;  %v631_v28 = vpack.c.bf16 %v1075_v18, %v1075_v18 }
 0x40d   :  { %266 = vadd.xlane.f32.xlu1 %v265_v21  ;;  %612 = vadd.xlane.f32.xlu0 %v611_v23  ;;  %1076 = vpow2.f32 %v540_v0  ;;  %v259_v23 = vld [vmem:[#allocation3 + $0x20] sm:$0xff] }
 0x40e   :  { %1078 = vpow2.f32 %v542_v14 }
 0x40f   :  { %1080 = vpow2.f32 %v538_v22 }
 0x410   :  { %1082 = vpow2.f32 %v546_v30 }
 0x411   :  { %272 = vadd.xlane.f32.xlu1 %v271_v24  ;;  %269 = vadd.xlane.f32.xlu0 %v268_v26  ;;  %1084 = vpow2.f32 %v544_v20  ;;  %v258_v24 = vld [vmem:[#allocation3 + $0x18] sm:$0xff] }
 0x412   :  { %1028 = vmatmul.mubr.msk.bf16.gmra.mxu0 %vm179_vm3, %v631_v28  ;;  %1086 = vpow2.f32 %v205_v31 }
 0x413   :  { %1088 = vpow2.f32 %v207_v56 }
 0x414   :  { %1090 = vpow2.f32 %v209_v57 }
 0x415   :  { %278 = vadd.xlane.f32.xlu1 %v277_v16  ;;  %275 = vadd.xlane.f32.xlu0 %v274_v3  ;;  %1092 = vpow2.f32 %v211_v35 }
 0x416   :  { %1094 = vpow2.f32 %v213_v37 }
 0x41a   :  { %v1077_v25 = vpop.eup %1076 }
 0x41b   :  { %v1079_v33 = vpop.eup %1078  ;;  %v595_v38 = vmul.f32 %v1077_v25, %v590_v62 }
 0x41c   :  { %v1081_v36 = vpop.eup %1080  ;;  %v596_v43 = vmul.f32 %v1079_v33, %v591_v41 }
 0x41d   :  { %v1083_v27 = vpop.eup %1082  ;;  %v594_v58 = vmul.f32 %v1081_v36, %v589_v44 }
 0x41e   :  { %v1085_v29 = vpop.eup %1084  ;;  %v598_v2 = vmul.f32 %v1083_v27, %v593_v6 }
 0x41f   :  { %v597_v51 = vmul.f32 %v1085_v29, %v592_v47  ;;  %v1087_v50 = vpop.eup %1086 }
 0x420   :  { %v1089_v5 = vpop.eup %1088  ;;  %v260_v60 = vmul.f32 %v1087_v50, %v255_v54 }
 0x421   :  { %v1091_v52 = vpop.eup %1090  ;;  %v261_v15 = vmul.f32 %v1089_v5, %v256_v13 }
 0x422   :  { %v1093_v19 = vpop.eup %1092  ;;  %v262_v12 = vmul.f32 %v1091_v52, %v257_v4  ;;  %v713_v4 = vld [vmem:[#allocation4 + $0x48] sm:$0xff] }
 0x423   :  { %v1095_v17 = vpop.eup %1094  ;;  %v263_v3 = vmul.f32 %v1093_v19, %v258_v24 }
 0x424   :  { %v264_v16 = vmul.f32 %v1095_v17, %v259_v23 }
 0x426   :  { %721 = vperm.xlu1 %1038, %v1077_v25  }
 0x42a   :  { %726 = vperm.xlu1 %1038, %v1079_v33  }
 0x42b   :  { %716 = vperm.xlu0 %1039, %v1081_v36  }
 0x42e   :  { %736 = vperm.xlu1 %1038, %v1083_v27  }
 0x42f   :  { %731 = vperm.xlu0 %1039, %v1085_v29  }
 0x486   :  { %v601_v61 = vpop.xlane.xlu1 %600 }
 0x487   :  { %v614_v63 = vadd.f32 %v601_v61, %v594_v58 }
 0x489   :  { %619 = vst.msk [vmem:[#allocation3 + $0x28] sm:$0xff] %vm19_vm2, %v614_v63 }
 0x48a   :  { %v604_v39 = vpop.xlane.xlu0 %603 }
 0x48b   :  { %v615_v42 = vadd.f32 %v604_v39, %v595_v38  ;;  %v709_v38 = vld [vmem:[#allocation4 + $0x28] sm:$0xff] }
 0x48d   :  { %620 = vst.msk [vmem:[#allocation3 + $0x30] sm:$0xff] %vm19_vm2, %v615_v42 }
 0x48e   :  { %v607_v45 = vpop.xlane.xlu0 %606 }
 0x48f   :  { %v616_v46 = vadd.f32 %v607_v45, %v596_v43  ;;  %v710_v45 = vld [vmem:[#allocation4 + $0x30] sm:$0xff] }
 0x490   :  { %v809_v49 = vld [vmem:[#allocation3 + $0x28] sm:$0xff] }
 0x491   :  { %621 = vst.msk [vmem:[#allocation3 + $0x38] sm:$0xff] %vm19_vm2, %v616_v46  ;;  %1096 = vrcp.f32 %v809_v49 }
 0x492   :  { %v610_v53 = vpop.xlane.xlu1 %609 }
 0x493   :  { %v617_v7 = vadd.f32 %v610_v53, %v597_v51 }
 0x494   :  { %v810_v11 = vld [vmem:[#allocation3 + $0x30] sm:$0xff] }
 0x495   :  { %622 = vst.msk [vmem:[#allocation3 + $0x40] sm:$0xff] %vm19_vm2, %v617_v7  ;;  %1098 = vrcp.f32 %v810_v11 }
 0x496   :  { %v267_v59 = vpop.xlane.xlu1 %266  ;;  %v613_v8 = vpop.xlane.xlu0 %612 }
 0x497   :  { %v280_v9 = vadd.f32 %v267_v59, %v260_v60  ;;  %v618_v1 = vadd.f32 %v613_v8, %v598_v2 }
 0x498   :  { %v811_v10 = vld [vmem:[#allocation3 + $0x38] sm:$0xff] }
 0x499   :  { %286 = vst.msk [vmem:[#allocation3] sm:$0xff] %vm19_vm2, %v280_v9  ;;  %623 = vst.msk [vmem:[#allocation3 + $0x48] sm:$0xff] %vm19_vm2, %v618_v1  ;;  %1100 = vrcp.f32 %v811_v10 }
 0x49a   :  { %v273_v18 = vpop.xlane.xlu1 %272  ;;  %v270_v21 = vpop.xlane.xlu0 %269 }
 0x49b   :  { %v282_v26 = vadd.f32 %v273_v18, %v262_v12  ;;  %v281_v28 = vadd.f32 %v270_v21, %v261_v15 }
 0x49c   :  { %v812_v0 = vld [vmem:[#allocation3 + $0x40] sm:$0xff] }
 0x49d   :  { %288 = vst.msk [vmem:[#allocation3 + $0x10] sm:$0xff] %vm19_vm2, %v282_v26  ;;  %287 = vst.msk [vmem:[#allocation3 + $0x8] sm:$0xff] %vm19_vm2, %v281_v28  ;;  %1102 = vrcp.f32 %v812_v0 }
 0x49e   :  { %v1097_v14 = vpop.eup %1096  ;;  %v279_v22 = vpop.xlane.xlu1 %278 }
 0x49f   :  { %v276_v30 = vpop.xlane.xlu0 %275  ;;  %v284_v20 = vadd.f32 %v279_v22, %v264_v16  ;;  %821 = vperm.xlu0 %1039, %v1097_v14  }
 0x4a0   :  { %v283_v25 = vadd.f32 %v276_v30, %v263_v3  ;;  %v813_v33 = vld [vmem:[#allocation3 + $0x48] sm:$0xff]  ;;  %v762_v29 = vld [vmem:[#allocation3] sm:$0xff] }
 0x4a1   :  { %290 = vst.msk [vmem:[#allocation3 + $0x20] sm:$0xff] %vm19_vm2, %v284_v20  ;;  %1104 = vrcp.f32 %v813_v33 }
 0x4a2   :  { %289 = vst.msk [vmem:[#allocation3 + $0x18] sm:$0xff] %vm19_vm2, %v283_v25  ;;  %v1099_v36 = vpop.eup %1098  ;;  %1106 = vrcp.f32 %v762_v29  ;;  %v722_v41 = vpop.permute.xlu1 %721 }
 0x4a3   :  { %826 = vperm.xlu1 %1038, %v1099_v36   ;;  %v740_v51 = vmul.f32 %v722_v41, %v710_v45  ;;  %v376_v36 = vld [vmem:[#allocation4] sm:$0xff]  ;;  %v379_v41 = vld [vmem:[#allocation4 + $0x18] sm:$0xff] }
 0x4a4   :  { %v763_v44 = vld [vmem:[#allocation3 + $0x8] sm:$0xff]  ;;  %v764_v56 = vld [vmem:[#allocation3 + $0x10] sm:$0xff] }
 0x4a5   :  { %1108 = vrcp.f32 %v763_v44 }
 0x4a6   :  { %v1101_v27 = vpop.eup %1100  ;;  %1110 = vrcp.f32 %v764_v56  ;;  %v717_v39 = vpop.permute.xlu0 %716 }
 0x4a7   :  { %831 = vperm.xlu0 %1039, %v1101_v27   ;;  %v739_v42 = vmul.f32 %v717_v39, %v709_v38  ;;  %v727_v53 = vpop.permute.xlu1 %726  ;;  %v380_v39 = vld [vmem:[#allocation4 + $0x20] sm:$0xff] }
 0x4a8   :  { %v766_v61 = vld [vmem:[#allocation3 + $0x20] sm:$0xff] }
 0x4a9   :  { %v765_v58 = vld [vmem:[#allocation3 + $0x18] sm:$0xff] }
 0x4aa   :  { %v1103_v31 = vpop.eup %1102  ;;  %1112 = vrcp.f32 %v765_v58  ;;  %v732_v60 = vpop.permute.xlu0 %731  ;;  %v378_v58 = vld [vmem:[#allocation4 + $0x10] sm:$0xff] }
 0x4ab   :  { %836 = vperm.xlu1 %1038, %v1103_v31   ;;  %1114 = vrcp.f32 %v766_v61  ;;  %v737_v13 = vpop.permute.xlu1 %736  ;;  %v377_v61 = vld [vmem:[#allocation4 + $0x8] sm:$0xff] }
 0x4ae   :  { %v1105_v57 = vpop.eup %1104 }
 0x4af   :  { %383 = vperm.xlu1 %1038, %v1087_v50   ;;  %841 = vperm.xlu0 %1039, %v1105_v57   ;;  %v1107_v62 = vpop.eup %1106  ;;  %v711_v50 = vld [vmem:[#allocation4 + $0x38] sm:$0xff] }
 0x4b0   :  { %v741_v11 = vmul.f32 %v727_v53, %v711_v50 }
 0x4b2   :  { %v1109_v63 = vpop.eup %1108 }
 0x4b3   :  { %393 = vperm.xlu1 %1038, %v1091_v52   ;;  %388 = vperm.xlu0 %1039, %v1089_v5   ;;  %v1111_v35 = vpop.eup %1110  ;;  %v712_v5 = vld [vmem:[#allocation4 + $0x40] sm:$0xff] }
 0x4b4   :  { %v742_v8 = vmul.f32 %v732_v60, %v712_v5 }
 0x4b7   :  { %403 = vperm.xlu1 %1038, %v1095_v17   ;;  %398 = vperm.xlu0 %1039, %v1093_v19   ;;  %v1113_v37 = vpop.eup %1112  ;;  %v743_v19 = vmul.f32 %v737_v13, %v713_v4 }
 0x4b8   :  { %v1115_v43 = vpop.eup %1114 }
 0x4bb   :  { %774 = vperm.xlu0 %1039, %v1107_v62   ;;  %779 = vperm.xlu1 %1038, %v1109_v63  }
 0x4bf   :  { %784 = vperm.xlu0 %1039, %v1111_v35   ;;  %789 = vperm.xlu1 %1038, %v1113_v37  }
 0x4c2   :  { %v686_v47 = vpop.f32.mrf.mxu0 }
 0x4c3   :  { %v744_v46 = vadd.f32 %v739_v42, %v686_v47  ;;  %794 = vperm.xlu0 %1039, %v1115_v43  }
 0x4c4   :  { %v1021_v49 = vpop.f32.mrf.mxu0 }
 0x4c5   :  { %749 = vst.msk [vmem:[#allocation4 + $0x28] sm:$0xff] %vm40_vm0, %v744_v46 }
 0x4c6   :  { %v689_v54 = vpop.f32.mrf.mxu0 }
 0x4c7   :  { %v745_v6 = vadd.f32 %v740_v51, %v689_v54 }
 0x4c8   :  { %v1022_v7 = vpop.f32.mrf.mxu0 }
 0x4c9   :  { %750 = vst.msk [vmem:[#allocation4 + $0x30] sm:$0xff] %vm40_vm0, %v745_v6 }
 0x4ca   :  { %v694_v2 = vpop.f32.mrf.mxu0 }
 0x4cb   :  { %v746_v52 = vadd.f32 %v741_v11, %v694_v2 }
 0x4cc   :  { %v1025_v59 = vpop.f32.mrf.mxu0  ;;  %v803_v24 = vld [vmem:[#allocation4 + $0x28] sm:$0xff] }
 0x4cd   :  { %751 = vst.msk [vmem:[#allocation4 + $0x38] sm:$0xff] %vm40_vm0, %v746_v52 }
 0x4ce   :  { %v697_v9 = vpop.f32.mrf.mxu0 }
 0x4cf   :  { %v747_v1 = vadd.f32 %v742_v8, %v697_v9 }
 0x4d0   :  { %v1026_v10 = vpop.f32.mrf.mxu0  ;;  %v804_v28 = vld [vmem:[#allocation4 + $0x30] sm:$0xff] }
 0x4d1   :  { %752 = vst.msk [vmem:[#allocation4 + $0x40] sm:$0xff] %vm40_vm0, %v747_v1 }
 0x4d2   :  { %v702_v12 = vpop.f32.mrf.mxu0 }
 0x4d3   :  { %v748_v15 = vadd.f32 %v743_v19, %v702_v12 }
 0x4d4   :  { %v1029_v17 = vpop.f32.mrf.mxu0  ;;  %v805_v22 = vld [vmem:[#allocation4 + $0x38] sm:$0xff] }
 0x4d5   :  { %753 = vst.msk [vmem:[#allocation4 + $0x48] sm:$0xff] %vm40_vm0, %v748_v15 }
 0x4d6   :  { %v705_v18 = vpop.f32.mrf.mxu0 }
 0x4d8   :  { %v1030_v21 = vpop.f32.mrf.mxu0  ;;  %v806_v20 = vld [vmem:[#allocation4 + $0x40] sm:$0xff] }
 0x4dc   :  { %v807_v44 = vld [vmem:[#allocation4 + $0x48] sm:$0xff] }
 0x51a   :  { %v822_v23 = vpop.permute.xlu0 %821 }
 0x51b   :  { %v844_v0 = vmul.f32 %v822_v23, %v803_v24 }
 0x51e   :  { %v827_v26 = vpop.permute.xlu1 %826 }
 0x51f   :  { %v845_v16 = vmul.f32 %v827_v26, %v804_v28 }
 0x521   :  { %v1040_v3 = vpack.i.bf16 %v845_v16, %v844_v0 }
 0x522   :  { %v832_v14 = vpop.permute.xlu0 %831 }
 0x523   :  { %1041 = vrot.lane.b32.xlu1 %v1040_v3, %s1122_s25  ;;  %v846_v25 = vmul.f32 %v832_v14, %v805_v22 }
 0x526   :  { %v837_v30 = vpop.permute.xlu1 %836 }
 0x527   :  { %v847_v33 = vmul.f32 %v837_v30, %v806_v20 }
 0x529   :  { %v1045_v27 = vpack.i.bf16 %v847_v33, %v846_v25 }
 0x52a   :  { %v384_v29 = vpop.permute.xlu1 %383  ;;  %v842_v31 = vpop.permute.xlu0 %841 }
 0x52b   :  { %v406_v56 = vmul.f32 %v384_v29, %v376_v36  ;;  %v848_v57 = vmul.f32 %v842_v31, %v807_v44  ;;  %1046 = vrot.lane.b32.xlu0 %v1045_v27, %s1122_s25 }
 0x52d   :  { %v411_v62 = vadd.f32 %v406_v56, %v1385_v32  ;;  %862 = vrot.lane.b32.xlu1 %v848_v57, %s1122_s25 }
 0x52e   :  { %v394_v63 = vpop.permute.xlu1 %393  ;;  %v389_v35 = vpop.permute.xlu0 %388 }
 0x52f   :  { %416 = vst.msk [vmem:[#allocation4] sm:$0xff] %vm40_vm0, %v411_v62  ;;  %v408_v37 = vmul.f32 %v394_v63, %v378_v58  ;;  %v407_v38 = vmul.f32 %v389_v35, %v377_v61 }
 0x531   :  { %v413_v42 = vadd.f32 %v408_v37, %v1389_v40  ;;  %v412_v43 = vadd.f32 %v407_v38, %v1387_v34 }
 0x532   :  { %v404_v45 = vpop.permute.xlu1 %403  ;;  %v399_v47 = vpop.permute.xlu0 %398 }
 0x533   :  { %418 = vst.msk [vmem:[#allocation4 + $0x10] sm:$0xff] %vm40_vm0, %v413_v42  ;;  %417 = vst.msk [vmem:[#allocation4 + $0x8] sm:$0xff] %vm40_vm0, %v412_v43  ;;  %v410_v32 = vmul.f32 %v404_v45, %v380_v39  ;;  %v409_v46 = vmul.f32 %v399_v47, %v379_v41 }
 0x535   :  { %v415_v49 = vadd.f32 %v410_v32, %v1393_v55  ;;  %v414_v51 = vadd.f32 %v409_v46, %v1391_v48 }
 0x536   :  { %v780_v50 = vpop.permute.xlu1 %779  ;;  %v775_v40 = vpop.permute.xlu0 %774  ;;  %v757_v54 = vld [vmem:[#allocation4] sm:$0xff] }
 0x537   :  { %420 = vst.msk [vmem:[#allocation4 + $0x20] sm:$0xff] %vm40_vm0, %v415_v49  ;;  %419 = vst.msk [vmem:[#allocation4 + $0x18] sm:$0xff] %vm40_vm0, %v414_v51  ;;  %v797_v5 = vmul.f32 %v775_v40, %v757_v54 }
 0x53a   :  { %v790_v53 = vpop.permute.xlu1 %789  ;;  %v758_v34 = vld [vmem:[#allocation4 + $0x8] sm:$0xff]  ;;  %v785_v6 = vpop.permute.xlu0 %784  ;;  %v759_v4 = vld [vmem:[#allocation4 + $0x10] sm:$0xff] }
 0x53b   :  { %v798_v11 = vmul.f32 %v780_v50, %v758_v34  ;;  %v799_v1 = vmul.f32 %v785_v6, %v759_v4 }
 0x53e   :  { %v795_v52 = vpop.permute.xlu0 %794  ;;  %v760_v13 = vld [vmem:[#allocation4 + $0x18] sm:$0xff]  ;;  %v761_v9 = vld [vmem:[#allocation4 + $0x20] sm:$0xff] }
 0x53f   :  { %v800_v19 = vmul.f32 %v790_v53, %v760_v13  ;;  %v801_v12 = vmul.f32 %v795_v52, %v761_v9 }
 0x595   :  { %v1042_v7 = vpop.permute.xlu1 %1041 }
 0x596   :  { %v1044_v60 = vunpack.i.h.bf16 %v1042_v7  ;;  %v1043_v2 = vunpack.i.l.bf16 %v1042_v7 }
 0x598   :  { %v871_v55 = vsel %vm40_vm0, %v798_v11, %v1044_v60  ;;  %v870_v48 = vsel %vm40_vm0, %v797_v5, %v1043_v2 }
 0x599   :  { %v931_v59 = vpack.c.bf16 %v871_v55, %v871_v55  ;;  %v930_v8 = vpack.c.bf16 %v870_v48, %v870_v48 }
 0x59b   :  { %898 = vst.msk [vmem:[%s1576_s3 + $0x4] sm:$0xf] %vm896_vm5, %v931_v59  ;;  %897 = vst.msk [vmem:[%s1576_s3] sm:$0xf] %vm896_vm5, %v930_v8 }
 0x59d   :  { %v1047_v10 = vpop.permute.xlu0 %1046 }
 0x59e   :  { %v1049_v15 = vunpack.i.h.bf16 %v1047_v10  ;;  %v1048_v17 = vunpack.i.l.bf16 %v1047_v10 }
 0x59f   :  { %v863_v18 = vpop.permute.xlu1 %862 }
 0x5a0   :  { %v873_v21 = vsel %vm40_vm0, %v800_v19, %v1049_v15  ;;  %v872_v23 = vsel %vm40_vm0, %v799_v1, %v1048_v17  ;;  %v874_v24 = vsel %vm40_vm0, %v801_v12, %v863_v18 }
 0x5a1   :  { %v933_v26 = vpack.c.bf16 %v873_v21, %v873_v21  ;;  %v932_v28 = vpack.c.bf16 %v872_v23, %v872_v23  ;;  %v934_v0 = vpack.c.bf16 %v874_v24, %v874_v24 }
 0x5a3   :  { %900 = vst.msk [vmem:[%s1576_s3 + $0xc] sm:$0xf] %vm896_vm5, %v933_v26  ;;  %899 = vst.msk [vmem:[%s1576_s3 + $0x8] sm:$0xf] %vm896_vm5, %v932_v28 }
 0x5a4   :  { %901 = vst.msk [vmem:[%s1576_s3 + $0x10] sm:$0xf] %vm896_vm5, %v934_v0 }

// kernel: diffusion_transformer_forward.17
= control target key start
LH: loop header
LB: loop body
LE: loop exit
PB: predicated region body
PF: predicated region fallthrough
CT: control target
= control target key end

     0   :  { %vm43_vm0 = vcmask 523264   ;;  %s496_s0 = inlined_call_operand.vmem [shape: bf16[1,32,64], index: 0, kind: input, shape index: {}]   ;;  %s497_s1 = inlined_call_operand.vmem [shape: f32[1,64], index: 1, kind: input, shape index: {}]   ;;  %s498_s2 = inlined_call_operand.vmem [shape: f32[1,64], index: 2, kind: input, shape index: {}]   ;;  %s499_s7 = inlined_call_operand.vmem [shape: bf16[64,128], index: 7, kind: input, shape index: {}]   ;;  %s500_s6 = inlined_call_operand.vmem [shape: f32[1,1,64], index: 6, kind: input, shape index: {}]   ;;  %s501_s3 = inlined_call_operand.vmem [shape: f32[1,64], index: 3, kind: input, shape index: {}]   ;;  %s502_s4 = inlined_call_operand.vmem [shape: f32[1,64], index: 4, kind: input, shape index: {}]   ;;  %s503_s5 = inlined_call_operand.vmem [shape: f32[1,1,64], index: 5, kind: input, shape index: {}]   ;;  %s504_s8 = inlined_call_operand.vmem [shape: f32[1,128], index: 8, kind: input, shape index: {}]   ;;  %s505_s9 = inlined_call_operand.vmem [shape: f32[1,32,128], index: 9, kind: output, shape index: {}]  }
   0x1   :  { %v331_v0 = vld [vmem:[%s496_s0] sm:$0xff]   ;;  %v338_v1 = vld [vmem:[%s496_s0 + $0x8] sm:$0xff]  }
   0x2   :  { %v332_v2 = vunpack.c.l.bf16 %v331_v0  ;;  %v336_v3 = vunpack.c.l.bf16 %v338_v1  ;;  %v333_v4 = vunpack.c.h.bf16 %v331_v0  ;;  %v337_v5 = vunpack.c.h.bf16 %v338_v1  ;;  %v318_v43 = vld [vmem:[%s497_s1] ss:$0 sm:$0xff] }
   0x3   :  { %v319_v45 = vld [vmem:[%s498_s2] ss:$0 sm:$0xff] }
   0x4   :  { %v44_v6 = vsel %vm43_vm0, %v332_v2, 0.0  ;;  %v50_v7 = vsel %vm43_vm0, %v336_v3, 0.0  ;;  %v47_v8 = vsel %vm43_vm0, %v333_v4, 0.0  ;;  %v53_v9 = vsel %vm43_vm0, %v337_v5, 0.0 }
   0x5   :  { %45 = vadd.xlane.f32.xlu0 %v44_v6  ;;  %51 = vadd.xlane.f32.xlu1 %v50_v7 }
   0x9   :  { %48 = vadd.xlane.f32.xlu0 %v47_v8  ;;  %54 = vadd.xlane.f32.xlu1 %v53_v9 }
  0x8e   :  { %v46_v10 = vpop.xlane.xlu0 %45  ;;  %v52_v11 = vpop.xlane.xlu1 %51 }
  0x8f   :  { %v57_v12 = vmul.f32 0.015625, %v46_v10  ;;  %v59_v13 = vmul.f32 0.015625, %v52_v11 }
  0x91   :  { %v61_v14 = vsub.f32 %v332_v2, %v57_v12  ;;  %v63_v15 = vsub.f32 %v336_v3, %v59_v13 }
  0x92   :  { %v49_v16 = vpop.xlane.xlu0 %48  ;;  %v55_v17 = vpop.xlane.xlu1 %54 }
  0x93   :  { %v58_v18 = vmul.f32 0.015625, %v49_v16  ;;  %v60_v19 = vmul.f32 0.015625, %v55_v17  ;;  %v65_v20 = vmul.f32 %v61_v14, %v61_v14  ;;  %v67_v21 = vmul.f32 %v63_v15, %v63_v15 }
  0x95   :  { %v62_v22 = vsub.f32 %v333_v4, %v58_v18  ;;  %v64_v23 = vsub.f32 %v337_v5, %v60_v19  ;;  %v69_v24 = vsel %vm43_vm0, %v65_v20, 0.0  ;;  %v75_v25 = vsel %vm43_vm0, %v67_v21, 0.0  ;;  %v357_v20 = vld [vmem:[%s499_s7 + $0x18] sm:$0xff]   ;;  %v358_v21 = vld [vmem:[%s499_s7 + $0x10] sm:$0xff]  }
  0x96   :  { %70 = vadd.xlane.f32.xlu0 %v69_v24  ;;  %345 = vmatprep.subr.bf16.mxu0 %v357_v20 }
  0x97   :  { %v66_v26 = vmul.f32 %v62_v22, %v62_v22  ;;  %v68_v27 = vmul.f32 %v64_v23, %v64_v23  ;;  %346 = vmatpush3.bf16.msra.mxu0 %v357_v20 }
  0x98   :  { %347 = vmatprep.subr.bf16.mxu0 %v358_v21 }
  0x99   :  { %v72_v28 = vsel %vm43_vm0, %v66_v26, 0.0  ;;  %v78_v29 = vsel %vm43_vm0, %v68_v27, 0.0 }
  0x9a   :  { %76 = vadd.xlane.f32.xlu0 %v75_v25  ;;  %73 = vadd.xlane.f32.xlu1 %v72_v28 }
  0x9b   :  { %348 = vmatpush3.bf16.msra.mxu0 %v358_v21 }
  0x9e   :  { %79 = vadd.xlane.f32.xlu1 %v78_v29 }
 0x11f   :  { %v71_v30 = vpop.xlane.xlu0 %70 }
 0x120   :  { %v81_v31 = vmul.f32 0.015625, %v71_v30 }
 0x122   :  { %v85_v32 = vadd.f32 1e-05, %v81_v31 }
 0x123   :  { %v74_v33 = vpop.xlane.xlu1 %73  ;;  %v77_v34 = vpop.xlane.xlu0 %76 }
 0x124   :  { %361 = vrsqrt.f32 %v85_v32  ;;  %v82_v35 = vmul.f32 0.015625, %v74_v33  ;;  %v83_v36 = vmul.f32 0.015625, %v77_v34 }
 0x126   :  { %v86_v37 = vadd.f32 1e-05, %v82_v35  ;;  %v87_v38 = vadd.f32 1e-05, %v83_v36  ;;  %v194_v36 = vlaneseq }
 0x127   :  { %v80_v39 = vpop.xlane.xlu1 %79 }
 0x128   :  { %363 = vrsqrt.f32 %v86_v37  ;;  %v84_v40 = vmul.f32 0.015625, %v80_v39  ;;  %v195_v37 = vshrl.u32 %v194_v36, 7 }
 0x129   :  { %365 = vrsqrt.f32 %v87_v38  ;;  %v191_v38 = vld [vmem:[%s500_s6] sm:$0x1] }
 0x12a   :  { %v88_v41 = vadd.f32 1e-05, %v84_v40  ;;  %v320_v40 = vld [vmem:[%s501_s3] ss:$0 sm:$0xff] }
 0x12c   :  { %367 = vrsqrt.f32 %v88_v41 }
 0x131   :  { %v362_v42 = vpop.eup %361 }
 0x132   :  { %v93_v44 = vmul.f32 %v362_v42, %v61_v14  ;;  %v192_v42 = vadd.f32 1.0, %v191_v38 }
 0x134   :  { %v103_v46 = vmul.f32 %v318_v43, %v93_v44  ;;  %v321_v44 = vld [vmem:[%s502_s4] ss:$0 sm:$0xff] }
 0x135   :  { %v364_v47 = vpop.eup %363 }
 0x136   :  { %v366_v48 = vpop.eup %365  ;;  %v113_v49 = vadd.f32 %v319_v45, %v103_v46  ;;  %v94_v50 = vmul.f32 %v364_v47, %v62_v22  ;;  %v359_v22 = vld [vmem:[%s499_s7 + $0x8] sm:$0xff]  }
 0x137   :  { %v95_v51 = vmul.f32 %v366_v48, %v63_v15  ;;  %349 = vmatprep.subr.bf16.mxu0 %v359_v22 }
 0x138   :  { %v119_v52 = vsel %vm43_vm0, %v113_v49, 0.0  ;;  %v104_v53 = vmul.f32 %v318_v43, %v94_v50  ;;  %350 = vmatpush3.bf16.msra.mxu0 %v359_v22 }
 0x139   :  { %v368_v54 = vpop.eup %367  ;;  %120 = vadd.xlane.f32.xlu0 %v119_v52  ;;  %v105_v55 = vmul.f32 %v318_v43, %v95_v51 }
 0x13a   :  { %v114_v56 = vadd.f32 %v319_v45, %v104_v53  ;;  %v96_v57 = vmul.f32 %v368_v54, %v64_v23  ;;  %v360_v23 = vld [vmem:[%s499_s7] sm:$0xff]  }
 0x13b   :  { %v115_v58 = vadd.f32 %v319_v45, %v105_v55  ;;  %351 = vmatprep.subr.bf16.mxu0 %v360_v23 }
 0x13c   :  { %v122_v59 = vsel %vm43_vm0, %v114_v56, 0.0  ;;  %v106_v60 = vmul.f32 %v318_v43, %v96_v57  ;;  %352 = vmatpush3.bf16.msra.mxu0 %v360_v23  ;;  %v196_v43 = vsub.s32 0, %v195_v37 }
 0x13d   :  { %123 = vadd.xlane.f32.xlu1 %v122_v59  ;;  %v125_v61 = vsel %vm43_vm0, %v115_v58, 0.0 }
 0x13e   :  { %126 = vadd.xlane.f32.xlu0 %v125_v61  ;;  %v116_v62 = vadd.f32 %v319_v45, %v106_v60  ;;  %v197_v50 = vrot.slane %v192_v42, %v196_v43 }
 0x140   :  { %v128_v63 = vsel %vm43_vm0, %v116_v62, 0.0 }
 0x141   :  { %129 = vadd.xlane.f32.xlu1 %v128_v63 }
 0x1c2   :  { %v121_v0 = vpop.xlane.xlu0 %120 }
 0x1c3   :  { %v131_v1 = vmul.f32 0.015625, %v121_v0 }
 0x1c5   :  { %v135_v2 = vsub.f32 %v113_v49, %v131_v1 }
 0x1c6   :  { %v124_v3 = vpop.xlane.xlu1 %123 }
 0x1c7   :  { %v132_v4 = vmul.f32 0.015625, %v124_v3  ;;  %v127_v5 = vpop.xlane.xlu0 %126  ;;  %v139_v6 = vmul.f32 %v135_v2, %v135_v2 }
 0x1c8   :  { %v133_v7 = vmul.f32 0.015625, %v127_v5 }
 0x1c9   :  { %v136_v8 = vsub.f32 %v114_v56, %v132_v4  ;;  %v143_v9 = vsel %vm43_vm0, %v139_v6, 0.0 }
 0x1ca   :  { %v137_v10 = vsub.f32 %v115_v58, %v133_v7  ;;  %v130_v11 = vpop.xlane.xlu1 %129  ;;  %144 = vadd.xlane.f32.xlu0 %v143_v9  ;;  %v322_v58 = vld [vmem:[%s503_s5] ss:$0 sm:$0xff] }
 0x1cb   :  { %v134_v12 = vmul.f32 0.015625, %v130_v11  ;;  %v140_v13 = vmul.f32 %v136_v8, %v136_v8  ;;  %v323_v7 = vld [vmem:[%s504_s8] ss:$0 sm:$0xff] }
 0x1cc   :  { %v141_v14 = vmul.f32 %v137_v10, %v137_v10 }
 0x1cd   :  { %v138_v15 = vsub.f32 %v116_v62, %v134_v12  ;;  %v146_v16 = vsel %vm43_vm0, %v140_v13, 0.0 }
 0x1ce   :  { %147 = vadd.xlane.f32.xlu1 %v146_v16  ;;  %v149_v17 = vsel %vm43_vm0, %v141_v14, 0.0 }
 0x1cf   :  { %150 = vadd.xlane.f32.xlu0 %v149_v17  ;;  %v142_v18 = vmul.f32 %v138_v15, %v138_v15 }
 0x1d1   :  { %v152_v19 = vsel %vm43_vm0, %v142_v18, 0.0 }
 0x1d2   :  { %153 = vadd.xlane.f32.xlu1 %v152_v19 }
 0x253   :  { %v145_v24 = vpop.xlane.xlu0 %144 }
 0x254   :  { %v155_v25 = vmul.f32 0.015625, %v145_v24 }
 0x256   :  { %v159_v26 = vadd.f32 1e-05, %v155_v25 }
 0x257   :  { %v148_v27 = vpop.xlane.xlu1 %147 }
 0x258   :  { %369 = vrsqrt.f32 %v159_v26  ;;  %v156_v28 = vmul.f32 0.015625, %v148_v27  ;;  %v151_v29 = vpop.xlane.xlu0 %150 }
 0x259   :  { %v157_v30 = vmul.f32 0.015625, %v151_v29 }
 0x25a   :  { %v160_v31 = vadd.f32 1e-05, %v156_v28 }
 0x25b   :  { %v161_v32 = vadd.f32 1e-05, %v157_v30  ;;  %v154_v33 = vpop.xlane.xlu1 %153 }
 0x25c   :  { %371 = vrsqrt.f32 %v160_v31  ;;  %v158_v34 = vmul.f32 0.015625, %v154_v33 }
 0x25d   :  { %373 = vrsqrt.f32 %v161_v32 }
 0x25e   :  { %v162_v35 = vadd.f32 1e-05, %v158_v34 }
 0x260   :  { %375 = vrsqrt.f32 %v162_v35 }
 0x265   :  { %v370_v39 = vpop.eup %369 }
 0x266   :  { %v167_v41 = vmul.f32 %v370_v39, %v135_v2 }
 0x268   :  { %v177_v45 = vmul.f32 %v320_v40, %v167_v41 }
 0x269   :  { %v372_v46 = vpop.eup %371 }
 0x26a   :  { %v374_v47 = vpop.eup %373  ;;  %v168_v48 = vmul.f32 %v372_v46, %v136_v8  ;;  %v187_v49 = vadd.f32 %v321_v44, %v177_v45 }
 0x26b   :  { %v169_v51 = vmul.f32 %v374_v47, %v137_v10 }
 0x26c   :  { %v178_v52 = vmul.f32 %v320_v40, %v168_v48  ;;  %v199_v57 = vmul.f32 %v197_v50, %v187_v49 }
 0x26d   :  { %v376_v53 = vpop.eup %375  ;;  %v179_v54 = vmul.f32 %v320_v40, %v169_v51 }
 0x26e   :  { %v170_v55 = vmul.f32 %v376_v53, %v138_v15  ;;  %v188_v56 = vadd.f32 %v321_v44, %v178_v52  ;;  %v210_v62 = vadd.f32 %v322_v58, %v199_v57 }
 0x26f   :  { %v189_v59 = vadd.f32 %v321_v44, %v179_v54 }
 0x270   :  { %v200_v60 = vmul.f32 %v197_v50, %v188_v56  ;;  %v180_v61 = vmul.f32 %v320_v40, %v170_v55 }
 0x271   :  { %v201_v1 = vmul.f32 %v197_v50, %v189_v59 }
 0x272   :  { %v211_v63 = vadd.f32 %v322_v58, %v200_v60  ;;  %v190_v0 = vadd.f32 %v321_v44, %v180_v61 }
 0x273   :  { %v212_v4 = vadd.f32 %v322_v58, %v201_v1 }
 0x274   :  { %v214_v2 = vpack.c.bf16 %v211_v63, %v210_v62  ;;  %v202_v3 = vmul.f32 %v197_v50, %v190_v0 }
 0x276   :  { %353 = vmatprep.mubr.msk.bf16.mxu0 %vm43_vm0, %v214_v2  ;;  %v213_v5 = vadd.f32 %v322_v58, %v202_v3 }
 0x278   :  { %v215_v6 = vpack.c.bf16 %v213_v5, %v212_v4 }
 0x27a   :  { %354 = vmatmul.mubr.msk.bf16.vlgmr.msra.gmra.mxu0 %vm43_vm0, %v215_v6 }
 0x33a   :  { %v355_v8 = vpop.f32.mrf.mxu0 }
 0x33b   :  { %v304_v9 = vadd.f32 %v355_v8, %v323_v7 }
 0x33c   :  { %v295_v10 = vpop.f32.mrf.mxu0 }
 0x33d   :  { %312 = vst [vmem:[%s505_s9 + $0x10] sm:$0xff] %v304_v9  ;;  %v296_v11 = vadd.f32 %v323_v7, %v295_v10 }
 0x33e   :  { %v356_v12 = vpop.f32.mrf.mxu0 }
 0x33f   :  { %310 = vst [vmem:[%s505_s9] sm:$0xff] %v296_v11  ;;  %v307_v13 = vadd.f32 %v356_v12, %v323_v7 }
 0x340   :  { %v298_v14 = vpop.f32.mrf.mxu0 }
 0x341   :  { %313 = vst [vmem:[%s505_s9 + $0x18] sm:$0xff] %v307_v13  ;;  %v299_v15 = vadd.f32 %v323_v7, %v298_v14 }
 0x343   :  { %311 = vst [vmem:[%s505_s9 + $0x8] sm:$0xff] %v299_v15 }

// kernel: diffusion_transformer_forward.13
= control target key start
LH: loop header
LB: loop body
LE: loop exit
PB: predicated region body
PF: predicated region fallthrough
CT: control target
= control target key end

     0   :  { %v1102_v0 = vmov 0.0   ;;  %vm1103_vm0 = vmmov 0   ;;  %vm141_vm1 = vcmask 523264   ;;  %vm893_vm2 = vcmask 519168   ;;  %s1519_s2 = inlined_call_operand.vmem [shape: bf16[64,64], index: 2, kind: input, shape index: {}]   ;;  %s1520_s0 = inlined_call_operand.vmem [shape: bf16[1,40,64], index: 0, kind: input, shape index: {}]   ;;  %s1521_s3 = inlined_call_operand.vmem [shape: f32[1,64], index: 3, kind: input, shape index: {}]   ;;  %s1522_s4 = inlined_call_operand.vmem [shape: f32[1,64], index: 4, kind: input, shape index: {}]   ;;  %s1523_s1 = inlined_call_operand.vmem [shape: bf16[1,40,64], index: 1, kind: input, shape index: {}]   ;;  %s1524_s6 = inlined_call_operand.vmem [shape: f32[1,1,64], index: 6, kind: input, shape index: {}]   ;;  %s1525_s5 = inlined_call_operand.vmem [shape: f32[1,64], index: 5, kind: input, shape index: {}]   ;;  %s1526_s7 = inlined_call_operand.vmem [shape: f32[1,1,64], index: 7, kind: input, shape index: {}]   ;;  %s1527_s16 = inlined_call_operand.vmem [shape: bf16[64,256], index: 16, kind: input, shape index: {}]   ;;  %s1528_s8 = inlined_call_operand.vmem [shape: f32[1,64], index: 8, kind: input, shape index: {}]   ;;  %s1529_s9 = inlined_call_operand.vmem [shape: f32[1,64], index: 9, kind: input, shape index: {}]   ;;  %s1530_s11 = inlined_call_operand.vmem [shape: f32[1,1,64], index: 11, kind: input, shape index: {}]   ;;  %s1531_s13 = inlined_call_operand.vmem [shape: f32[1,1,64], index: 13, kind: input, shape index: {}]   ;;  %s1532_s10 = inlined_call_operand.vmem [shape: f32[1,1,64], index: 10, kind: input, shape index: {}]   ;;  %s1533_s12 = inlined_call_operand.vmem [shape: f32[1,1,64], index: 12, kind: input, shape index: {}]   ;;  %s1534_s18 = inlined_call_operand.vmem [shape: bf16[256,64], index: 18, kind: input, shape index: {}]   ;;  %s1535_s17 = inlined_call_operand.vmem [shape: f32[1,256], index: 17, kind: input, shape index: {}]   ;;  %s1536_s19 = inlined_call_operand.vmem [shape: f32[1,64], index: 19, kind: input, shape index: {}]   ;;  %s1537_s14 = inlined_call_operand.vmem [shape: f32[1,1,64], index: 14, kind: input, shape index: {}]   ;;  %s1538_s15 = inlined_call_operand.vmem [shape: f32[1,1,64], index: 15, kind: input, shape index: {}]   ;;  %s1539_s20 = inlined_call_operand.vmem [shape: bf16[1,40,64], index: 20, kind: output, shape index: {}]  }
   0x1   :  { %1543 = sst [smem:[#allocation2_spill]] %s1519_s2  ;;  %1014 = vmatprep.subr.bf16.mxu1 %v1102_v0  ;;  %1022 = vmatprep.mubr.msk.bf16.mxu1 %vm1103_vm0, %v1102_v0  ;;  %v916_v13 = vld [vmem:[%s1524_s6] ss:$0 sm:$0xff] }
   0x2   :  { %1544 = sst [smem:[#allocation3_spill]] %s1520_s0  ;;  %v915_v18 = vld [vmem:[%s1525_s5] ss:$0 sm:$0xff] }
   0x3   :  { %1545 = sst [smem:[#allocation4_spill]] %s1521_s3  ;;  %v917_v21 = vld [vmem:[%s1526_s7] ss:$0 sm:$0xff] }
   0x4   :  { %1546 = sst [smem:[#allocation5_spill]] %s1522_s4 }
   0x5   :  { %1547 = sst [smem:[#allocation6_spill]] %s1523_s1 }
   0x6   :  { %s1548_s23 = sld [smem:[#allocation2_spill]] }
   0x7   :  { %s1549_s29 = sld [smem:[#allocation3_spill]] }
   0x8   :  { %s1550_s24 = sld [smem:[#allocation4_spill]] }
   0x9   :  { %s1551_s4 = sld [smem:[#allocation5_spill]] }
   0xa   :  { %s1552_s28 = sld [smem:[#allocation6_spill]] }
   0xc   :  { %v1037_v1 = vld [vmem:[%s1548_s23 + $0x18] sm:$0xff]   ;;  %v1038_v2 = vld [vmem:[%s1548_s23 + $0x10] sm:$0xff]   ;;  %v1039_v3 = vld [vmem:[%s1548_s23 + $0x8] sm:$0xff]  }
   0xd   :  { %1015 = vmatpush3.bf16.msra.mxu1 %v1037_v1  ;;  %v1040_v4 = vld [vmem:[%s1548_s23] sm:$0xff]   ;;  %v1042_v6 = vld [vmem:[%s1549_s29 + $0x8] sm:$0xff]   ;;  %v1043_v7 = vld [vmem:[%s1549_s29 + $0x10] ss:$0 sps:$4 sm:$0xff]  }
   0xe   :  { %1016 = vmatprep.subr.bf16.mxu1 %v1102_v0  ;;  %v1041_v5 = vld [vmem:[%s1549_s29] sm:$0xff]  }
   0xf   :  { %v903_v8 = vld [vmem:[%s1550_s24] ss:$0 sm:$0xff] }
  0x10   :  { %v914_v10 = vld [vmem:[%s1551_s4] ss:$0 sm:$0xff]  ;;  %v972_v27 = vld [vmem:[%s1552_s28 + $0x8] sm:$0xff]   ;;  %v259_v44 = vld [vmem:[%s1552_s28 + $0x10] sm:$0xf] }
  0x11   :  { %1017 = vmatpush3.bf16.msra.mxu1 %v1038_v2  ;;  %v965_v11 = vld [vmem:[%s1552_s28] sm:$0xff]   ;;  %v970_v34 = vunpack.c.l.bf16 %v972_v27  ;;  %v971_v42 = vunpack.c.h.bf16 %v972_v27  ;;  %v264_v51 = vunpack.c.l.bf16 %v259_v44 }
  0x12   :  { %1018 = vmatprep.subr.bf16.mxu1 %v1102_v0  ;;  %v966_v16 = vunpack.c.l.bf16 %v965_v11  ;;  %v967_v25 = vunpack.c.h.bf16 %v965_v11  ;;  %v1053_v27 = vld [vmem:[%s1527_s16] ss:$8 sps:$4 sm:$0xff]  }
  0x15   :  { %1019 = vmatpush3.bf16.msra.mxu1 %v1039_v3 }
  0x16   :  { %1020 = vmatprep.subr.bf16.mxu1 %v1102_v0 }
  0x19   :  { %1021 = vmatpush3.bf16.msra.mxu1 %v1040_v4 }
  0x1c   :  { %1023 = vmatmul.mubr.msk.bf16.vlgmr.msra.gmra.mxu1 %vm141_vm1, %v1041_v5 }
  0x1d   :  { %1026 = vmatprep.mubr.msk.bf16.mxu1 %vm1103_vm0, %v1102_v0 }
  0x24   :  { %1027 = vmatmul.mubr.msk.bf16.gmra.mxu1 %vm141_vm1, %v1042_v6 }
  0x25   :  { %1030 = vmatprep.mubr.msk.bf16.mxu1 %vm1103_vm0, %v1102_v0 }
  0x2c   :  { %1031 = vmatmul.mubr.msk.bf16.gmra.mxu1 %vm141_vm1, %v1043_v7 }
  0xdc   :  { %v185_v9 = vpop.f32.mrf.mxu1 }
  0xdd   :  { %v186_v12 = vadd.f32 %v903_v8, %v185_v9 }
  0xde   :  { %v1024_v14 = vpop.f32.mrf.mxu1 }
  0xdf   :  { %v265_v15 = vmul.f32 %v914_v10, %v186_v12 }
  0xe0   :  { %v188_v17 = vpop.f32.mrf.mxu1 }
  0xe1   :  { %v270_v19 = vmul.f32 %v916_v13, %v265_v15  ;;  %v189_v20 = vadd.f32 %v903_v8, %v188_v17 }
  0xe2   :  { %v1025_v22 = vpop.f32.mrf.mxu1 }
  0xe3   :  { %v266_v23 = vmul.f32 %v915_v18, %v189_v20  ;;  %v1255_v24 = vadd.f32 %v966_v16, %v270_v19  ;;  %v1046_v19 = vld [vmem:[%s1527_s16 + $0x34] ss:$8 sps:$4 sm:$0xff]   ;;  %v1044_v20 = vld [vmem:[%s1527_s16 + $0x30] ss:$8 sps:$4 sm:$0xff]   ;;  %v1047_v22 = vld [vmem:[%s1527_s16 + $0x20] ss:$8 sps:$4 sm:$0xff]  }
  0xe4   :  { %v193_v26 = vpop.f32.mrf.mxu1  ;;  %503 = vmatprep.subr.bf16.mxu1 %v1046_v19 }
  0xe5   :  { %v271_v28 = vmul.f32 %v917_v21, %v266_v23  ;;  %v194_v29 = vadd.f32 %v903_v8, %v193_v26  ;;  %v282_v30 = vsel %vm141_vm1, %v1255_v24, 0.0  ;;  %504 = vmatpush1.bf16.msra.mxu1 %v1044_v20  ;;  %v1052_v23 = vld [vmem:[%s1527_s16 + $0x14] ss:$8 sps:$4 sm:$0xff]   ;;  %v1055_v26 = vld [vmem:[%s1527_s16 + $0x4] ss:$8 sps:$4 sm:$0xff]  }
  0xe6   :  { %283 = vadd.xlane.f32.xlu0 %v282_v30  ;;  %v1028_v31 = vpop.f32.mrf.mxu1 }
  0xe7   :  { %v267_v32 = vmul.f32 %v915_v18, %v194_v29  ;;  %v1262_v33 = vadd.f32 %v967_v25, %v271_v28  ;;  %v1050_v25 = vld [vmem:[%s1527_s16 + $0x10] ss:$8 sps:$4 sm:$0xff]   ;;  %v1104_v28 = vmov 0  }
  0xe8   :  { %v196_v35 = vpop.f32.mrf.mxu1  ;;  %527 = vmatprep.mubr.bf16.mxu1 %v1104_v28 }
  0xe9   :  { %v272_v36 = vmul.f32 %v917_v21, %v267_v32  ;;  %v197_v37 = vadd.f32 %v903_v8, %v196_v35  ;;  %v285_v38 = vsel %vm141_vm1, %v1262_v33, 0.0 }
  0xea   :  { %286 = vadd.xlane.f32.xlu0 %v285_v38  ;;  %v1029_v39 = vpop.f32.mrf.mxu1 }
  0xeb   :  { %v268_v40 = vmul.f32 %v915_v18, %v197_v37  ;;  %v1266_v41 = vadd.f32 %v970_v34, %v272_v36 }
  0xec   :  { %v201_v43 = vpop.f32.mrf.mxu1 }
  0xed   :  { %v273_v45 = vmul.f32 %v917_v21, %v268_v40  ;;  %v202_v46 = vadd.f32 %v903_v8, %v201_v43  ;;  %v288_v47 = vsel %vm141_vm1, %v1266_v41, 0.0 }
  0xee   :  { %289 = vadd.xlane.f32.xlu1 %v288_v47  ;;  %v1032_v48 = vpop.f32.mrf.mxu1 }
  0xef   :  { %v269_v49 = vmul.f32 %v915_v18, %v202_v46  ;;  %v1273_v50 = vadd.f32 %v971_v42, %v273_v45  ;;  %v918_v46 = vld [vmem:[%s1528_s8] ss:$0 sm:$0xff] }
  0xf0   :  { %v204_v52 = vpop.f32.mrf.mxu1 }
  0xf1   :  { %v274_v53 = vmul.f32 %v917_v21, %v269_v49  ;;  %v291_v54 = vsel %vm141_vm1, %v1273_v50, 0.0  ;;  %v1049_v21 = vld [vmem:[%s1527_s16 + $0x24] ss:$8 sps:$4 sm:$0xff]   ;;  %v919_v49 = vld [vmem:[%s1529_s9] ss:$0 sm:$0xff] }
  0xf2   :  { %292 = vadd.xlane.f32.xlu1 %v291_v54  ;;  %v1033_v55 = vpop.f32.mrf.mxu1  ;;  %505 = vmatprep.subr.bf16.mxu1 %v1049_v21  ;;  %v921_v54 = vld [vmem:[%s1531_s13] ss:$0 sm:$0xff] }
  0xf3   :  { %v1277_v56 = vadd.f32 %v274_v53, %v264_v51  ;;  %506 = vmatpush1.bf16.msra.mxu1 %v1047_v22  ;;  %v920_v51 = vld [vmem:[%s1530_s11] ss:$0 sm:$0xff] }
  0xf4   :  { %507 = vmatprep.subr.bf16.mxu1 %v1052_v23 }
  0xf5   :  { %v294_v57 = vsel %vm141_vm1, %v1277_v56, 0.0 }
  0xf6   :  { %295 = vadd.xlane.f32.xlu0 %v294_v57 }
  0xf7   :  { %508 = vmatpush1.bf16.msra.mxu1 %v1050_v25 }
  0xf8   :  { %509 = vmatprep.subr.bf16.mxu1 %v1055_v26 }
  0xfb   :  { %510 = vmatpush1.bf16.msra.mxu1 %v1053_v27  ;;  %v1057_v27 = vld [vmem:[%s1534_s18 + $0x38] sm:$0xff]  }
 0x16f   :  { %v284_v58 = vpop.xlane.xlu0 %283 }
 0x170   :  { %v298_v59 = vmul.f32 0.015625, %v284_v58  ;;  %v408_v58 = vadd.f32 1.0, %v920_v51 }
 0x172   :  { %v1282_v60 = vsub.f32 %v1255_v24, %v298_v59 }
 0x173   :  { %v287_v61 = vpop.xlane.xlu0 %286 }
 0x174   :  { %v299_v62 = vmul.f32 0.015625, %v287_v61  ;;  %v308_v63 = vmul.f32 %v1282_v60, %v1282_v60 }
 0x176   :  { %v1287_v0 = vsub.f32 %v1262_v33, %v299_v62  ;;  %v313_v1 = vsel %vm141_vm1, %v308_v63, 0.0 }
 0x177   :  { %v290_v2 = vpop.xlane.xlu1 %289  ;;  %314 = vadd.xlane.f32.xlu1 %v313_v1 }
 0x178   :  { %v300_v3 = vmul.f32 0.015625, %v290_v2  ;;  %v309_v4 = vmul.f32 %v1287_v0, %v1287_v0  ;;  %v922_v2 = vld [vmem:[%s1532_s10] ss:$0 sm:$0xff] }
 0x17a   :  { %v1293_v5 = vsub.f32 %v1266_v41, %v300_v3  ;;  %v316_v6 = vsel %vm141_vm1, %v309_v4, 0.0  ;;  %v923_v3 = vld [vmem:[%s1533_s12] ss:$0 sm:$0xff] }
 0x17b   :  { %v293_v7 = vpop.xlane.xlu1 %292  ;;  %317 = vadd.xlane.f32.xlu0 %v316_v6 }
 0x17c   :  { %v301_v8 = vmul.f32 0.015625, %v293_v7  ;;  %v310_v9 = vmul.f32 %v1293_v5, %v1293_v5 }
 0x17e   :  { %v1299_v10 = vsub.f32 %v1273_v50, %v301_v8  ;;  %v319_v11 = vsel %vm141_vm1, %v310_v9, 0.0 }
 0x17f   :  { %320 = vadd.xlane.f32.xlu1 %v319_v11  ;;  %v296_v12 = vpop.xlane.xlu0 %295 }
 0x180   :  { %v302_v13 = vmul.f32 0.015625, %v296_v12  ;;  %v311_v14 = vmul.f32 %v1299_v10, %v1299_v10 }
 0x182   :  { %v1305_v15 = vsub.f32 %v1277_v56, %v302_v13  ;;  %v322_v16 = vsel %vm141_vm1, %v311_v14, 0.0 }
 0x183   :  { %323 = vadd.xlane.f32.xlu0 %v322_v16 }
 0x184   :  { %v312_v17 = vmul.f32 %v1305_v15, %v1305_v15 }
 0x186   :  { %v325_v18 = vsel %vm141_vm1, %v312_v17, 0.0 }
 0x187   :  { %326 = vadd.xlane.f32.xlu1 %v325_v18 }
 0x200   :  { %v315_v29 = vpop.xlane.xlu1 %314 }
 0x201   :  { %v328_v30 = vmul.f32 0.015625, %v315_v29  ;;  %v1058_v29 = vld [vmem:[%s1534_s18 + $0x70] sm:$0xff]  }
 0x203   :  { %v333_v31 = vadd.f32 1e-05, %v328_v30  ;;  %v1060_v30 = vld [vmem:[%s1534_s18 + $0x68] sm:$0xff]  }
 0x204   :  { %v318_v32 = vpop.xlane.xlu0 %317 }
 0x205   :  { %1072 = vrsqrt.f32 %v333_v31  ;;  %v329_v34 = vmul.f32 0.015625, %v318_v32  ;;  %v1061_v31 = vld [vmem:[%s1534_s18 + $0x28] sm:$0xff]   ;;  %v1062_v32 = vld [vmem:[%s1534_s18 + $0x60] sm:$0xff]  }
 0x207   :  { %v334_v35 = vadd.f32 1e-05, %v329_v34  ;;  %v1063_v34 = vld [vmem:[%s1534_s18 + $0x20] sm:$0xff]  }
 0x208   :  { %v321_v36 = vpop.xlane.xlu1 %320 }
 0x209   :  { %1074 = vrsqrt.f32 %v334_v35  ;;  %v330_v37 = vmul.f32 0.015625, %v321_v36  ;;  %v1064_v35 = vld [vmem:[%s1534_s18 + $0x58] sm:$0xff]  }
 0x20a   :  { %v1065_v36 = vld [vmem:[%s1534_s18 + $0x18] sm:$0xff]  }
 0x20b   :  { %v335_v38 = vadd.f32 1e-05, %v330_v37  ;;  %v1066_v37 = vld [vmem:[%s1534_s18 + $0x50] sm:$0xff]  }
 0x20c   :  { %v324_v39 = vpop.xlane.xlu0 %323 }
 0x20d   :  { %1076 = vrsqrt.f32 %v335_v38  ;;  %v331_v40 = vmul.f32 0.015625, %v324_v39  ;;  %v1067_v38 = vld [vmem:[%s1534_s18 + $0x10] sm:$0xff]   ;;  %v1068_v39 = vld [vmem:[%s1534_s18 + $0x48] sm:$0xff]  }
 0x20f   :  { %v336_v42 = vadd.f32 1e-05, %v331_v40  ;;  %v1069_v40 = vld [vmem:[%s1534_s18 + $0x8] sm:$0xff]  }
 0x210   :  { %v327_v43 = vpop.xlane.xlu1 %326 }
 0x211   :  { %1078 = vrsqrt.f32 %v336_v42  ;;  %v332_v44 = vmul.f32 0.015625, %v327_v43  ;;  %v1070_v42 = vld [vmem:[%s1534_s18 + $0x40] sm:$0xff]  }
 0x212   :  { %v1073_v45 = vpop.eup %1072  ;;  %v1071_v43 = vld [vmem:[%s1534_s18] sm:$0xff]  }
 0x213   :  { %v343_v47 = vmul.f32 %v1073_v45, %v1282_v60  ;;  %v337_v48 = vadd.f32 1e-05, %v332_v44  ;;  %v409_v60 = vadd.f32 1.0, %v921_v54  ;;  %v436_v44 = vlaneseq }
 0x215   :  { %v354_v52 = vmul.f32 %v918_v46, %v343_v47  ;;  %1080 = vrsqrt.f32 %v337_v48  ;;  %v437_v45 = vshrl.u32 %v436_v44, 7  ;;  %v434_v47 = vld [vmem:[%s1535_s17] sm:$0x3] }
 0x216   :  { %v1075_v53 = vpop.eup %1074 }
 0x217   :  { %v365_v55 = vadd.f32 %v919_v49, %v354_v52  ;;  %v344_v57 = vmul.f32 %v1075_v53, %v1287_v0  ;;  %v442_v48 = vsub.s32 1, %v437_v45 }
 0x219   :  { %v355_v59 = vmul.f32 %v918_v46, %v344_v57  ;;  %v413_v1 = vmul.f32 %v408_v58, %v365_v55  ;;  %v443_v51 = vrot.slane %v434_v47, %v442_v48 }
 0x21a   :  { %v1077_v61 = vpop.eup %1076 }
 0x21b   :  { %v366_v62 = vadd.f32 %v919_v49, %v355_v59  ;;  %v345_v63 = vmul.f32 %v1077_v61, %v1293_v5  ;;  %v418_v8 = vadd.f32 %v922_v2, %v413_v1 }
 0x21d   :  { %v414_v4 = vmul.f32 %v409_v60, %v366_v62  ;;  %v356_v6 = vmul.f32 %v918_v46, %v345_v63 }
 0x21e   :  { %v1079_v7 = vpop.eup %1078 }
 0x21f   :  { %v346_v0 = vmul.f32 %v1079_v7, %v1299_v10  ;;  %v419_v9 = vadd.f32 %v923_v3, %v414_v4  ;;  %v367_v11 = vadd.f32 %v919_v49, %v356_v6 }
 0x221   :  { %v423_v12 = vpack.c.bf16 %v419_v9, %v418_v8  ;;  %v357_v13 = vmul.f32 %v918_v46, %v346_v0  ;;  %v415_v17 = vmul.f32 %v409_v60, %v367_v11 }
 0x222   :  { %v1081_v5 = vpop.eup %1080 }
 0x223   :  { %v347_v14 = vmul.f32 %v1081_v5, %v1305_v15  ;;  %932 = vmatmul.mubr.msk.bf16.vlgmr.msra.gmra.mxu1 %vm141_vm1, %v423_v12  ;;  %v368_v16 = vadd.f32 %v919_v49, %v357_v13  ;;  %v420_v20 = vadd.f32 %v923_v3, %v415_v17  ;;  %v1056_v15 = vld [vmem:[%s1534_s18 + $0x78] sm:$0xff]  }
 0x224   :  { %537 = vmatprep.mubr.bf16.mxu1 %v1104_v28  ;;  %980 = vmatprep.subr.bf16.mxu0 %v1056_v15 }
 0x225   :  { %v416_v18 = vmul.f32 %v409_v60, %v368_v16  ;;  %v358_v19 = vmul.f32 %v918_v46, %v347_v14  ;;  %981 = vmatpush3.bf16.msra.mxu0 %v1057_v27  ;;  %v438_v46 = vsub.s32 0, %v437_v45 }
 0x226   :  { %982 = vmatprep.subr.bf16.mxu0 %v1058_v29 }
 0x227   :  { %v421_v21 = vadd.f32 %v923_v3, %v416_v18  ;;  %v369_v22 = vadd.f32 %v919_v49, %v358_v19  ;;  %v439_v49 = vrot.slane %v434_v47, %v438_v46 }
 0x229   :  { %v424_v10 = vpack.c.bf16 %v421_v21, %v420_v20  ;;  %v417_v23 = vmul.f32 %v409_v60, %v369_v22 }
 0x22b   :  { %933 = vmatmul.mubr.msk.bf16.gmra.mxu1 %vm141_vm1, %v424_v10  ;;  %v422_v25 = vadd.f32 %v923_v3, %v417_v23 }
 0x22c   :  { %547 = vmatprep.mubr.bf16.mxu1 %v1104_v28  ;;  %v1059_v28 = vld [vmem:[%s1534_s18 + $0x30] sm:$0xff]  }
 0x22d   :  { %v425_v26 = vpack.c.bf16 %v422_v25, %v422_v25  ;;  %983 = vmatpush3.bf16.msra.mxu0 %v1059_v28 }
 0x22e   :  { %984 = vmatprep.subr.bf16.mxu0 %v1060_v30 }
 0x231   :  { %985 = vmatpush3.bf16.msra.mxu0 %v1061_v31 }
 0x232   :  { %986 = vmatprep.subr.bf16.mxu0 %v1062_v32 }
 0x233   :  { %934 = vmatmul.mubr.msk.bf16.gmra.mxu1 %vm141_vm1, %v425_v26 }
 0x235   :  { %987 = vmatpush3.bf16.msra.mxu0 %v1063_v34 }
 0x236   :  { %988 = vmatprep.subr.bf16.mxu0 %v1064_v35 }
 0x239   :  { %989 = vmatpush3.bf16.msra.mxu0 %v1065_v36 }
 0x23a   :  { %990 = vmatprep.subr.bf16.mxu0 %v1066_v37 }
 0x23d   :  { %991 = vmatpush3.bf16.msra.mxu0 %v1067_v38 }
 0x23e   :  { %992 = vmatprep.subr.bf16.mxu0 %v1068_v39 }
 0x241   :  { %993 = vmatpush3.bf16.msra.mxu0 %v1069_v40 }
 0x242   :  { %994 = vmatprep.subr.bf16.mxu0 %v1070_v42 }
 0x245   :  { %995 = vmatpush3.bf16.msra.mxu0 %v1071_v43 }
 0x2e3   :  { %v529_v52 = vpop.f32.mrf.mxu1 }
 0x2e4   :  { %v1415_v53 = vadd.f32 %v529_v52, %v439_v49 }
 0x2e5   :  { %v531_v54 = vpop.f32.mrf.mxu1 }
 0x2e6   :  { %v556_v55 = vmul.f32 %v1415_v53, %v1415_v53  ;;  %v1419_v57 = vadd.f32 %v531_v54, %v443_v51 }
 0x2e7   :  { %v533_v58 = vpop.f32.mrf.mxu1 }
 0x2e8   :  { %v566_v59 = vmul.f32 %v556_v55, %v1415_v53  ;;  %v557_v60 = vmul.f32 %v1419_v57, %v1419_v57  ;;  %v1424_v61 = vadd.f32 %v533_v58, %v439_v49 }
 0x2e9   :  { %v535_v62 = vpop.f32.mrf.mxu1 }
 0x2ea   :  { %v576_v63 = vmul.f32 0.044715, %v566_v59  ;;  %v567_v1 = vmul.f32 %v557_v60, %v1419_v57  ;;  %v558_v2 = vmul.f32 %v1424_v61, %v1424_v61  ;;  %v1429_v3 = vadd.f32 %v535_v62, %v443_v51 }
 0x2eb   :  { %v539_v4 = vpop.f32.mrf.mxu1 }
 0x2ec   :  { %v586_v6 = vadd.f32 %v576_v63, %v1415_v53  ;;  %v577_v7 = vmul.f32 0.044715, %v567_v1  ;;  %v568_v0 = vmul.f32 %v558_v2, %v1424_v61  ;;  %v559_v8 = vmul.f32 %v1429_v3, %v1429_v3 }
 0x2ed   :  { %v1435_v9 = vadd.f32 %v539_v4, %v439_v49  ;;  %v541_v11 = vpop.f32.mrf.mxu1 }
 0x2ee   :  { %v596_v12 = vmul.f32 0.7978846, %v586_v6  ;;  %v587_v13 = vadd.f32 %v577_v7, %v1419_v57  ;;  %v578_v5 = vmul.f32 0.044715, %v568_v0  ;;  %v569_v14 = vmul.f32 %v559_v8, %v1429_v3 }
 0x2ef   :  { %v560_v16 = vmul.f32 %v1435_v9, %v1435_v9  ;;  %v1441_v17 = vadd.f32 %v541_v11, %v443_v51  ;;  %v543_v18 = vpop.f32.mrf.mxu1 }
 0x2f0   :  { %v588_v19 = vadd.f32 %v578_v5, %v1424_v61  ;;  %v579_v20 = vmul.f32 0.044715, %v569_v14  ;;  %v1444_v21 = vadd.f32 %v543_v18, %v439_v49  ;;  %1082 = vtanh.f32 %v596_v12 }
 0x2f1   :  { %v570_v22 = vmul.f32 %v560_v16, %v1435_v9  ;;  %v561_v10 = vmul.f32 %v1441_v17, %v1441_v17  ;;  %v545_v23 = vpop.f32.mrf.mxu1  ;;  %v597_v25 = vmul.f32 0.7978846, %v587_v13 }
 0x2f2   :  { %v598_v26 = vmul.f32 0.7978846, %v588_v19  ;;  %v589_v15 = vadd.f32 %v579_v20, %v1429_v3  ;;  %v562_v27 = vmul.f32 %v1444_v21, %v1444_v21  ;;  %v1452_v29 = vadd.f32 %v545_v23, %v443_v51 }
 0x2f3   :  { %v580_v28 = vmul.f32 0.044715, %v570_v22  ;;  %v571_v30 = vmul.f32 %v561_v10, %v1441_v17  ;;  %v549_v31 = vpop.f32.mrf.mxu1  ;;  %1084 = vtanh.f32 %v597_v25 }
 0x2f4   :  { %1086 = vtanh.f32 %v598_v26  ;;  %v572_v32 = vmul.f32 %v562_v27, %v1444_v21  ;;  %v563_v34 = vmul.f32 %v1452_v29, %v1452_v29  ;;  %v1458_v35 = vadd.f32 %v549_v31, %v439_v49 }
 0x2f5   :  { %v590_v36 = vadd.f32 %v580_v28, %v1435_v9  ;;  %v581_v37 = vmul.f32 0.044715, %v571_v30  ;;  %v551_v38 = vpop.f32.mrf.mxu1  ;;  %v599_v39 = vmul.f32 0.7978846, %v589_v15 }
 0x2f6   :  { %v582_v40 = vmul.f32 0.044715, %v572_v32  ;;  %v573_v42 = vmul.f32 %v563_v34, %v1452_v29  ;;  %v564_v43 = vmul.f32 %v1458_v35, %v1458_v35  ;;  %v1464_v44 = vadd.f32 %v551_v38, %v443_v51 }
 0x2f7   :  { %v600_v45 = vmul.f32 0.7978846, %v590_v36  ;;  %v591_v46 = vadd.f32 %v581_v37, %v1441_v17  ;;  %v553_v47 = vpop.f32.mrf.mxu1  ;;  %1088 = vtanh.f32 %v599_v39 }
 0x2f8   :  { %v592_v48 = vadd.f32 %v582_v40, %v1444_v21  ;;  %v583_v49 = vmul.f32 0.044715, %v573_v42  ;;  %v574_v52 = vmul.f32 %v564_v43, %v1458_v35  ;;  %v565_v54 = vmul.f32 %v1464_v44, %v1464_v44 }
 0x2f9   :  { %1090 = vtanh.f32 %v600_v45  ;;  %v601_v55 = vmul.f32 0.7978846, %v591_v46  ;;  %v554_v58 = vpop.f32.mrf.mxu1 }
 0x2fa   :  { %v602_v59 = vmul.f32 0.7978846, %v592_v48  ;;  %v593_v51 = vadd.f32 %v583_v49, %v1452_v29  ;;  %v584_v60 = vmul.f32 0.044715, %v574_v52  ;;  %v575_v62 = vmul.f32 %v565_v54, %v1464_v44 }
 0x2fb   :  { %1092 = vtanh.f32 %v601_v55 }
 0x2fc   :  { %1094 = vtanh.f32 %v602_v59  ;;  %v603_v63 = vmul.f32 0.7978846, %v593_v51  ;;  %v594_v1 = vadd.f32 %v584_v60, %v1458_v35  ;;  %v585_v2 = vmul.f32 0.044715, %v575_v62  ;;  %v952_v62 = vld [vmem:[%s1537_s14] ss:$0 sm:$0xff] }
 0x2fd   :  { %v1083_v4 = vpop.eup %1082 }
 0x2fe   :  { %1096 = vtanh.f32 %v603_v63  ;;  %v604_v6 = vmul.f32 0.7978846, %v594_v1  ;;  %v595_v7 = vadd.f32 %v585_v2, %v1464_v44  ;;  %v616_v13 = vadd.f32 1.0, %v1083_v4 }
 0x300   :  { %v1085_v0 = vpop.eup %1084  ;;  %1098 = vtanh.f32 %v604_v6  ;;  %v605_v8 = vmul.f32 0.7978846, %v595_v7  ;;  %v626_v22 = vmul.f32 0.5, %v616_v13 }
 0x301   :  { %v1087_v11 = vpop.eup %1086  ;;  %v617_v12 = vadd.f32 1.0, %v1085_v0 }
 0x302   :  { %1100 = vtanh.f32 %v605_v8  ;;  %v618_v5 = vadd.f32 1.0, %v1087_v11  ;;  %v636_v30 = vmul.f32 %v626_v22, %v1415_v53 }
 0x303   :  { %v627_v19 = vmul.f32 0.5, %v617_v12 }
 0x304   :  { %v1089_v14 = vpop.eup %1088  ;;  %v628_v16 = vmul.f32 0.5, %v618_v5 }
 0x305   :  { %v619_v18 = vadd.f32 1.0, %v1089_v14  ;;  %v637_v15 = vmul.f32 %v627_v19, %v1419_v57 }
 0x306   :  { %v1091_v20 = vpop.eup %1090  ;;  %v638_v25 = vmul.f32 %v628_v16, %v1424_v61 }
 0x307   :  { %v629_v10 = vmul.f32 0.5, %v619_v18  ;;  %v620_v31 = vadd.f32 1.0, %v1091_v20 }
 0x308   :  { %v1093_v23 = vpop.eup %1092  ;;  %v646_v38 = vpack.c.bf16 %v638_v25, %v636_v30 }
 0x309   :  { %v1095_v26 = vpop.eup %1094  ;;  %v639_v27 = vmul.f32 %v629_v10, %v1429_v3  ;;  %v621_v28 = vadd.f32 1.0, %v1093_v23  ;;  %v630_v43 = vmul.f32 0.5, %v620_v31 }
 0x30a   :  { %v622_v32 = vadd.f32 1.0, %v1095_v26 }
 0x30b   :  { %v1097_v34 = vpop.eup %1096  ;;  %v647_v36 = vpack.c.bf16 %v639_v27, %v637_v15  ;;  %v631_v37 = vmul.f32 0.5, %v621_v28  ;;  %v640_v49 = vmul.f32 %v630_v43, %v1435_v9 }
 0x30c   :  { %v623_v39 = vadd.f32 1.0, %v1097_v34  ;;  %v632_v40 = vmul.f32 0.5, %v622_v32 }
 0x30d   :  { %v1099_v42 = vpop.eup %1098  ;;  %819 = vmatprep.mubr.bf16.mxu0 %v647_v36  ;;  %v641_v57 = vmul.f32 %v631_v37, %v1441_v17 }
 0x30e   :  { %820 = vmatmul.mubr.bf16.vlgmr.msra.gmra.mxu0 %v646_v38  ;;  %v633_v61 = vmul.f32 0.5, %v623_v39  ;;  %v642_v53 = vmul.f32 %v632_v40, %v1444_v21  ;;  %v624_v47 = vadd.f32 1.0, %v1099_v42  ;;  %v935_v21 = vld [vmem:[%s1536_s19] ss:$0 sm:$0xff] }
 0x30f   :  { %v1101_v45 = vpop.eup %1100 }
 0x310   :  { %v643_v3 = vmul.f32 %v633_v61, %v1452_v29  ;;  %v625_v46 = vadd.f32 1.0, %v1101_v45  ;;  %v648_v54 = vpack.c.bf16 %v642_v53, %v640_v49  ;;  %v634_v58 = vmul.f32 0.5, %v624_v47 }
 0x312   :  { %v649_v48 = vpack.c.bf16 %v643_v3, %v641_v57  ;;  %v635_v52 = vmul.f32 0.5, %v625_v46  ;;  %v644_v17 = vmul.f32 %v634_v58, %v1458_v35  ;;  %v953_v35 = vld [vmem:[%s1538_s15] ss:$0 sm:$0xff] }
 0x314   :  { %827 = vmatprep.mubr.bf16.mxu0 %v649_v48  ;;  %v645_v55 = vmul.f32 %v635_v52, %v1464_v44  ;;  %v650_v51 = vpack.c.bf16 %v644_v17, %v644_v17 }
 0x316   :  { %828 = vmatmul.mubr.bf16.gmra.mxu0 %v648_v54  ;;  %v651_v59 = vpack.c.bf16 %v645_v55, %v645_v55 }
 0x318   :  { %835 = vmatprep.mubr.bf16.mxu0 %v651_v59 }
 0x31e   :  { %836 = vmatmul.mubr.bf16.gmra.mxu0 %v650_v51 }
 0x3ce   :  { %v996_v29 = vpop.f32.mrf.mxu0 }
 0x3d0   :  { %v997_v60 = vpop.f32.mrf.mxu0 }
 0x3d1   :  { %v998_v9 = vadd.f32 %v997_v60, %v996_v29 }
 0x3d2   :  { %v999_v44 = vpop.f32.mrf.mxu0 }
 0x3d3   :  { %v822_v63 = vadd.f32 %v998_v9, %v935_v21 }
 0x3d4   :  { %v1000_v1 = vpop.f32.mrf.mxu0 }
 0x3d5   :  { %v862_v2 = vmul.f32 %v952_v62, %v822_v63  ;;  %v1001_v4 = vadd.f32 %v1000_v1, %v999_v44 }
 0x3d6   :  { %v1002_v6 = vpop.f32.mrf.mxu0 }
 0x3d7   :  { %v867_v7 = vadd.f32 %v862_v2, %v1255_v24  ;;  %v825_v0 = vadd.f32 %v1001_v4, %v935_v21 }
 0x3d8   :  { %v1003_v8 = vpop.f32.mrf.mxu0 }
 0x3d9   :  { %v959_v11 = vpack.c.bf16 %v867_v7, %v867_v7  ;;  %v863_v12 = vmul.f32 %v953_v35, %v825_v0  ;;  %v1004_v13 = vadd.f32 %v1003_v8, %v1002_v6 }
 0x3da   :  { %v1005_v5 = vpop.f32.mrf.mxu0 }
 0x3db   :  { %894 = vst.msk [vmem:[%s1539_s20] sm:$0xf] %vm893_vm2, %v959_v11  ;;  %v868_v14 = vadd.f32 %v863_v12, %v1262_v33  ;;  %v830_v16 = vadd.f32 %v1004_v13, %v935_v21 }
 0x3dc   :  { %v1006_v18 = vpop.f32.mrf.mxu0 }
 0x3dd   :  { %v960_v19 = vpack.c.bf16 %v868_v14, %v868_v14  ;;  %v864_v20 = vmul.f32 %v953_v35, %v830_v16  ;;  %v1007_v22 = vadd.f32 %v1006_v18, %v1005_v5 }
 0x3de   :  { %v1008_v24 = vpop.f32.mrf.mxu0 }
 0x3df   :  { %895 = vst.msk [vmem:[%s1539_s20 + $0x4] sm:$0xf] %vm893_vm2, %v960_v19  ;;  %v869_v10 = vadd.f32 %v864_v20, %v1266_v41  ;;  %v833_v23 = vadd.f32 %v1007_v22, %v935_v21 }
 0x3e0   :  { %v1009_v25 = vpop.f32.mrf.mxu0 }
 0x3e1   :  { %v961_v26 = vpack.c.bf16 %v869_v10, %v869_v10  ;;  %v865_v15 = vmul.f32 %v953_v35, %v833_v23  ;;  %v1010_v27 = vadd.f32 %v1009_v25, %v1008_v24 }
 0x3e2   :  { %v1011_v28 = vpop.f32.mrf.mxu0 }
 0x3e3   :  { %896 = vst.msk [vmem:[%s1539_s20 + $0x8] sm:$0xf] %vm893_vm2, %v961_v26  ;;  %v870_v33 = vadd.f32 %v865_v15, %v1273_v50  ;;  %v838_v30 = vadd.f32 %v1010_v27, %v935_v21 }
 0x3e4   :  { %v1012_v31 = vpop.f32.mrf.mxu0 }
 0x3e5   :  { %v962_v32 = vpack.c.bf16 %v870_v33, %v870_v33  ;;  %v866_v34 = vmul.f32 %v953_v35, %v838_v30 }
 0x3e7   :  { %897 = vst.msk [vmem:[%s1539_s20 + $0xc] sm:$0xf] %vm893_vm2, %v962_v32  ;;  %v871_v41 = vadd.f32 %v866_v34, %v1277_v56 }
 0x3e9   :  { %v963_v36 = vpack.c.bf16 %v871_v41, %v871_v41 }
 0x3eb   :  { %898 = vst.msk [vmem:[%s1539_s20 + $0x10] sm:$0xf] %vm893_vm2, %v963_v36 }

// kernel: diffusion_transformer_forward.11
= control target key start
LH: loop header
LB: loop body
LE: loop exit
PB: predicated region body
PF: predicated region fallthrough
CT: control target
= control target key end

     0   :  { %vm65_vm0 = vcmask 523264   ;;  %v1485_v46 = vmov 0   ;;  %s1486_s21 = smov 64   ;;  %vm380_vm1 = vcmask 261120   ;;  %s1488_s22 = smov 96   ;;  %vm637_vm2 = vcmask 130048   ;;  %s2333_s0 = inlined_call_operand.vmem [shape: bf16[1,40,64], index: 0, kind: input, shape index: {}]   ;;  %s2334_s7 = inlined_call_operand.vmem [shape: bf16[64,192], index: 7, kind: input, shape index: {}]   ;;  %s2335_s1 = inlined_call_operand.vmem [shape: f32[1,64], index: 1, kind: input, shape index: {}]   ;;  %s2336_s2 = inlined_call_operand.vmem [shape: f32[1,64], index: 2, kind: input, shape index: {}]   ;;  %s2337_s6 = inlined_call_operand.vmem [shape: f32[1,1,64], index: 6, kind: input, shape index: {}]   ;;  %s2338_s4 = inlined_call_operand.vmem [shape: f32[1,1,64], index: 4, kind: input, shape index: {}]   ;;  %s2339_s5 = inlined_call_operand.vmem [shape: f32[1,1,64], index: 5, kind: input, shape index: {}]   ;;  %s2340_s3 = inlined_call_operand.vmem [shape: f32[1,1,64], index: 3, kind: input, shape index: {}]   ;;  %s2341_s8 = inlined_call_operand.vmem [shape: f32[1,192], index: 8, kind: input, shape index: {}]   ;;  %s2342_s13 = inlined_call_operand.vmem [shape: f32[1,32], index: 13, kind: input, shape index: {}]   ;;  %s2343_s11 = inlined_call_operand.vmem [shape: f32[1,32], index: 11, kind: input, shape index: {}]   ;;  %s2344_s12 = inlined_call_operand.vmem [shape: f32[1,32], index: 12, kind: input, shape index: {}]   ;;  %s2345_s14 = inlined_call_operand.vmem [shape: f32[1,32], index: 14, kind: input, shape index: {}]   ;;  %s2346_s9 = inlined_call_operand.vmem [shape: f32[40,32], index: 9, kind: input, shape index: {}]   ;;  %s2347_s10 = inlined_call_operand.vmem [shape: f32[40,32], index: 10, kind: input, shape index: {}]   ;;  %s2348_s15 = inlined_call_operand.vmem [shape: bf16[1,40,64], index: 15, kind: output, shape index: {0}]   ;;  %s2349_s16 = inlined_call_operand.vmem [shape: bf16[1,40,128], index: 16, kind: output, shape index: {1}]  }
   0x1   :  { %2354 = sst [smem:[#allocation5_spill]] %s2333_s0  ;;  %v1423_v38 = vld [vmem:[%s2334_s7 + $0x34] ss:$8 sps:$4 sm:$0xff]   ;;  %v1425_v39 = vld [vmem:[%s2334_s7 + $0x30] ss:$8 sps:$4 sm:$0xff]   ;;  %349 = vmatprep.mubr.bf16.mxu1 %v1485_v46  ;;  %339 = vmatprep.mubr.bf16.mxu0 %v1485_v46  ;;  %s1489_s27 = smov 112  }
   0x2   :  { %s2355_s23 = sld [smem:[#allocation5_spill]]  ;;  %1372 = vmatprep.subr.bf16.mxu1 %v1423_v38  ;;  %315 = vmatprep.subr.bf16.mxu0 %v1423_v38  ;;  %v1426_v40 = vld [vmem:[%s2334_s7 + $0x24] ss:$8 sps:$4 sm:$0xff]   ;;  %v1428_v41 = vld [vmem:[%s2334_s7 + $0x20] ss:$8 sps:$4 sm:$0xff]   ;;  %s1492_s29 = smov 80  }
   0x3   :  { %1376 = vmatpush1.bf16.msra.mxu1 %v1425_v39  ;;  %316 = vmatpush1.bf16.msra.mxu0 %v1425_v39  ;;  %v1429_v42 = vld [vmem:[%s2334_s7 + $0x14] ss:$8 sps:$4 sm:$0xff]   ;;  %v1431_v43 = vld [vmem:[%s2334_s7 + $0x10] ss:$8 sps:$4 sm:$0xff]   ;;  %v1432_v44 = vld [vmem:[%s2334_s7 + $0x4] ss:$8 sps:$4 sm:$0xff]   ;;  %v248_v39 = vlaneseq }
   0x4   :  { %1373 = vmatprep.subr.bf16.mxu1 %v1426_v40  ;;  %317 = vmatprep.subr.bf16.mxu0 %v1426_v40  ;;  %v1434_v45 = vld [vmem:[%s2334_s7] ss:$8 sps:$4 sm:$0xff]   ;;  %s1491_s7 = smov 48   ;;  %vm1201_vm3 = vcmask 519168  }
   0x5   :  { %v1311_v63 = vld [vmem:[%s2335_s1] ss:$0 sm:$0xff]  ;;  %v249_v40 = vshrl.u32 %v248_v39, 7 }
   0x7   :  { %1377 = vmatpush1.bf16.msra.mxu1 %v1428_v41  ;;  %318 = vmatpush1.bf16.msra.mxu0 %v1428_v41  ;;  %v250_v41 = vsub.s32 0, %v249_v40 }
   0x8   :  { %v1370_v0 = vld [vmem:[%s2355_s23 + $0x8] sm:$0xff]   ;;  %v1353_v1 = vld [vmem:[%s2355_s23] sm:$0xff]   ;;  %v57_v5 = vld [vmem:[%s2355_s23 + $0x10] sm:$0xf]  ;;  %1374 = vmatprep.subr.bf16.mxu1 %v1429_v42  ;;  %319 = vmatprep.subr.bf16.mxu0 %v1429_v42 }
   0x9   :  { %v1358_v2 = vunpack.c.l.bf16 %v1370_v0  ;;  %v1359_v3 = vunpack.c.h.bf16 %v1370_v0  ;;  %v1354_v4 = vunpack.c.l.bf16 %v1353_v1  ;;  %v1355_v6 = vunpack.c.h.bf16 %v1353_v1  ;;  %v1312_v1 = vld [vmem:[%s2336_s2] ss:$0 sm:$0xff] }
   0xa   :  { %v62_v10 = vunpack.c.l.bf16 %v57_v5  ;;  %v246_v42 = vld [vmem:[%s2341_s8] sm:$0x3]  ;;  %s1487_s8 = smov 32  }
   0xb   :  { %v72_v7 = vsel %vm65_vm0, %v1358_v2, 0.0  ;;  %v66_v8 = vsel %vm65_vm0, %v1354_v4, 0.0  ;;  %v75_v9 = vsel %vm65_vm0, %v1359_v3, 0.0  ;;  %v69_v11 = vsel %vm65_vm0, %v1355_v6, 0.0  ;;  %1378 = vmatpush1.bf16.msra.mxu1 %v1431_v43  ;;  %320 = vmatpush1.bf16.msra.mxu0 %v1431_v43 }
   0xc   :  { %73 = vadd.xlane.f32.xlu0 %v72_v7  ;;  %67 = vadd.xlane.f32.xlu1 %v66_v8  ;;  %v78_v12 = vsel %vm65_vm0, %v62_v10, 0.0  ;;  %v254_v43 = vsub.s32 1, %v249_v40 }
   0xd   :  { %1375 = vmatprep.subr.bf16.mxu1 %v1432_v44  ;;  %321 = vmatprep.subr.bf16.mxu0 %v1432_v44  ;;  %v251_v44 = vrot.slane %v246_v42, %v250_v41 }
   0xf   :  { %1379 = vmatpush1.bf16.msra.mxu1 %v1434_v45  ;;  %322 = vmatpush1.bf16.msra.mxu0 %v1434_v45  ;;  %v1673_v45 = vrot.slane %v246_v42, %v254_v43 }
  0x10   :  { %76 = vadd.xlane.f32.xlu0 %v75_v9  ;;  %70 = vadd.xlane.f32.xlu1 %v69_v11 }
  0x14   :  { %79 = vadd.xlane.f32.xlu0 %v78_v12 }
  0x95   :  { %v74_v13 = vpop.xlane.xlu0 %73  ;;  %v68_v14 = vpop.xlane.xlu1 %67 }
  0x96   :  { %v84_v15 = vmul.f32 0.015625, %v74_v13  ;;  %v82_v16 = vmul.f32 0.015625, %v68_v14 }
  0x98   :  { %v1592_v17 = vsub.f32 %v1358_v2, %v84_v15  ;;  %v1594_v18 = vsub.f32 %v1354_v4, %v82_v16  ;;  %v1314_v2 = vld [vmem:[%s2337_s6] ss:$0 sm:$0xff] }
  0x99   :  { %v77_v19 = vpop.xlane.xlu0 %76  ;;  %v71_v20 = vpop.xlane.xlu1 %70  ;;  %v221_v8 = vadd.f32 1.0, %v1314_v2 }
  0x9a   :  { %v85_v21 = vmul.f32 0.015625, %v77_v19  ;;  %v94_v22 = vmul.f32 %v1592_v17, %v1592_v17  ;;  %v83_v23 = vmul.f32 0.015625, %v71_v20  ;;  %v92_v24 = vmul.f32 %v1594_v18, %v1594_v18  ;;  %v1316_v20 = vld [vmem:[%s2339_s5] ss:$0 sm:$0xff] }
  0x9c   :  { %v1600_v25 = vsub.f32 %v1359_v3, %v85_v21  ;;  %v103_v26 = vsel %vm65_vm0, %v94_v22, 0.0  ;;  %v1603_v27 = vsub.f32 %v1355_v6, %v83_v23  ;;  %v97_v31 = vsel %vm65_vm0, %v92_v24, 0.0 }
  0x9d   :  { %v80_v28 = vpop.xlane.xlu0 %79  ;;  %104 = vadd.xlane.f32.xlu1 %v103_v26 }
  0x9e   :  { %v86_v29 = vmul.f32 0.015625, %v80_v28  ;;  %v95_v30 = vmul.f32 %v1600_v25, %v1600_v25  ;;  %v93_v32 = vmul.f32 %v1603_v27, %v1603_v27 }
  0xa0   :  { %v1610_v33 = vsub.f32 %v62_v10, %v86_v29  ;;  %v106_v34 = vsel %vm65_vm0, %v95_v30, 0.0  ;;  %v100_v36 = vsel %vm65_vm0, %v93_v32, 0.0  ;;  %v1313_v10 = vld [vmem:[%s2338_s4] ss:$0 sm:$0xff] }
  0xa1   :  { %107 = vadd.xlane.f32.xlu0 %v106_v34  ;;  %98 = vadd.xlane.f32.xlu1 %v97_v31  ;;  %v220_v19 = vadd.f32 1.0, %v1313_v10 }
  0xa2   :  { %v96_v35 = vmul.f32 %v1610_v33, %v1610_v33 }
  0xa4   :  { %v109_v37 = vsel %vm65_vm0, %v96_v35, 0.0 }
  0xa5   :  { %110 = vadd.xlane.f32.xlu1 %v109_v37  ;;  %101 = vadd.xlane.f32.xlu0 %v100_v36 }
 0x126   :  { %v105_v47 = vpop.xlane.xlu1 %104 }
 0x127   :  { %v114_v48 = vmul.f32 0.015625, %v105_v47 }
 0x129   :  { %v119_v49 = vadd.f32 1e-05, %v114_v48 }
 0x12a   :  { %v108_v50 = vpop.xlane.xlu0 %107  ;;  %v99_v51 = vpop.xlane.xlu1 %98 }
 0x12b   :  { %1435 = vrsqrt.f32 %v119_v49  ;;  %v115_v52 = vmul.f32 0.015625, %v108_v50  ;;  %v112_v53 = vmul.f32 0.015625, %v99_v51 }
 0x12d   :  { %v120_v54 = vadd.f32 1e-05, %v115_v52  ;;  %v117_v55 = vadd.f32 1e-05, %v112_v53 }
 0x12e   :  { %v102_v56 = vpop.xlane.xlu0 %101  ;;  %v111_v57 = vpop.xlane.xlu1 %110 }
 0x12f   :  { %1437 = vrsqrt.f32 %v120_v54  ;;  %v113_v58 = vmul.f32 0.015625, %v102_v56  ;;  %v116_v59 = vmul.f32 0.015625, %v111_v57 }
 0x130   :  { %1439 = vrsqrt.f32 %v117_v55 }
 0x131   :  { %v118_v60 = vadd.f32 1e-05, %v113_v58  ;;  %v121_v61 = vadd.f32 1e-05, %v116_v59 }
 0x133   :  { %1441 = vrsqrt.f32 %v118_v60 }
 0x134   :  { %1443 = vrsqrt.f32 %v121_v61 }
 0x138   :  { %v1436_v62 = vpop.eup %1435 }
 0x139   :  { %v129_v0 = vmul.f32 %v1436_v62, %v1592_v17 }
 0x13b   :  { %v140_v3 = vmul.f32 %v1311_v63, %v129_v0 }
 0x13c   :  { %v1438_v4 = vpop.eup %1437 }
 0x13d   :  { %v1440_v5 = vpop.eup %1439  ;;  %v130_v6 = vmul.f32 %v1438_v4, %v1600_v25  ;;  %v151_v7 = vadd.f32 %v1312_v1, %v140_v3 }
 0x13e   :  { %v127_v9 = vmul.f32 %v1440_v5, %v1594_v18 }
 0x13f   :  { %v141_v11 = vmul.f32 %v1311_v63, %v130_v6  ;;  %v227_v17 = vmul.f32 %v221_v8, %v151_v7 }
 0x140   :  { %v1442_v12 = vpop.eup %1441  ;;  %v138_v13 = vmul.f32 %v1311_v63, %v127_v9 }
 0x141   :  { %v1444_v14 = vpop.eup %1443  ;;  %v128_v15 = vmul.f32 %v1442_v12, %v1603_v27  ;;  %v152_v16 = vadd.f32 %v1312_v1, %v141_v11  ;;  %v232_v25 = vadd.f32 %v1316_v20, %v227_v17  ;;  %v1315_v27 = vld [vmem:[%s2340_s3] ss:$0 sm:$0xff] }
 0x142   :  { %v149_v21 = vadd.f32 %v1312_v1, %v138_v13  ;;  %v131_v18 = vmul.f32 %v1444_v14, %v1610_v33 }
 0x143   :  { %v228_v22 = vmul.f32 %v221_v8, %v152_v16  ;;  %v139_v23 = vmul.f32 %v1311_v63, %v128_v15 }
 0x144   :  { %v142_v24 = vmul.f32 %v1311_v63, %v131_v18  ;;  %v225_v29 = vmul.f32 %v220_v19, %v149_v21 }
 0x145   :  { %v233_v26 = vadd.f32 %v1316_v20, %v228_v22  ;;  %v150_v28 = vadd.f32 %v1312_v1, %v139_v23 }
 0x146   :  { %v153_v30 = vadd.f32 %v1312_v1, %v142_v24  ;;  %v230_v35 = vadd.f32 %v1315_v27, %v225_v29 }
 0x147   :  { %v236_v31 = vpack.c.bf16 %v233_v26, %v232_v25  ;;  %v226_v32 = vmul.f32 %v221_v8, %v150_v28 }
 0x148   :  { %v229_v34 = vmul.f32 %v221_v8, %v153_v30 }
 0x149   :  { %1326 = vmatmul.mubr.msk.bf16.vlgmr.msra.gmra.mxu1 %vm65_vm0, %v236_v31  ;;  %v231_v36 = vadd.f32 %v1316_v20, %v226_v32 }
 0x14a   :  { %359 = vmatprep.mubr.bf16.mxu1 %v1485_v46  ;;  %v234_v37 = vadd.f32 %v1316_v20, %v229_v34 }
 0x14b   :  { %v235_v33 = vpack.c.bf16 %v231_v36, %v230_v35 }
 0x14c   :  { %v237_v38 = vpack.c.bf16 %v234_v37, %v234_v37 }
 0x14d   :  { %1325 = vmatmul.mubr.msk.bf16.vlgmr.msra.gmra.mxu0 %vm65_vm0, %v235_v33 }
 0x151   :  { %1327 = vmatmul.mubr.msk.bf16.gmra.mxu1 %vm65_vm0, %v237_v38 }
 0x209   :  { %v351_v47 = vpop.f32.mrf.mxu1 }
 0x20a   :  { %v1675_v46 = vadd.f32 %v351_v47, %v251_v44 }
 0x20b   :  { %v353_v48 = vpop.f32.mrf.mxu1 }
 0x20c   :  { %v1678_v49 = vadd.f32 %v353_v48, %v1673_v45  ;;  %480 = vrot.lane.b32.xlu1 %v1675_v46, %s1486_s21  ;;  %v387_v4 = vsel %vm380_vm1, %v1675_v46, 0.0 }
 0x20d   :  { %v341_v50 = vpop.f32.mrf.mxu0  ;;  %v355_v51 = vpop.f32.mrf.mxu1 }
 0x20e   :  { %v1682_v52 = vadd.f32 %v341_v50, %v251_v44  ;;  %v1704_v0 = vadd.f32 %v355_v51, %v251_v44 }
 0x20f   :  { %v1684_v53 = vpop.f32.mrf.mxu0  ;;  %v357_v54 = vpop.f32.mrf.mxu1 }
 0x210   :  { %v1687_v55 = vadd.f32 %v357_v54, %v1673_v45  ;;  %874 = vrot.lane.b32.xlu1 %v1682_v52, %s1487_s8  ;;  %476 = vrot.lane.b32.xlu0 %v1682_v52, %s1486_s21  ;;  %v381_v2 = vsel %vm380_vm1, %v1682_v52, 0.0  ;;  %v390_v5 = vsel %vm380_vm1, %v1704_v0, 0.0 }
 0x211   :  { %v361_v56 = vpop.f32.mrf.mxu1  ;;  %v345_v58 = vpop.f32.mrf.mxu0 }
 0x212   :  { %v1700_v62 = vadd.f32 %v345_v58, %v251_v44  ;;  %v1708_v1 = vadd.f32 %v361_v56, %v251_v44 }
 0x213   :  { %v363_v59 = vpop.f32.mrf.mxu1 }
 0x214   :  { %v1696_v60 = vadd.f32 %v363_v59, %v1673_v45  ;;  %878 = vrot.lane.b32.xlu1 %v1675_v46, %s1487_s8  ;;  %v384_v3 = vsel %vm380_vm1, %v1700_v62, 0.0  ;;  %v393_v9 = vsel %vm380_vm1, %v1708_v1, 0.0 }
 0x215   :  { %v365_v61 = vpop.f32.mrf.mxu1 }
 0x217   :  { %v366_v63 = vpop.f32.mrf.mxu1 }
 0x218   :  { %478 = vrot.lane.b32.xlu1 %v1700_v62, %s1486_s21 }
 0x21c   :  { %482 = vrot.lane.b32.xlu1 %v1704_v0, %s1486_s21 }
 0x220   :  { %882 = vrot.lane.b32.xlu1 %v1708_v1, %s1487_s8 }
 0x22f   :  { %382 = vadd.xlane.f32.xlu0 %v381_v2 }
 0x244   :  { %385 = vadd.xlane.f32.xlu1 %v384_v3 }
 0x245   :  { %876 = vrot.lane.b32.xlu0 %v1700_v62, %s1487_s8 }
 0x249   :  { %880 = vrot.lane.b32.xlu0 %v1704_v0, %s1487_s8 }
 0x24d   :  { %484 = vrot.lane.b32.xlu0 %v1708_v1, %s1486_s21 }
 0x255   :  { %760 = vrot.lane.b32.xlu1 %v1700_v62, %s1488_s22 }
 0x259   :  { %762 = vrot.lane.b32.xlu1 %v1675_v46, %s1488_s22 }
 0x25d   :  { %764 = vrot.lane.b32.xlu1 %v1704_v0, %s1488_s22 }
 0x26c   :  { %388 = vadd.xlane.f32.xlu0 %v387_v4 }
 0x270   :  { %391 = vadd.xlane.f32.xlu0 %v390_v5 }
 0x27e   :  { %v481_v8 = vpop.permute.xlu1 %480 }
 0x27f   :  { %v497_v11 = vsel %vm380_vm1, %v481_v8, 0.0 }
 0x282   :  { %v477_v6 = vpop.permute.xlu0 %476  ;;  %v875_v10 = vpop.permute.xlu1 %874 }
 0x283   :  { %v491_v7 = vsel %vm380_vm1, %v477_v6, 0.0  ;;  %v889_v12 = vsel %vm380_vm1, %v875_v10, 0.0 }
 0x284   :  { %492 = vadd.xlane.f32.xlu1 %v491_v7 }
 0x286   :  { %758 = vrot.lane.b32.xlu0 %v1682_v52, %s1488_s22  ;;  %v879_v13 = vpop.permute.xlu1 %878 }
 0x287   :  { %v895_v14 = vsel %vm380_vm1, %v879_v13, 0.0 }
 0x28a   :  { %766 = vrot.lane.b32.xlu0 %v1708_v1, %s1488_s22  ;;  %v479_v17 = vpop.permute.xlu1 %478 }
 0x28b   :  { %v494_v51 = vsel %vm380_vm1, %v479_v17, 0.0 }
 0x28e   :  { %v483_v18 = vpop.permute.xlu1 %482 }
 0x28f   :  { %v500_v56 = vsel %vm380_vm1, %v483_v18, 0.0 }
 0x292   :  { %v883_v22 = vpop.permute.xlu1 %882 }
 0x293   :  { %v901_v59 = vsel %vm380_vm1, %v883_v22, 0.0 }
 0x2a9   :  { %394 = vadd.xlane.f32.xlu0 %v393_v9 }
 0x2ad   :  { %498 = vadd.xlane.f32.xlu0 %v497_v11 }
 0x2b1   :  { %890 = vadd.xlane.f32.xlu0 %v889_v12 }
 0x2b5   :  { %896 = vadd.xlane.f32.xlu0 %v895_v14 }
 0x2b8   :  { %v383_v15 = vpop.xlane.xlu0 %382 }
 0x2b9   :  { %v397_v25 = vmul.f32 0.03125, %v383_v15 }
 0x2bb   :  { %v1746_v27 = vsub.f32 %v1682_v52, %v397_v25 }
 0x2bc   :  { %v877_v16 = vpop.permute.xlu0 %876 }
 0x2bd   :  { %v892_v19 = vsel %vm380_vm1, %v877_v16, 0.0  ;;  %v407_v36 = vmul.f32 %v1746_v27, %v1746_v27 }
 0x2be   :  { %893 = vadd.xlane.f32.xlu1 %v892_v19 }
 0x2bf   :  { %v412_v33 = vsel %vm380_vm1, %v407_v36, 0.0 }
 0x2c0   :  { %v881_v20 = vpop.permute.xlu0 %880 }
 0x2c1   :  { %v898_v21 = vsel %vm380_vm1, %v881_v20, 0.0 }
 0x2c2   :  { %899 = vadd.xlane.f32.xlu1 %v898_v21 }
 0x2c4   :  { %v485_v28 = vpop.permute.xlu0 %484 }
 0x2c5   :  { %v503_v31 = vsel %vm380_vm1, %v485_v28, 0.0 }
 0x2cd   :  { %v386_v23 = vpop.xlane.xlu1 %385 }
 0x2ce   :  { %v398_v30 = vmul.f32 0.03125, %v386_v23 }
 0x2d0   :  { %v1750_v34 = vsub.f32 %v1700_v62, %v398_v30 }
 0x2d1   :  { %v761_v24 = vpop.permute.xlu1 %760 }
 0x2d2   :  { %v776_v26 = vsel %vm380_vm1, %v761_v24, 0.0  ;;  %v408_v37 = vmul.f32 %v1750_v34, %v1750_v34 }
 0x2d3   :  { %777 = vadd.xlane.f32.xlu1 %v776_v26 }
 0x2d4   :  { %v415_v38 = vsel %vm380_vm1, %v408_v37, 0.0 }
 0x2d5   :  { %v763_v29 = vpop.permute.xlu1 %762 }
 0x2d6   :  { %v779_v50 = vsel %vm380_vm1, %v763_v29, 0.0 }
 0x2d7   :  { %504 = vadd.xlane.f32.xlu1 %v503_v31 }
 0x2d9   :  { %v765_v32 = vpop.permute.xlu1 %764 }
 0x2da   :  { %v782_v35 = vsel %vm380_vm1, %v765_v32, 0.0 }
 0x2db   :  { %783 = vadd.xlane.f32.xlu1 %v782_v35 }
 0x2df   :  { %413 = vadd.xlane.f32.xlu1 %v412_v33 }
 0x2e3   :  { %416 = vadd.xlane.f32.xlu1 %v415_v38 }
 0x2f5   :  { %v389_v39 = vpop.xlane.xlu0 %388 }
 0x2f6   :  { %v399_v54 = vmul.f32 0.03125, %v389_v39 }
 0x2f8   :  { %v1770_v58 = vsub.f32 %v1675_v46, %v399_v54 }
 0x2f9   :  { %v392_v40 = vpop.xlane.xlu0 %391 }
 0x2fa   :  { %v400_v41 = vmul.f32 0.03125, %v392_v40  ;;  %v409_v2 = vmul.f32 %v1770_v58, %v1770_v58 }
 0x2fc   :  { %v1760_v42 = vsub.f32 %v1704_v0, %v400_v41  ;;  %v418_v3 = vsel %vm380_vm1, %v409_v2, 0.0 }
 0x2fd   :  { %v759_v43 = vpop.permute.xlu0 %758 }
 0x2fe   :  { %v773_v44 = vsel %vm380_vm1, %v759_v43, 0.0  ;;  %v410_v47 = vmul.f32 %v1760_v42, %v1760_v42 }
 0x2ff   :  { %774 = vadd.xlane.f32.xlu0 %v773_v44 }
 0x300   :  { %v421_v48 = vsel %vm380_vm1, %v410_v47, 0.0 }
 0x301   :  { %422 = vadd.xlane.f32.xlu1 %v421_v48  ;;  %v767_v61 = vpop.permute.xlu0 %766 }
 0x302   :  { %v785_v63 = vsel %vm380_vm1, %v767_v61, 0.0 }
 0x303   :  { %780 = vadd.xlane.f32.xlu0 %v779_v50 }
 0x307   :  { %495 = vadd.xlane.f32.xlu0 %v494_v51 }
 0x30b   :  { %501 = vadd.xlane.f32.xlu0 %v500_v56 }
 0x30d   :  { %v493_v4 = vpop.xlane.xlu1 %492 }
 0x30e   :  { %v506_v5 = vmul.f32 0.03125, %v493_v4 }
 0x30f   :  { %902 = vadd.xlane.f32.xlu0 %v901_v59 }
 0x310   :  { %v1778_v6 = vsub.f32 %v1682_v52, %v506_v5 }
 0x312   :  { %v516_v7 = vmul.f32 %v1778_v6, %v1778_v6 }
 0x313   :  { %786 = vadd.xlane.f32.xlu0 %v785_v63 }
 0x317   :  { %419 = vadd.xlane.f32.xlu0 %v418_v3  ;;  %v1330_v3 = vld [vmem:[%s2342_s13] ss:$0 sm:$0xff] }
 0x32d   :  { %526 = vrot.lane.b32.xlu0 %v516_v7, %s1486_s21 }
 0x332   :  { %v395_v8 = vpop.xlane.xlu0 %394 }
 0x333   :  { %v401_v9 = vmul.f32 0.03125, %v395_v8 }
 0x335   :  { %v1784_v10 = vsub.f32 %v1708_v1, %v401_v9 }
 0x336   :  { %v499_v13 = vpop.xlane.xlu0 %498 }
 0x337   :  { %v411_v11 = vmul.f32 %v1784_v10, %v1784_v10  ;;  %v508_v15 = vmul.f32 0.03125, %v499_v13 }
 0x339   :  { %v424_v12 = vsel %vm380_vm1, %v411_v11, 0.0  ;;  %v1790_v16 = vsub.f32 %v1675_v46, %v508_v15 }
 0x33a   :  { %425 = vadd.xlane.f32.xlu1 %v424_v12  ;;  %v891_v14 = vpop.xlane.xlu0 %890 }
 0x33b   :  { %v904_v17 = vmul.f32 0.03125, %v891_v14  ;;  %v518_v23 = vmul.f32 %v1790_v16, %v1790_v16 }
 0x33d   :  { %v1793_v18 = vsub.f32 %v1682_v52, %v904_v17 }
 0x33e   :  { %v897_v19 = vpop.xlane.xlu0 %896 }
 0x33f   :  { %v906_v22 = vmul.f32 0.03125, %v897_v19  ;;  %v914_v30 = vmul.f32 %v1793_v18, %v1793_v18 }
 0x341   :  { %v1804_v29 = vsub.f32 %v1675_v46, %v906_v22 }
 0x343   :  { %v916_v35 = vmul.f32 %v1804_v29, %v1804_v29 }
 0x347   :  { %v894_v20 = vpop.xlane.xlu1 %893 }
 0x348   :  { %v905_v21 = vmul.f32 0.03125, %v894_v20 }
 0x34a   :  { %v1798_v24 = vsub.f32 %v1700_v62, %v905_v21 }
 0x34b   :  { %530 = vrot.lane.b32.xlu1 %v518_v23, %s1486_s21  ;;  %v900_v25 = vpop.xlane.xlu1 %899 }
 0x34c   :  { %v907_v26 = vmul.f32 0.03125, %v900_v25  ;;  %v915_v28 = vmul.f32 %v1798_v24, %v1798_v24 }
 0x34e   :  { %v1809_v31 = vsub.f32 %v1704_v0, %v907_v26  ;;  %926 = vrot.lane.b32.xlu0 %v915_v28, %s1487_s8 }
 0x34f   :  { %924 = vrot.lane.b32.xlu1 %v914_v30, %s1487_s8  ;;  %v1860_v30 = vld [vmem:[%s2343_s11] ss:$0 sm:$0xff] }
 0x350   :  { %v917_v32 = vmul.f32 %v1809_v31, %v1809_v31 }
 0x352   :  { %930 = vrot.lane.b32.xlu0 %v917_v32, %s1487_s8 }
 0x353   :  { %928 = vrot.lane.b32.xlu1 %v916_v35, %s1487_s8 }
 0x35c   :  { %v778_v36 = vpop.xlane.xlu1 %777 }
 0x35d   :  { %v789_v19 = vmul.f32 0.03125, %v778_v36 }
 0x35f   :  { %v1863_v32 = vsub.f32 %v1700_v62, %v789_v19 }
 0x360   :  { %v505_v33 = vpop.xlane.xlu1 %504 }
 0x361   :  { %v510_v37 = vmul.f32 0.03125, %v505_v33 }
 0x363   :  { %v1820_v38 = vsub.f32 %v1708_v1, %v510_v37 }
 0x364   :  { %v784_v40 = vpop.xlane.xlu1 %783 }
 0x365   :  { %v520_v39 = vmul.f32 %v1820_v38, %v1820_v38 }
 0x367   :  { %534 = vrot.lane.b32.xlu0 %v520_v39, %s1486_s21 }
 0x368   :  { %v414_v41 = vpop.xlane.xlu1 %413 }
 0x369   :  { %v427_v11 = vmul.f32 0.03125, %v414_v41  ;;  %v791_v41 = vmul.f32 0.03125, %v784_v40 }
 0x36b   :  { %v432_v20 = vadd.f32 1e-05, %v427_v11  ;;  %v1889_v40 = vsub.f32 %v1704_v0, %v791_v41 }
 0x36c   :  { %v417_v43 = vpop.xlane.xlu1 %416 }
 0x36d   :  { %v428_v44 = vmul.f32 0.03125, %v417_v43  ;;  %v1876_v43 = vld [vmem:[%s2344_s12] ss:$0 sm:$0xff] }
 0x36f   :  { %v433_v47 = vadd.f32 1e-05, %v428_v44 }
 0x371   :  { %1445 = vrsqrt.f32 %v433_v47 }
 0x37e   :  { %v1446_v13 = vpop.eup %1445 }
 0x37f   :  { %v443_v22 = vmul.f32 %v1446_v13, %v1750_v34 }
 0x381   :  { %v454_v35 = vmul.f32 %v1860_v30, %v443_v22 }
 0x388   :  { %v775_v48 = vpop.xlane.xlu0 %774 }
 0x389   :  { %v788_v50 = vmul.f32 0.03125, %v775_v48 }
 0x38a   :  { %v423_v51 = vpop.xlane.xlu1 %422 }
 0x38b   :  { %v1826_v54 = vsub.f32 %v1682_v52, %v788_v50  ;;  %v430_v56 = vmul.f32 0.03125, %v423_v51  ;;  %v801_v51 = vmul.f32 %v1889_v40, %v1889_v40 }
 0x38c   :  { %v781_v59 = vpop.xlane.xlu0 %780 }
 0x38d   :  { %v435_v61 = vadd.f32 1e-05, %v430_v56  ;;  %v798_v63 = vmul.f32 %v1826_v54, %v1826_v54  ;;  %v790_v36 = vmul.f32 0.03125, %v781_v59 }
 0x38f   :  { %808 = vrot.lane.b32.xlu0 %v798_v63, %s1488_s22  ;;  %1447 = vrsqrt.f32 %v435_v61  ;;  %v1879_v44 = vsub.f32 %v1675_v46, %v790_v36 }
 0x390   :  { %v496_v2 = vpop.xlane.xlu0 %495  ;;  %1449 = vrsqrt.f32 %v432_v20 }
 0x391   :  { %v507_v4 = vmul.f32 0.03125, %v496_v2  ;;  %v800_v48 = vmul.f32 %v1879_v44, %v1879_v44 }
 0x393   :  { %v1835_v5 = vsub.f32 %v1700_v62, %v507_v4  ;;  %974 = vrot.lane.b32.xlu0 %v1330_v3, %s1488_s22  ;;  %v799_v62 = vmul.f32 %v1863_v32, %v1863_v32 }
 0x394   :  { %v502_v52 = vpop.xlane.xlu0 %501 }
 0x395   :  { %v509_v7 = vmul.f32 0.03125, %v502_v52  ;;  %v517_v8 = vmul.f32 %v1835_v5, %v1835_v5 }
 0x397   :  { %v1841_v9 = vsub.f32 %v1704_v0, %v509_v7  ;;  %528 = vrot.lane.b32.xlu1 %v517_v8, %s1486_s21  ;;  %v1331_v0 = vld [vmem:[%s2345_s14] ss:$0 sm:$0xff]  ;;  %s1490_s14 = smov 16  }
 0x398   :  { %v903_v12 = vpop.xlane.xlu0 %902 }
 0x399   :  { %v908_v14 = vmul.f32 0.03125, %v903_v12  ;;  %v519_v15 = vmul.f32 %v1841_v9, %v1841_v9 }
 0x39b   :  { %v1847_v17 = vsub.f32 %v1708_v1, %v908_v14  ;;  %532 = vrot.lane.b32.xlu1 %v519_v15, %s1486_s21 }
 0x39c   :  { %v787_v21 = vpop.xlane.xlu0 %786  ;;  %v1448_v26 = vpop.eup %1447 }
 0x39d   :  { %v792_v23 = vmul.f32 0.03125, %v787_v21  ;;  %v918_v25 = vmul.f32 %v1847_v17, %v1847_v17  ;;  %v445_v37 = vmul.f32 %v1448_v26, %v1760_v42  ;;  %v1882_v42 = vadd.f32 %v1876_v43, %v454_v35  ;;  %v1450_v50 = vpop.eup %1449 }
 0x39e   :  { %v442_v56 = vmul.f32 %v1450_v50, %v1746_v27 }
 0x39f   :  { %v1854_v28 = vsub.f32 %v1708_v1, %v792_v23  ;;  %932 = vrot.lane.b32.xlu1 %v918_v25, %s1487_s8  ;;  %v456_v47 = vmul.f32 %v1860_v30, %v445_v37 }
 0x3a0   :  { %v420_v34 = vpop.xlane.xlu0 %419  ;;  %v453_v61 = vmul.f32 %v1860_v30, %v442_v56 }
 0x3a1   :  { %v429_v33 = vmul.f32 0.03125, %v420_v34  ;;  %v802_v1 = vmul.f32 %v1854_v28, %v1854_v28  ;;  %v1894_v46 = vadd.f32 %v1876_v43, %v456_v47 }
 0x3a2   :  { %v1911_v2 = vadd.f32 %v1876_v43, %v453_v61 }
 0x3a3   :  { %v434_v39 = vadd.f32 1e-05, %v429_v33  ;;  %581 = vrot.lane.b32.xlu1 %v1330_v3, %s1486_s21  ;;  %816 = vrot.lane.b32.xlu0 %v802_v1, %s1488_s22 }
 0x3a4   :  { %v527_v7 = vpop.permute.xlu0 %526 }
 0x3a5   :  { %1451 = vrsqrt.f32 %v434_v39  ;;  %v541_v11 = vsel %vm380_vm1, %v527_v7, 0.0 }
 0x3a7   :  { %810 = vrot.lane.b32.xlu1 %v799_v62, %s1488_s22  ;;  %609 = vrot.lane.b32.xlu0 %v1882_v42, %s1489_s27 }
 0x3ab   :  { %812 = vrot.lane.b32.xlu1 %v800_v48, %s1488_s22  ;;  %613 = vrot.lane.b32.xlu0 %v1894_v46, %s1489_s27 }
 0x3af   :  { %814 = vrot.lane.b32.xlu1 %v801_v51, %s1488_s22 }
 0x3b2   :  { %v1452_v59 = vpop.eup %1451 }
 0x3b3   :  { %594 = vrot.lane.b32.xlu1 %v1331_v0, %s1486_s21  ;;  %v444_v63 = vmul.f32 %v1452_v59, %v1770_v58 }
 0x3b5   :  { %v455_v3 = vmul.f32 %v1860_v30, %v444_v63 }
 0x3b7   :  { %982 = vrot.lane.b32.xlu1 %v1331_v0, %s1488_s22  ;;  %v1917_v4 = vadd.f32 %v1876_v43, %v455_v3 }
 0x3bb   :  { %607 = vrot.lane.b32.xlu1 %v1911_v2, %s1489_s27 }
 0x3bf   :  { %611 = vrot.lane.b32.xlu1 %v1917_v4, %s1489_s27 }
 0x3c0   :  { %v927_v23 = vpop.permute.xlu0 %926 }
 0x3c1   :  { %v942_v41 = vsel %vm380_vm1, %v927_v23, 0.0 }
 0x3c3   :  { %v426_v27 = vpop.xlane.xlu1 %425 }
 0x3c4   :  { %v431_v52 = vmul.f32 0.03125, %v426_v27  ;;  %v931_v25 = vpop.permute.xlu0 %930 }
 0x3c5   :  { %v948_v48 = vsel %vm380_vm1, %v931_v25, 0.0 }
 0x3c6   :  { %v436_v58 = vadd.f32 1e-05, %v431_v52 }
 0x3c7   :  { %v531_v8 = vpop.permute.xlu1 %530 }
 0x3c8   :  { %1453 = vrsqrt.f32 %v436_v58  ;;  %v547_v13 = vsel %vm380_vm1, %v531_v8, 0.0 }
 0x3ca   :  { %542 = vadd.xlane.f32.xlu0 %v541_v11 }
 0x3cb   :  { %v925_v12 = vpop.permute.xlu1 %924 }
 0x3cc   :  { %v939_v34 = vsel %vm380_vm1, %v925_v12, 0.0 }
 0x3ce   :  { %548 = vadd.xlane.f32.xlu0 %v547_v13 }
 0x3cf   :  { %v929_v14 = vpop.permute.xlu1 %928 }
 0x3d0   :  { %v945_v15 = vsel %vm380_vm1, %v929_v14, 0.0 }
 0x3d2   :  { %946 = vadd.xlane.f32.xlu0 %v945_v15 }
 0x3d5   :  { %v1454_v19 = vpop.eup %1453 }
 0x3d6   :  { %v446_v20 = vmul.f32 %v1454_v19, %v1784_v10 }
 0x3d8   :  { %v457_v21 = vmul.f32 %v1860_v30, %v446_v20 }
 0x3d9   :  { %v535_v26 = vpop.permute.xlu0 %534 }
 0x3da   :  { %v1927_v22 = vadd.f32 %v1876_v43, %v457_v21  ;;  %v553_v51 = vsel %vm380_vm1, %v535_v26, 0.0 }
 0x3dc   :  { %2356 = vst [vmem:[#allocation2_spill] sm:$0xff] %v1927_v22  ;;  %615 = vrot.lane.b32.xlu1 %v1927_v22, %s1489_s27 }
 0x400   :  { %940 = vadd.xlane.f32.xlu1 %v939_v34 }
 0x401   :  { %v809_v35 = vpop.permute.xlu0 %808 }
 0x402   :  { %v823_v36 = vsel %vm380_vm1, %v809_v35, 0.0 }
 0x403   :  { %824 = vadd.xlane.f32.xlu0 %v823_v36 }
 0x405   :  { %v1952_v3 = vpop.permute.xlu0 %974 }
 0x409   :  { %v529_v33 = vpop.permute.xlu1 %528 }
 0x40a   :  { %v544_v10 = vsel %vm380_vm1, %v529_v33, 0.0 }
 0x40b   :  { %545 = vadd.xlane.f32.xlu1 %v544_v10 }
 0x40d   :  { %v533_v1 = vpop.permute.xlu1 %532 }
 0x40e   :  { %v550_v37 = vsel %vm380_vm1, %v533_v1, 0.0 }
 0x40f   :  { %551 = vadd.xlane.f32.xlu0 %v550_v37 }
 0x411   :  { %v933_v39 = vpop.permute.xlu1 %932 }
 0x412   :  { %v951_v62 = vsel %vm380_vm1, %v933_v39, 0.0 }
 0x413   :  { %943 = vadd.xlane.f32.xlu0 %v942_v41  ;;  %952 = vadd.xlane.f32.xlu1 %v951_v62 }
 0x415   :  { %v1937_v47 = vpop.permute.xlu1 %581  ;;  %v817_v27 = vpop.permute.xlu0 %816 }
 0x416   :  { %v835_v14 = vsel %vm380_vm1, %v817_v27, 0.0 }
 0x417   :  { %949 = vadd.xlane.f32.xlu0 %v948_v48 }
 0x419   :  { %v811_v50 = vpop.permute.xlu1 %810  ;;  %v1956_v52 = vpop.permute.xlu0 %609 }
 0x41a   :  { %v826_v0 = vsel %vm380_vm1, %v811_v50, 0.0 }
 0x41b   :  { %554 = vadd.xlane.f32.xlu0 %v553_v51  ;;  %827 = vadd.xlane.f32.xlu1 %v826_v0 }
 0x41d   :  { %v813_v56 = vpop.permute.xlu1 %812  ;;  %v1958_v7 = vpop.permute.xlu0 %613 }
 0x41e   :  { %v829_v59 = vsel %vm380_vm1, %v813_v56, 0.0 }
 0x41f   :  { %830 = vadd.xlane.f32.xlu0 %v829_v59 }
 0x421   :  { %v815_v61 = vpop.permute.xlu1 %814 }
 0x422   :  { %v832_v63 = vsel %vm380_vm1, %v815_v61, 0.0 }
 0x423   :  { %833 = vadd.xlane.f32.xlu0 %v832_v63 }
 0x425   :  { %v1963_v21 = vpop.permute.xlu1 %594 }
 0x42c   :  { %622 = vrot.lane.b32.xlu1 %v1911_v2, %s1490_s14 }
 0x430   :  { %866 = vrot.lane.b32.xlu1 %v1876_v43, %s1487_s8 }
 0x434   :  { %626 = vrot.lane.b32.xlu1 %v1917_v4, %s1490_s14 }
 0x439   :  { %858 = vrot.lane.b32.xlu0 %v1860_v30, %s1487_s8 }
 0x43d   :  { %624 = vrot.lane.b32.xlu0 %v1882_v42, %s1490_s14 }
 0x453   :  { %v543_v58 = vpop.xlane.xlu0 %542 }
 0x454   :  { %v556_v8 = vmul.f32 0.03125, %v543_v58 }
 0x456   :  { %v561_v11 = vadd.f32 1e-05, %v556_v8 }
 0x457   :  { %v549_v43 = vpop.xlane.xlu0 %548 }
 0x458   :  { %1455 = vrsqrt.f32 %v561_v11  ;;  %v558_v12 = vmul.f32 0.03125, %v549_v43 }
 0x45a   :  { %v563_v13 = vadd.f32 1e-05, %v558_v12 }
 0x45b   :  { %v947_v36 = vpop.xlane.xlu0 %946 }
 0x45c   :  { %1457 = vrsqrt.f32 %v563_v13  ;;  %836 = vadd.xlane.f32.xlu0 %v835_v14  ;;  %v956_v33 = vmul.f32 0.03125, %v947_v36 }
 0x45e   :  { %v961_v1 = vadd.f32 1e-05, %v956_v33 }
 0x460   :  { %1459 = vrsqrt.f32 %v961_v1 }
 0x465   :  { %v1456_v30 = vpop.eup %1455 }
 0x466   :  { %v571_v15 = vmul.f32 %v1456_v30, %v1778_v6 }
 0x468   :  { %v584_v19 = vmul.f32 %v1937_v47, %v571_v15 }
 0x469   :  { %v1458_v20 = vpop.eup %1457 }
 0x46a   :  { %v1966_v23 = vadd.f32 %v1963_v21, %v584_v19  ;;  %v573_v25 = vmul.f32 %v1458_v20, %v1790_v16  ;;  %v1981_v16 = vpop.permute.xlu1 %982 }
 0x46c   :  { %668 = vrot.lane.b32.xlu1 %v1966_v23, %s1491_s7  ;;  %v586_v26 = vmul.f32 %v1937_v47, %v573_v25 }
 0x46d   :  { %v1460_v56 = vpop.eup %1459 }
 0x46e   :  { %v1975_v6 = vadd.f32 %v1963_v21, %v586_v26  ;;  %v1983_v34 = vpop.permute.xlu1 %607  ;;  %v971_v11 = vmul.f32 %v1460_v56, %v1804_v29 }
 0x470   :  { %683 = vrot.lane.b32.xlu1 %v1966_v23, %s1492_s29  ;;  %v979_v19 = vmul.f32 %v1952_v3, %v971_v11 }
 0x472   :  { %672 = vrot.lane.b32.xlu0 %v1975_v6, %s1491_s7  ;;  %v1985_v35 = vpop.permute.xlu1 %611  ;;  %v2001_v26 = vadd.f32 %v1981_v16, %v979_v19 }
 0x474   :  { %687 = vrot.lane.b32.xlu1 %v1975_v6, %s1492_s29 }
 0x476   :  { %v1987_v10 = vpop.permute.xlu1 %615 }
 0x489   :  { %v941_v37 = vpop.xlane.xlu1 %940 }
 0x48a   :  { %v954_v39 = vmul.f32 0.03125, %v941_v37 }
 0x48c   :  { %v959_v41 = vadd.f32 1e-05, %v954_v39  ;;  %v825_v62 = vpop.xlane.xlu0 %824 }
 0x48e   :  { %1461 = vrsqrt.f32 %v959_v41 }
 0x494   :  { %v546_v48 = vpop.xlane.xlu1 %545 }
 0x495   :  { %v557_v50 = vmul.f32 0.03125, %v546_v48 }
 0x497   :  { %v562_v51 = vadd.f32 1e-05, %v557_v50 }
 0x498   :  { %v552_v0 = vpop.xlane.xlu0 %551 }
 0x499   :  { %1463 = vrsqrt.f32 %v562_v51  ;;  %v559_v59 = vmul.f32 0.03125, %v552_v0 }
 0x49b   :  { %v1462_v61 = vpop.eup %1461  ;;  %v564_v63 = vadd.f32 1e-05, %v559_v59 }
 0x49c   :  { %v944_v27 = vpop.xlane.xlu0 %943  ;;  %v953_v58 = vpop.xlane.xlu1 %952  ;;  %v969_v8 = vmul.f32 %v1462_v61, %v1793_v18 }
 0x49d   :  { %1465 = vrsqrt.f32 %v564_v63  ;;  %v955_v43 = vmul.f32 0.03125, %v944_v27  ;;  %v958_v14 = vmul.f32 0.03125, %v953_v58  ;;  %v838_v58 = vmul.f32 0.03125, %v825_v62 }
 0x49e   :  { %v977_v12 = vmul.f32 %v1952_v3, %v969_v8 }
 0x49f   :  { %v960_v13 = vadd.f32 1e-05, %v955_v43  ;;  %v963_v18 = vadd.f32 1e-05, %v958_v14 }
 0x4a0   :  { %v950_v30 = vpop.xlane.xlu0 %949  ;;  %v1993_v15 = vadd.f32 %v1981_v16, %v977_v12 }
 0x4a1   :  { %1467 = vrsqrt.f32 %v960_v13  ;;  %v957_v20 = vmul.f32 0.03125, %v950_v30  ;;  %v843_v30 = vadd.f32 1e-05, %v838_v58 }
 0x4a2   :  { %1105 = vrot.lane.b32.xlu1 %v1993_v15, %s1491_s7  ;;  %1090 = vrot.lane.b32.xlu0 %v1993_v15, %s1490_s14 }
 0x4a3   :  { %v962_v29 = vadd.f32 1e-05, %v957_v20 }
 0x4a4   :  { %v555_v25 = vpop.xlane.xlu0 %554  ;;  %v828_v50 = vpop.xlane.xlu1 %827 }
 0x4a5   :  { %1469 = vrsqrt.f32 %v962_v29  ;;  %v560_v36 = vmul.f32 0.03125, %v555_v25  ;;  %v839_v59 = vmul.f32 0.03125, %v828_v50 }
 0x4a6   :  { %v1464_v33 = vpop.eup %1463  ;;  %1109 = vrot.lane.b32.xlu1 %v2001_v26, %s1491_s7  ;;  %1094 = vrot.lane.b32.xlu0 %v2001_v26, %s1490_s14  ;;  %1471 = vrsqrt.f32 %v963_v18 }
 0x4a7   :  { %v565_v1 = vadd.f32 1e-05, %v560_v36  ;;  %v572_v37 = vmul.f32 %v1464_v33, %v1835_v5  ;;  %v844_v11 = vadd.f32 1e-05, %v839_v59  ;;  %v2088_v59 = vld [vmem:[%s2346_s9 + $0x18] sm:$0xff] }
 0x4a8   :  { %v831_v48 = vpop.xlane.xlu0 %830 }
 0x4a9   :  { %1473 = vrsqrt.f32 %v565_v1  ;;  %v585_v39 = vmul.f32 %v1937_v47, %v572_v37  ;;  %v840_v43 = vmul.f32 0.03125, %v831_v48  ;;  %v2076_v48 = vld [vmem:[%s2346_s9] sm:$0xff] }
 0x4aa   :  { %v1466_v41 = vpop.eup %1465  ;;  %1475 = vrsqrt.f32 %v844_v11  ;;  %v2126_v11 = vld [vmem:[%s2346_s9 + $0x20] sm:$0xff] }
 0x4ab   :  { %v2010_v51 = vadd.f32 %v1963_v21, %v585_v39  ;;  %v574_v0 = vmul.f32 %v1466_v41, %v1841_v9  ;;  %v845_v20 = vadd.f32 1e-05, %v840_v43  ;;  %1477 = vrsqrt.f32 %v843_v30  ;;  %v2071_v41 = vld [vmem:[%s2346_s9 + $0x8] sm:$0xff]  ;;  %2357 = vst [vmem:[#allocation3_spill] sm:$0xff] %v2126_v11 }
 0x4ac   :  { %v834_v27 = vpop.xlane.xlu0 %833 }
 0x4ad   :  { %685 = vrot.lane.b32.xlu0 %v2010_v51, %s1492_s29  ;;  %670 = vrot.lane.b32.xlu1 %v2010_v51, %s1491_s7  ;;  %v587_v56 = vmul.f32 %v1937_v47, %v574_v0  ;;  %v841_v12 = vmul.f32 0.03125, %v834_v27  ;;  %1479 = vrsqrt.f32 %v845_v20 }
 0x4ae   :  { %v1468_v5 = vpop.eup %1467 }
 0x4af   :  { %v2019_v61 = vadd.f32 %v1963_v21, %v587_v56  ;;  %v970_v63 = vmul.f32 %v1468_v5, %v1798_v24  ;;  %v846_v18 = vadd.f32 1e-05, %v841_v12 }
 0x4b0   :  { %v859_v39 = vpop.permute.xlu0 %858 }
 0x4b1   :  { %689 = vrot.lane.b32.xlu0 %v2019_v61, %s1492_s29  ;;  %674 = vrot.lane.b32.xlu1 %v2019_v61, %s1491_s7  ;;  %v978_v9 = vmul.f32 %v1952_v3, %v970_v63  ;;  %1481 = vrsqrt.f32 %v846_v18 }
 0x4b2   :  { %v1470_v8 = vpop.eup %1469 }
 0x4b3   :  { %v2028_v13 = vadd.f32 %v1981_v16, %v978_v9  ;;  %v972_v14 = vmul.f32 %v1470_v8, %v1809_v31  ;;  %v1472_v24 = vpop.eup %1471 }
 0x4b4   :  { %v973_v31 = vmul.f32 %v1472_v24, %v1847_v17  ;;  %v2128_v43 = vpop.permute.xlu0 %624 }
 0x4b5   :  { %1107 = vrot.lane.b32.xlu0 %v2028_v13, %s1491_s7  ;;  %1092 = vrot.lane.b32.xlu1 %v2028_v13, %s1490_s14  ;;  %v980_v62 = vmul.f32 %v1952_v3, %v972_v14 }
 0x4b6   :  { %v1474_v19 = vpop.eup %1473  ;;  %v981_v1 = vmul.f32 %v1952_v3, %v973_v31 }
 0x4b7   :  { %v2037_v29 = vadd.f32 %v1981_v16, %v980_v62  ;;  %v575_v25 = vmul.f32 %v1474_v19, %v1820_v38  ;;  %v1476_v17 = vpop.eup %1475 }
 0x4b8   :  { %v2055_v38 = vadd.f32 %v1981_v16, %v981_v1  ;;  %v2066_v16 = vpop.permute.xlu1 %622 }
 0x4b9   :  { %1111 = vrot.lane.b32.xlu0 %v2037_v29, %s1491_s7  ;;  %1096 = vrot.lane.b32.xlu1 %v2037_v29, %s1490_s14  ;;  %v588_v36 = vmul.f32 %v1937_v47, %v575_v25  ;;  %v1478_v47 = vpop.eup %1477 }
 0x4ba   :  { %v1480_v3 = vpop.eup %1479  ;;  %v853_v50 = vmul.f32 %v1478_v47, %v1826_v54  ;;  %v2093_v54 = vld [vmem:[%s2346_s9 + $0x10] sm:$0xff] }
 0x4bb   :  { %v2047_v33 = vadd.f32 %v1963_v21, %v588_v36  ;;  %v854_v21 = vmul.f32 %v1476_v17, %v1863_v32  ;;  %v855_v32 = vmul.f32 %v1480_v3, %v1879_v44  ;;  %v2155_v17 = vld [vmem:[%s2347_s10] sm:$0xff] }
 0x4bc   :  { %v861_v56 = vmul.f32 %v859_v39, %v853_v50  ;;  %v867_v44 = vpop.permute.xlu1 %866 }
 0x4bd   :  { %676 = vrot.lane.b32.xlu0 %v2047_v33, %s1491_s7  ;;  %691 = vrot.lane.b32.xlu1 %v2047_v33, %s1492_s29  ;;  %v862_v5 = vmul.f32 %v859_v39, %v854_v21  ;;  %v2163_v21 = vld [vmem:[%s2347_s10 + $0x10] sm:$0xff] }
 0x4be   :  { %v1482_v37 = vpop.eup %1481  ;;  %v2101_v58 = vadd.f32 %v867_v44, %v861_v56 }
 0x4bf   :  { %v856_v0 = vmul.f32 %v1482_v37, %v1889_v40  ;;  %v863_v40 = vmul.f32 %v859_v39, %v855_v32  ;;  %v2099_v27 = vadd.f32 %v867_v44, %v862_v5 }
 0x4c0   :  { %v2142_v30 = vpop.permute.xlu1 %626 }
 0x4c1   :  { %1113 = vrot.lane.b32.xlu1 %v2055_v38, %s1491_s7  ;;  %1098 = vrot.lane.b32.xlu0 %v2055_v38, %s1490_s14  ;;  %v864_v63 = vmul.f32 %v859_v39, %v856_v0  ;;  %v2109_v8 = vadd.f32 %v867_v44, %v863_v40 }
 0x4c3   :  { %v2107_v9 = vadd.f32 %v867_v44, %v864_v63 }
 0x4c5   :  { %630 = vrot.lane.b32.xlu1 %v1927_v22, %s1490_s14  ;;  %628 = vrot.lane.b32.xlu0 %v1894_v46, %s1490_s14 }
 0x4c9   :  { %710 = vrot.lane.b32.xlu1 %v2071_v41, %s1486_s21  ;;  %708 = vrot.lane.b32.xlu0 %v2076_v48, %s1486_s21 }
 0x4cd   :  { %714 = vrot.lane.b32.xlu1 %v2088_v59, %s1486_s21  ;;  %712 = vrot.lane.b32.xlu0 %v2093_v54, %s1486_s21 }
 0x4d1   :  { %997 = vrot.lane.b32.xlu1 %v2099_v27, %s1492_s29  ;;  %995 = vrot.lane.b32.xlu0 %v2101_v58, %s1492_s29 }
 0x4d5   :  { %1001 = vrot.lane.b32.xlu1 %v2107_v9, %s1492_s29  ;;  %999 = vrot.lane.b32.xlu0 %v2109_v8, %s1492_s29 }
 0x4d9   :  { %1010 = vrot.lane.b32.xlu1 %v2101_v58, %s1489_s27  ;;  %1012 = vrot.lane.b32.xlu0 %v2099_v27, %s1489_s27 }
 0x4dd   :  { %1014 = vrot.lane.b32.xlu1 %v2109_v8, %s1489_s27  ;;  %1016 = vrot.lane.b32.xlu0 %v2107_v9, %s1489_s27 }
 0x4de   :  { %v669_v62 = vpop.permute.xlu1 %668 }
 0x4e1   :  { %1125 = vrot.lane.b32.xlu1 %v2076_v48, %s1488_s22  ;;  %716 = vrot.lane.b32.xlu0 %v2126_v11, %s1486_s21 }
 0x4e2   :  { %v684_v18 = vpop.permute.xlu1 %683 }
 0x4e3   :  { %v698_v36 = vsel %vm637_vm2, %v669_v62, %v684_v18 }
 0x4e5   :  { %v837_v12 = vpop.xlane.xlu0 %836  ;;  %1129 = vrot.lane.b32.xlu1 %v2093_v54, %s1488_s22  ;;  %1127 = vrot.lane.b32.xlu0 %v2071_v41, %s1488_s22 }
 0x4e6   :  { %v842_v14 = vmul.f32 0.03125, %v837_v12  ;;  %v688_v47 = vpop.permute.xlu1 %687 }
 0x4e8   :  { %v847_v24 = vadd.f32 1e-05, %v842_v14  ;;  %v2176_v14 = vld [vmem:[%s2347_s10 + $0x8] sm:$0xff] }
 0x4e9   :  { %1133 = vrot.lane.b32.xlu1 %v2126_v11, %s1488_s22  ;;  %1131 = vrot.lane.b32.xlu0 %v2088_v59, %s1488_s22  ;;  %v673_v1 = vpop.permute.xlu0 %672 }
 0x4ea   :  { %1483 = vrsqrt.f32 %v847_v24  ;;  %v700_v3 = vsel %vm637_vm2, %v673_v1, %v688_v47 }
 0x4eb   :  { %v730_v37 = vmul.f32 %v700_v3, %v2163_v21 }
 0x4f7   :  { %v1484_v19 = vpop.eup %1483 }
 0x4f8   :  { %v857_v20 = vmul.f32 %v1484_v19, %v1854_v28  ;;  %v728_v28 = vmul.f32 %v698_v36, %v2155_v17  ;;  %v376_v19 = vld [vmem:[%s2347_s10 + $0x18] sm:$0xff] }
 0x4fa   :  { %v865_v25 = vmul.f32 %v859_v39, %v857_v20 }
 0x4fc   :  { %v2145_v31 = vadd.f32 %v867_v44, %v865_v25 }
 0x4fe   :  { %2358 = vst [vmem:[#allocation4_spill] sm:$0xff] %v2145_v31  ;;  %1018 = vrot.lane.b32.xlu1 %v2145_v31, %s1489_s27  ;;  %1003 = vrot.lane.b32.xlu0 %v2145_v31, %s1492_s29 }
 0x502   :  { %738 = vrot.lane.b32.xlu0 %v728_v28, %s1486_s21 }
 0x506   :  { %742 = vrot.lane.b32.xlu0 %v730_v37, %s1486_s21 }
 0x514   :  { %v1091_v39 = vpop.permute.xlu0 %1090  ;;  %v1106_v50 = vpop.permute.xlu1 %1105 }
 0x515   :  { %v1120_v32 = vsel %vm637_vm2, %v1091_v39, %v1106_v50  ;;  %v2192_v50 = vld [vmem:[%s2347_s10 + $0x20] sm:$0xff] }
 0x516   :  { %v1145_v0 = vmul.f32 %v1120_v32, %v2155_v17 }
 0x518   :  { %v1095_v56 = vpop.permute.xlu0 %1094  ;;  %1155 = vrot.lane.b32.xlu1 %v1145_v0, %s1488_s22  ;;  %v1110_v5 = vpop.permute.xlu1 %1109 }
 0x519   :  { %v1122_v44 = vsel %vm637_vm2, %v1095_v56, %v1110_v5 }
 0x51a   :  { %v1147_v40 = vmul.f32 %v1122_v44, %v2163_v21 }
 0x51c   :  { %1159 = vrot.lane.b32.xlu1 %v1147_v40, %s1488_s22 }
 0x51f   :  { %v686_v63 = vpop.permute.xlu0 %685  ;;  %v671_v12 = vpop.permute.xlu1 %670 }
 0x520   :  { %v699_v24 = vsel %vm637_vm2, %v671_v12, %v686_v63 }
 0x521   :  { %v729_v62 = vmul.f32 %v699_v24, %v2176_v14 }
 0x523   :  { %v690_v20 = vpop.permute.xlu0 %689  ;;  %740 = vrot.lane.b32.xlu1 %v729_v62, %s1486_s21  ;;  %v675_v18 = vpop.permute.xlu1 %674 }
 0x524   :  { %v701_v25 = vsel %vm637_vm2, %v675_v18, %v690_v20 }
 0x525   :  { %v731_v36 = vmul.f32 %v701_v25, %v376_v19 }
 0x527   :  { %v1108_v1 = vpop.permute.xlu0 %1107  ;;  %744 = vrot.lane.b32.xlu1 %v731_v36, %s1486_s21  ;;  %v1093_v28 = vpop.permute.xlu1 %1092 }
 0x528   :  { %v1121_v47 = vsel %vm637_vm2, %v1093_v28, %v1108_v1 }
 0x529   :  { %v1146_v3 = vmul.f32 %v1121_v47, %v2176_v14 }
 0x52b   :  { %v1112_v37 = vpop.permute.xlu0 %1111  ;;  %1157 = vrot.lane.b32.xlu0 %v1146_v3, %s1488_s22  ;;  %v1097_v39 = vpop.permute.xlu1 %1096 }
 0x52c   :  { %v1123_v44 = vsel %vm637_vm2, %v1097_v39, %v1112_v37 }
 0x52d   :  { %v1148_v24 = vmul.f32 %v1123_v44, %v376_v19 }
 0x52f   :  { %v677_v32 = vpop.permute.xlu0 %676  ;;  %v692_v0 = vpop.permute.xlu1 %691 }
 0x530   :  { %v702_v56 = vsel %vm637_vm2, %v677_v32, %v692_v0 }
 0x531   :  { %v732_v5 = vmul.f32 %v702_v56, %v2192_v50 }
 0x533   :  { %v1099_v40 = vpop.permute.xlu0 %1098  ;;  %746 = vrot.lane.b32.xlu0 %v732_v5, %s1486_s21  ;;  %v1114_v63 = vpop.permute.xlu1 %1113 }
 0x534   :  { %v1124_v12 = vsel %vm637_vm2, %v1099_v40, %v1114_v63 }
 0x535   :  { %v1149_v62 = vmul.f32 %v1124_v12, %v2192_v50  ;;  %v347_v12 = vpop.f32.mrf.mxu0 }
 0x536   :  { %v348_v57 = vadd.f32 %v347_v12, %v1673_v45 }
 0x537   :  { %v629_v20 = vpop.permute.xlu0 %628  ;;  %1161 = vrot.lane.b32.xlu0 %v1148_v24, %s1488_s22  ;;  %1163 = vrot.lane.b32.xlu1 %v1149_v62, %s1488_s22  ;;  %v2202_v18 = vpop.permute.xlu1 %630 }
 0x538   :  { %v641_v25 = vsel %vm637_vm2, %v1958_v7, %v629_v20 }
 0x539   :  { %v2206_v36 = vmul.f32 %v641_v25, %v376_v19 }
 0x53b   :  { %v709_v1 = vpop.permute.xlu0 %708  ;;  %1030 = vrot.lane.b32.xlu0 %v2076_v48, %s1487_s8  ;;  %1032 = vrot.lane.b32.xlu1 %v2071_v41, %s1487_s8  ;;  %v711_v28 = vpop.permute.xlu1 %710 }
 0x53f   :  { %v713_v47 = vpop.permute.xlu0 %712  ;;  %1034 = vrot.lane.b32.xlu0 %v2093_v54, %s1487_s8  ;;  %1036 = vrot.lane.b32.xlu1 %v2088_v59, %s1487_s8  ;;  %v715_v3 = vpop.permute.xlu1 %714 }
 0x540   :  { %v725_v31 = vmul.f32 %v713_v47, %v1975_v6  ;;  %v726_v22 = vmul.f32 %v715_v3, %v2019_v61 }
 0x543   :  { %v996_v37 = vpop.permute.xlu0 %995  ;;  %1038 = vrot.lane.b32.xlu0 %v2126_v11, %s1487_s8  ;;  %v998_v7 = vpop.permute.xlu1 %997 }
 0x547   :  { %v1000_v39 = vpop.permute.xlu0 %999  ;;  %v1002_v32 = vpop.permute.xlu1 %1001 }
 0x54b   :  { %v1013_v0 = vpop.permute.xlu0 %1012  ;;  %v1011_v56 = vpop.permute.xlu1 %1010 }
 0x54c   :  { %v1026_v5 = vsel %vm637_vm2, %v998_v7, %v1013_v0  ;;  %v1025_v44 = vsel %vm637_vm2, %v996_v37, %v1011_v56  ;;  %v344_v0 = vadd.f32 %v1684_v53, %v1673_v45 }
 0x54d   :  { %v1051_v40 = vmul.f32 %v1026_v5, %v2176_v14  ;;  %v1050_v63 = vmul.f32 %v1025_v44, %v2155_v17 }
 0x54e   :  { %v1388_v56 = vpack.i.bf16 %v348_v57, %v344_v0  ;;  %v723_v57 = vmul.f32 %v709_v1, %v1966_v23 }
 0x54f   :  { %v1017_v24 = vpop.permute.xlu0 %1016  ;;  %1062 = vrot.lane.b32.xlu0 %v1051_v40, %s1487_s8  ;;  %1060 = vrot.lane.b32.xlu1 %v1050_v63, %s1487_s8  ;;  %v1015_v62 = vpop.permute.xlu1 %1014 }
 0x550   :  { %v1028_v20 = vsel %vm637_vm2, %v1002_v32, %v1017_v24  ;;  %v1027_v25 = vsel %vm637_vm2, %v1000_v39, %v1015_v62 }
 0x551   :  { %v1053_v7 = vmul.f32 %v1028_v20, %v376_v19  ;;  %v1052_v37 = vmul.f32 %v1027_v25, %v2163_v21  ;;  %v724_v25 = vmul.f32 %v711_v28, %v2010_v51 }
 0x553   :  { %1066 = vrot.lane.b32.xlu0 %v1053_v7, %s1487_s8  ;;  %1064 = vrot.lane.b32.xlu1 %v1052_v37, %s1487_s8  ;;  %v717_v5 = vpop.permute.xlu0 %716  ;;  %v1126_v44 = vpop.permute.xlu1 %1125 }
 0x554   :  { %v727_v6 = vmul.f32 %v717_v5, %v2047_v33  ;;  %v1140_v61 = vmul.f32 %v1126_v44, %v1993_v15  ;;  %v2359_v5 = vpack.i.bf16 %v1687_v55, %v1678_v49  ;;  %v639_v44 = vsel %vm637_vm2, %v1956_v52, %v2128_v43 }
 0x555   :  { %v644_v49 = vmul.f32 %v1882_v42, %v2071_v41  ;;  %v643_v55 = vmul.f32 %v1911_v2, %v2076_v48 }
 0x557   :  { %1389 = vrot.lane.b32.xlu1 %v1388_v56, %s1486_s21  ;;  %v1128_v32 = vpop.permute.xlu0 %1127  ;;  %v1130_v40 = vpop.permute.xlu1 %1129 }
 0x558   :  { %v1142_v23 = vmul.f32 %v1130_v40, %v2001_v26 }
 0x55b   :  { %v1132_v39 = vpop.permute.xlu0 %1131  ;;  %v1134_v63 = vpop.permute.xlu1 %1133 }
 0x55c   :  { %v1143_v26 = vmul.f32 %v1132_v39, %v2037_v29 }
 0x570   :  { %v1004_v12 = vpop.permute.xlu0 %1003  ;;  %v1019_v19 = vpop.permute.xlu1 %1018 }
 0x571   :  { %v1029_v24 = vsel %vm637_vm2, %v1004_v12, %v1019_v19 }
 0x572   :  { %v1054_v62 = vmul.f32 %v1029_v24, %v2192_v50 }
 0x574   :  { %1068 = vrot.lane.b32.xlu1 %v1054_v62, %s1487_s8  ;;  %v739_v53 = vpop.permute.xlu0 %738  ;;  %v1141_v62 = vmul.f32 %v1128_v32, %v2028_v13  ;;  %v1144_v13 = vmul.f32 %v1134_v63, %v2055_v38  ;;  %v638_v38 = vsel %vm637_vm2, %v1983_v34, %v2066_v16  ;;  %v649_v63 = vmul.f32 %v639_v44, %v2176_v14 }
 0x575   :  { %v753_v37 = vadd.f32 %v739_v53, %v723_v57  ;;  %v648_v39 = vmul.f32 %v638_v38, %v2155_v17  ;;  %v645_v14 = vmul.f32 %v1917_v4, %v2093_v54 }
 0x577   :  { %v653_v52 = vadd.f32 %v648_v39, %v643_v55 }
 0x578   :  { %v743_v56 = vpop.permute.xlu0 %742 }
 0x579   :  { %v755_v24 = vadd.f32 %v743_v56, %v725_v31 }
 0x58a   :  { %v1156_v45 = vpop.permute.xlu1 %1155 }
 0x58b   :  { %v1170_v31 = vadd.f32 %v1156_v45, %v1140_v61  ;;  %v640_v45 = vsel %vm637_vm2, %v1985_v35, %v2142_v30  ;;  %v646_v35 = vmul.f32 %v1894_v46, %v2088_v59 }
 0x58c   :  { %v650_v16 = vmul.f32 %v640_v45, %v2163_v21 }
 0x58d   :  { %v656_v21 = vadd.f32 %v2206_v36, %v646_v35 }
 0x58e   :  { %v1160_v20 = vpop.permute.xlu1 %1159 }
 0x58f   :  { %v1172_v28 = vadd.f32 %v1160_v20, %v1142_v23 }
 0x595   :  { %v741_v7 = vpop.permute.xlu1 %740 }
 0x596   :  { %v754_v0 = vadd.f32 %v741_v7, %v724_v25  ;;  %v654_v7 = vadd.f32 %v649_v63, %v644_v49 }
 0x598   :  { %v1393_v12 = vpack.i.bf16 %v754_v0, %v753_v37  ;;  %v659_v48 = vmul.f32 0.17677669, %v654_v7  ;;  %v658_v37 = vmul.f32 0.17677669, %v653_v52  ;;  %v655_v0 = vadd.f32 %v650_v16, %v645_v14 }
 0x599   :  { %v745_v19 = vpop.permute.xlu1 %744 }
 0x59a   :  { %v756_v11 = vadd.f32 %v745_v19, %v726_v22  ;;  %1394 = vrot.lane.b32.xlu0 %v1393_v12, %s1486_s21 }
 0x59c   :  { %v1398_v1 = vpack.i.bf16 %v756_v11, %v755_v24 }
 0x59d   :  { %v1158_v51 = vpop.permute.xlu0 %1157 }
 0x59e   :  { %v1171_v53 = vadd.f32 %v1158_v51, %v1141_v62  ;;  %1399 = vrot.lane.b32.xlu1 %v1398_v1, %s1486_s21  ;;  %v660_v62 = vmul.f32 0.17677669, %v655_v0  ;;  %v661_v51 = vmul.f32 0.17677669, %v656_v21 }
 0x5a0   :  { %v1403_v57 = vpack.i.bf16 %v1172_v28, %v1171_v53 }
 0x5a2   :  { %1404 = vrot.lane.b32.xlu1 %v1403_v57, %s1486_s21 }
 0x5a5   :  { %v747_v22 = vpop.permute.xlu0 %746 }
 0x5a6   :  { %v757_v47 = vadd.f32 %v747_v22, %v727_v6  ;;  %1260 = vrot.lane.b32.xlu1 %v1696_v60, %s1486_s21  ;;  %v642_v6 = vsel %vm637_vm2, %v1987_v10, %v2202_v18 }
 0x5a7   :  { %v652_v61 = vmul.f32 %v642_v6, %v2192_v50 }
 0x5a8   :  { %v1408_v11 = vpack.i.bf16 %v1170_v31, %v757_v47  ;;  %v2360_v31 = vld [vmem:[#allocation3_spill] sm:$0xff]  ;;  %v2361_v47 = vld [vmem:[#allocation2_spill] sm:$0xff] }
 0x5a9   :  { %v1162_v3 = vpop.permute.xlu0 %1161  ;;  %v1164_v32 = vpop.permute.xlu1 %1163 }
 0x5aa   :  { %v1173_v40 = vadd.f32 %v1162_v3, %v1143_v26  ;;  %v1174_v20 = vadd.f32 %v1164_v32, %v1144_v13  ;;  %1409 = vrot.lane.b32.xlu0 %v1408_v11, %s1486_s21  ;;  %v647_v26 = vmul.f32 %v2361_v47, %v2360_v31  ;;  %v2362_v11 = vld [vmem:[#allocation4_spill] sm:$0xff] }
 0x5ac   :  { %v1413_v33 = vpack.i.bf16 %v1174_v20, %v1173_v40  ;;  %v657_v13 = vadd.f32 %v652_v61, %v647_v26 }
 0x5ad   :  { %v1031_v15 = vpop.permute.xlu0 %1030  ;;  %v1033_v60 = vpop.permute.xlu1 %1032 }
 0x5ae   :  { %1414 = vrot.lane.b32.xlu0 %v1413_v33, %s1486_s21  ;;  %v1045_v43 = vmul.f32 %v1031_v15, %v2101_v58  ;;  %v1046_v17 = vmul.f32 %v1033_v60, %v2099_v27  ;;  %v662_v20 = vmul.f32 0.17677669, %v657_v13 }
 0x5b1   :  { %v1035_v29 = vpop.permute.xlu0 %1034  ;;  %v1037_v25 = vpop.permute.xlu1 %1036 }
 0x5b2   :  { %1419 = vrot.lane.b32.xlu0 %v2359_v5, %s1486_s21  ;;  %v1047_v56 = vmul.f32 %v1035_v29, %v2109_v8  ;;  %v1048_v58 = vmul.f32 %v1037_v25, %v2107_v9 }
 0x5b5   :  { %v1039_v34 = vpop.permute.xlu0 %1038 }
 0x5b6   :  { %v1049_v3 = vmul.f32 %v1039_v34, %v2362_v11 }
 0x5c1   :  { %v1063_v42 = vpop.permute.xlu0 %1062  ;;  %v1061_v41 = vpop.permute.xlu1 %1060 }
 0x5c2   :  { %v1076_v30 = vadd.f32 %v1063_v42, %v1046_v17  ;;  %v1075_v2 = vadd.f32 %v1061_v41, %v1045_v43 }
 0x5c4   :  { %v1081_v27 = vmul.f32 0.17677669, %v1076_v30  ;;  %v1080_v12 = vmul.f32 0.17677669, %v1075_v2 }
 0x5c5   :  { %v1067_v4 = vpop.permute.xlu0 %1066  ;;  %v1065_v54 = vpop.permute.xlu1 %1064 }
 0x5c6   :  { %v1176_v46 = vsel %vm380_vm1, %v659_v48, %v1081_v27  ;;  %v1175_v59 = vsel %vm380_vm1, %v658_v37, %v1080_v12  ;;  %v1078_v19 = vadd.f32 %v1067_v4, %v1048_v58  ;;  %v1077_v24 = vadd.f32 %v1065_v54, %v1047_v56 }
 0x5c7   :  { %v1343_v23 = vpack.c.bf16 %v1176_v46, %v1176_v46  ;;  %v1342_v1 = vpack.c.bf16 %v1175_v59, %v1175_v59 }
 0x5c8   :  { %v1083_v36 = vmul.f32 0.17677669, %v1078_v19  ;;  %v1082_v28 = vmul.f32 0.17677669, %v1077_v24 }
 0x5c9   :  { %1203 = vst.msk [vmem:[%s2348_s15 + $0x4] sm:$0xf] %vm1201_vm3, %v1343_v23  ;;  %1202 = vst.msk [vmem:[%s2348_s15] sm:$0xf] %vm1201_vm3, %v1342_v1  ;;  %v1390_v22 = vpop.permute.xlu1 %1389 }
 0x5ca   :  { %v1178_v9 = vsel %vm380_vm1, %v661_v51, %v1083_v36  ;;  %v1177_v8 = vsel %vm380_vm1, %v660_v62, %v1082_v28  ;;  %v1392_v45 = vunpack.i.h.bf16 %v1390_v22  ;;  %v1391_v49 = vunpack.i.l.bf16 %v1390_v22 }
 0x5cb   :  { %v1345_v53 = vpack.c.bf16 %v1178_v9, %v1178_v9  ;;  %v1344_v57 = vpack.c.bf16 %v1177_v8, %v1177_v8 }
 0x5cd   :  { %1205 = vst.msk [vmem:[%s2348_s15 + $0xc] sm:$0xf] %vm1201_vm3, %v1345_v53  ;;  %1204 = vst.msk [vmem:[%s2348_s15 + $0x8] sm:$0xf] %vm1201_vm3, %v1344_v57 }
 0x5e6   :  { %v1069_v32 = vpop.permute.xlu1 %1068 }
 0x5e7   :  { %v1079_v40 = vadd.f32 %v1069_v32, %v1049_v3 }
 0x5e9   :  { %v1084_v33 = vmul.f32 0.17677669, %v1079_v40 }
 0x5eb   :  { %v1179_v15 = vsel %vm380_vm1, %v662_v20, %v1084_v33 }
 0x5ec   :  { %v1346_v5 = vpack.c.bf16 %v1179_v15, %v1179_v15 }
 0x5ee   :  { %1206 = vst.msk [vmem:[%s2348_s15 + $0x10] sm:$0xf] %vm1201_vm3, %v1346_v5 }
 0x60c   :  { %v1395_v18 = vpop.permute.xlu0 %1394 }
 0x60d   :  { %v1397_v29 = vunpack.i.h.bf16 %v1395_v18  ;;  %v1396_v44 = vunpack.i.l.bf16 %v1395_v18 }
 0x610   :  { %v1400_v10 = vpop.permute.xlu1 %1399 }
 0x611   :  { %v1402_v41 = vunpack.i.h.bf16 %v1400_v10  ;;  %v1401_v30 = vunpack.i.l.bf16 %v1400_v10 }
 0x614   :  { %v1405_v50 = vpop.permute.xlu1 %1404 }
 0x615   :  { %v1406_v60 = vunpack.i.l.bf16 %v1405_v50  ;;  %v1407_v17 = vunpack.i.h.bf16 %v1405_v50 }
 0x617   :  { %v1268_v39 = vsel %vm380_vm1, %v1397_v29, %v1406_v60  ;;  %v1269_v56 = vsel %vm380_vm1, %v1401_v30, %v1407_v17 }
 0x618   :  { %v1273_v25 = vsel %vm65_vm0, %v1268_v39, %v1392_v45  ;;  %v1261_v35 = vpop.permute.xlu1 %1260 }
 0x61c   :  { %v1410_v38 = vpop.permute.xlu0 %1409 }
 0x61d   :  { %v1412_v63 = vunpack.i.h.bf16 %v1410_v38  ;;  %v1411_v7 = vunpack.i.l.bf16 %v1410_v38 }
 0x61f   :  { %v1267_v55 = vsel %vm380_vm1, %v1396_v44, %v1412_v63 }
 0x620   :  { %v1272_v34 = vsel %vm65_vm0, %v1267_v55, %v1391_v49  ;;  %v1415_v16 = vpop.permute.xlu0 %1414 }
 0x621   :  { %v1363_v52 = vpack.c.bf16 %v1273_v25, %v1272_v34  ;;  %v1417_v43 = vunpack.i.h.bf16 %v1415_v16  ;;  %v1416_v14 = vunpack.i.l.bf16 %v1415_v16 }
 0x623   :  { %v1271_v42 = vsel %vm380_vm1, %v1411_v7, %v1417_v43  ;;  %1364 = vst [vmem:[%s2349_s16] sm:$0xff] %v1363_v52   ;;  %v1270_v58 = vsel %vm380_vm1, %v1402_v41, %v1416_v14 }
 0x624   :  { %v1276_v2 = vsel %vm65_vm0, %v1271_v42, %v1261_v35  ;;  %v1420_v48 = vpop.permute.xlu0 %1419 }
 0x625   :  { %v1351_v37 = vpack.c.bf16 %v1276_v2, %v1276_v2  ;;  %v1422_v0 = vunpack.i.h.bf16 %v1420_v48  ;;  %v1421_v21 = vunpack.i.l.bf16 %v1420_v48 }
 0x627   :  { %v1274_v27 = vsel %vm65_vm0, %v1269_v56, %v1421_v21  ;;  %v1275_v12 = vsel %vm65_vm0, %v1270_v58, %v1422_v0  ;;  %1302 = vst [vmem:[%s2349_s16 + $0x10] sm:$0xf] %v1351_v37 }
 0x628   :  { %v1368_v4 = vpack.c.bf16 %v1275_v12, %v1274_v27 }
 0x62a   :  { %1371 = vst [vmem:[%s2349_s16 + $0x8] sm:$0xff] %v1368_v4  }

</bundles_post_ra>
